<compile_context>
chip_gen: v7x
topology: tpu7x:2x2x1
jax: 0.10.0
libtpu: 0.0.40
codegen_flags: <defaults>
</compile_context>

<pallas_src>
import functools

import jax
import jax.numpy as jnp
from jax.experimental import pallas as pl
from jax.experimental.pallas import tpu as pltpu

# Tap offsets (ky-1, kx-1) for a 3x3 conv, in (ky, kx) row-major order — this
# matches how the (Cout, Cin, 3, 3) weights are flattened on the host.
TAPS = tuple((sy, sx) for sy in (-1, 0, 1) for sx in (-1, 0, 1))


# --------------------- measurement / AMP kernels (f32) ----------------------

def _measure_init_kernel(xp_ref, phi_ref, y_ref, out_ref):
    """y = phi @ xp ; out0 = phi^T @ y   (patch-transposed, lane-dense cols)."""
    phi = phi_ref[...]                                          # (m, d)
    xp = xp_ref[...]                                            # (d, ct)
    y = jax.lax.dot_general(phi, xp, (((1,), (0,)), ((), ())),
                            preferred_element_type=jnp.float32)  # (m, ct)
    y_ref[...] = y
    out_ref[...] = jax.lax.dot_general(phi, y, (((0,), (0,)), ((), ())),
                                       preferred_element_type=jnp.float32)


def _amp_step_kernel(out_ref, y_ref, phi_ref, new_ref):
    """z = y - phi @ out ; out_new = out + phi^T @ z   (lane-dense columns)."""
    phi = phi_ref[...]                                          # (m, d)
    out_p = out_ref[...]                                        # (d, ct)
    z = y_ref[...] - jax.lax.dot_general(
        phi, out_p, (((1,), (0,)), ((), ())),
        preferred_element_type=jnp.float32)                     # (m, ct)
    new_ref[...] = out_p + jax.lax.dot_general(
        phi, z, (((0,), (0,)), ((), ())),
        preferred_element_type=jnp.float32)                     # (d, ct)


def measure_init(xp_T, phi, col_tile):
    d, NP = xp_T.shape
    m = phi.shape[0]
    return pl.pallas_call(
        _measure_init_kernel,
        out_shape=(jax.ShapeDtypeStruct((m, NP), jnp.float32),
                   jax.ShapeDtypeStruct((d, NP), jnp.float32)),
        grid=(pl.cdiv(NP, col_tile),),
        in_specs=[pl.BlockSpec((d, col_tile), lambda j: (0, j)),
                  pl.BlockSpec((m, d), lambda j: (0, 0))],
        out_specs=(pl.BlockSpec((m, col_tile), lambda j: (0, j)),
                   pl.BlockSpec((d, col_tile), lambda j: (0, j))),
        compiler_params=pltpu.CompilerParams(
            dimension_semantics=("parallel",)),
    )(xp_T, phi)


def amp_step(out_T, y_T, phi, col_tile):
    d, NP = out_T.shape
    m = phi.shape[0]
    return pl.pallas_call(
        _amp_step_kernel,
        out_shape=jax.ShapeDtypeStruct((d, NP), jnp.float32),
        grid=(pl.cdiv(NP, col_tile),),
        in_specs=[pl.BlockSpec((d, col_tile), lambda j: (0, j)),
                  pl.BlockSpec((m, col_tile), lambda j: (0, j)),
                  pl.BlockSpec((m, d), lambda j: (0, 0))],
        out_specs=pl.BlockSpec((d, col_tile), lambda j: (0, j)),
        input_output_aliases={0: 0},        # out_p is read-modify-write
        compiler_params=pltpu.CompilerParams(
            dimension_semantics=("parallel",)),
    )(out_T, y_T, phi)


# ------------------------- fused eta-stage kernel ----------------------------

def _eta_kernel(out_ref, x_ref, mask_ref,
                w1, b1, w2a, b2a, w2b, b2b, w3a, b3a, w3b, b3b, w4, b4,
                o_ref, *, H, W):
    """out = x + BasicBlock(Res(Res(BasicBlock(out)))) on one flattened image.

    Each 3x3 conv: for every tap the (Cin, H*W) activation is rolled along the
    lane axis, boundary-masked (precomputed 0/1 mask kills the roll wraparound
    and the zero padding), cast to bf16 and accumulated through the MXU
    against the (Cout, Cin) tap weights in f32.
    """
    HW = H * W
    mask = mask_ref[...]                                        # (9, HW) f32

    def conv(a, w_ref, b_ref, relu):
        # a: (Cin, HW) f32 value; w_ref: (9, Cout, Cin) bf16 (tap-major).
        cin = a.shape[0]
        acc = None
        for t, (sy, sx) in enumerate(TAPS):
            delta = sy * W + sx                                 # static int
            if delta == 0:
                sh = a                                          # center tap: mask is all-ones
            else:
                sh = pltpu.roll(a, shift=(-delta) % HW, axis=1)
                sh = sh * mask[t:t + 1, :]                      # zero OOB / wrapped pixels
            if cin == 1:
                # Depth-1 input: the conv is a weighted sum of shifted images
                # -> plain VPU broadcast multiply, no K=1 MXU matmul needed.
                contrib = w_ref[t].astype(jnp.float32) * sh     # (Cout,1)*(1,HW)
            else:
                contrib = jax.lax.dot_general(
                    w_ref[t], sh.astype(jnp.bfloat16),
                    (((1,), (0,)), ((), ())),
                    preferred_element_type=jnp.float32)         # (Cout, HW)
            acc = contrib if acc is None else acc + contrib
        acc = acc + b_ref[...]                                  # (Cout, 1) f32 bias
        return jnp.maximum(acc, 0.0) if relu else acc

    a0 = out_ref[0]                                             # (1, HW) f32
    h = conv(a0, w1, b1, relu=True)                             # BasicBlock(in -> n)
    h = h + conv(conv(h, w2a, b2a, True), w2b, b2b, False)      # ResidualBlock(n)
    h = h + conv(conv(h, w3a, b3a, True), w3b, b3b, False)      # ResidualBlock(n)
    o = conv(h, w4, b4, relu=True)                              # BasicBlock(n -> in)
    o_ref[0] = x_ref[0] + o                                     # learned-Onsager skip


def eta_stage(out_flat, x_flat, mask9, p, *, H, W):
    """Run one fused eta stage.  out_flat / x_flat: (N, 1, H*W) f32."""
    N = out_flat.shape[0]
    HW = H * W
    nc = p['rb1a'][0].shape[1]                                  # n_channels

    weight_args = (p['bb1'][0], p['bb1'][1],
                   p['rb1a'][0], p['rb1a'][1],
                   p['rb1b'][0], p['rb1b'][1],
                   p['rb2a'][0], p['rb2a'][1],
                   p['rb2b'][0], p['rb2b'][1],
                   p['bb2'][0], p['bb2'][1])

    img_spec = pl.BlockSpec((1, 1, HW), lambda n: (n, 0, 0))

    def full_spec(arr):
        return pl.BlockSpec(arr.shape, lambda n, _nd=arr.ndim: (0,) * _nd)

    flops = 2 * N * HW * 9 * (2 * nc + 4 * nc * nc)
    bytes_accessed = 4 * (3 * N * HW + 9 * HW) + sum(
        int(a.size) * a.dtype.itemsize for a in weight_args)

    return pl.pallas_call(
        functools.partial(_eta_kernel, H=H, W=W),
        out_shape=jax.ShapeDtypeStruct((N, 1, HW), jnp.float32),
        grid=(N,),
        in_specs=[img_spec, img_spec, full_spec(mask9)]
                 + [full_spec(a) for a in weight_args],
        out_specs=img_spec,
        compiler_params=pltpu.CompilerParams(
            dimension_semantics=("parallel",)),
        cost_estimate=pl.CostEstimate(flops=flops, transcendentals=0,
                                      bytes_accessed=bytes_accessed),
    )(out_flat, x_flat, mask9, *weight_args)


# ------------------------------ host-side glue -------------------------------

def _to_patches_T(img, s):
    """(N, 1, H, W) -> (s*s, N*Hp*Wp); row index k = i*s + j inside a patch."""
    N, C, H, W = img.shape
    Hp, Wp = H // s, W // s
    t = img[:, 0].reshape(N, Hp, s, Wp, s)                      # (n, hp, i, wp, j)
    return t.transpose(2, 4, 0, 1, 3).reshape(s * s, N * Hp * Wp)


def _from_patches_T(p, N, H, W, s):
    """Inverse of _to_patches_T -> (N, 1, H*W).  Exactly PixelShuffle(s)."""
    Hp, Wp = H // s, W // s
    t = p.reshape(s, s, N, Hp, Wp).transpose(2, 3, 0, 4, 1)     # (n, hp, i, wp, j)
    return t.reshape(N, 1, H * W)


def _make_tap_masks(H, W):
    """(9, H*W) 0/1 masks: 1 where the 3x3 tap's source pixel is in-bounds."""
    y = jnp.arange(H, dtype=jnp.int32)[:, None]
    x = jnp.arange(W, dtype=jnp.int32)[None, :]
    rows = []
    for sy, sx in TAPS:
        valid = ((y + sy >= 0) & (y + sy < H) & (x + sx >= 0) & (x + sx < W))
        rows.append(valid.reshape(-1))
    return jnp.stack(rows, axis=0).astype(jnp.float32)


def _prepare_eta_params(p):
    """(Cout,Cin,3,3) f32 weights -> tap-major (9,Cout,Cin) bf16 + (Cout,1) f32 bias."""
    def prep(wb):
        w, b = wb
        cout, cin = w.shape[0], w.shape[1]
        wf = w.transpose(2, 3, 0, 1).reshape(9, cout, cin).astype(jnp.bfloat16)
        bf = b.reshape(cout, 1).astype(jnp.float32)
        return wf, bf
    return {k: prep(p[k]) for k in ('bb1', 'rb1a', 'rb1b', 'rb2a', 'rb2b', 'bb2')}


def loamp_forward(x, params, *, scale, stages):
    N, C, H, W = x.shape
    assert C == 1, "reference LOAMP back-projection assumes in_channels == 1"
    assert H % scale == 0 and W % scale == 0
    s = scale
    HW = H * W
    phi = params['measurement'].astype(jnp.float32)             # (cs, s*s)

    x_f32 = x.astype(jnp.float32)
    x_flat = x_f32.reshape(N, 1, HW)
    mask9 = _make_tap_masks(H, W)
    eta_params = [_prepare_eta_params(p) for p in params['eta']]

    xp_T = _to_patches_T(x_f32, s)                              # (d, NP)
    NP = xp_T.shape[1]
    # Column tile for the AMP/measurement kernels: whole extent when small,
    # otherwise 2048-wide lane-aligned chunks (double-buffered footprint stays
    # far under v7x's 64 MiB VMEM; v5e/v6e have headroom to spare).
    col_tile = NP if NP <= 4096 else 2048

    # y = conv(x, phi, stride=s);  out0 = shuffle(conv(y, phi^T, 1x1))  (fused).
    y_T, out_T = measure_init(xp_T, phi, col_tile)

    out_flat = None
    for i in range(stages):
        out_T = amp_step(out_T, y_T, phi, col_tile)             # z = y - Phi out ; out += Phi^T z
        out_flat = _from_patches_T(out_T, N, H, W, s)           # (N, 1, HW)
        out_flat = eta_stage(out_flat, x_flat, mask9, eta_params[i], H=H, W=W)
        if i + 1 < stages:                                      # skip re-patch after last stage
            out_T = _to_patches_T(out_flat.reshape(N, 1, H, W), s)

    if out_flat is None:                                        # stages == 0
        out_flat = _from_patches_T(out_T, N, H, W, s)
    return out_flat.reshape(N, 1, H, W)


def init_params(key, in_channels, cs_channels, n_channels, stages, scale):
    d = scale * scale * in_channels
    keys = jax.random.split(key, 1 + stages * 6)
    measurement = jax.random.normal(keys[0], (cs_channels, d), jnp.float32)

    def conv_init(k, cout, cin):
        w = jax.random.normal(k, (cout, cin, 3, 3), jnp.float32) * 0.1
        b = jnp.zeros((cout,), jnp.float32)
        return (w, b)

    etas = []
    ki = 1
    for _ in range(stages):
        etas.append({
            'bb1':  conv_init(keys[ki + 0], n_channels, in_channels),
            'rb1a': conv_init(keys[ki + 1], n_channels, n_channels),
            'rb1b': conv_init(keys[ki + 2], n_channels, n_channels),
            'rb2a': conv_init(keys[ki + 3], n_channels, n_channels),
            'rb2b': conv_init(keys[ki + 4], n_channels, n_channels),
            'bb2':  conv_init(keys[ki + 5], in_channels, n_channels),
        })
        ki += 6
    return {'measurement': measurement, 'eta': etas}


if __name__ == "__main__":
    in_channels, cs_channels, n_channels, stages, scale = 1, 8, 8, 2, 4
    N, H, W = 2, 16, 16

    key = jax.random.PRNGKey(0)
    kx, kp = jax.random.split(key)
    x = jax.random.normal(kx, (N, in_channels, H, W), jnp.float32)
    params = init_params(kp, in_channels, cs_channels, n_channels, stages, scale)

    fwd = jax.jit(functools.partial(loamp_forward, scale=scale, stages=stages))
    out = fwd(x, params)
    jax.block_until_ready(out)
    assert out.shape == (N, in_channels, H, W), out.shape
    assert out.dtype == jnp.float32
    print("KERNEL_OK")
</pallas_src>

<mosaic_0001>
module attributes {stable_mosaic.version = 11 : i64} {
  func.func @_amp_step_kernel(%arg0: i32, %arg1: memref<16x32xf32, #tpu.memory_space<vmem>>, %arg2: memref<8x32xf32, #tpu.memory_space<vmem>>, %arg3: memref<8x16xf32, #tpu.memory_space<vmem>>, %arg4: memref<16x32xf32, #tpu.memory_space<vmem>>) attributes {dimension_semantics = [#tpu.dimension_semantics<parallel>], iteration_bounds = array<i64: 1>, scalar_prefetch = 0 : i64, scratch_operands = 0 : i64, tpu.core_type = #tpu.core_type<tc>, window_params = [{transform_indices = @transform_0, window_bounds = array<i64: 16, 32>}, {transform_indices = @transform_1, window_bounds = array<i64: 8, 32>}, {pipeline_mode = #tpu.pipeline_mode<synchronous>, transform_indices = @transform_2, window_bounds = array<i64: 8, 16>}, {transform_indices = @transform_3, window_bounds = array<i64: 16, 32>}]} {
    %c0 = arith.constant 0 : index
    %c0_0 = arith.constant 0 : index
    %0 = vector.load %arg3[%c0, %c0_0] : memref<8x16xf32, #tpu.memory_space<vmem>>, vector<8x16xf32>
    %c0_1 = arith.constant 0 : index
    %c0_2 = arith.constant 0 : index
    %1 = vector.load %arg1[%c0_1, %c0_2] : memref<16x32xf32, #tpu.memory_space<vmem>>, vector<16x32xf32>
    %c0_3 = arith.constant 0 : index
    %c0_4 = arith.constant 0 : index
    %2 = vector.load %arg2[%c0_3, %c0_4] : memref<8x32xf32, #tpu.memory_space<vmem>>, vector<8x32xf32>
    %cst = arith.constant dense<0.000000e+00> : vector<8x32xf32>
    %3 = tpu.matmul %0, %1, %cst {dimension_numbers = #tpu.dot_dimension_numbers<[1], [0], [0], [1], [0, 0, 1, 1], [], []>} : vector<8x16xf32>, vector<16x32xf32>, vector<8x32xf32> -> vector<8x32xf32>
    %4 = arith.subf %2, %3 : vector<8x32xf32>
    %cst_5 = arith.constant dense<0.000000e+00> : vector<16x32xf32>
    %5 = tpu.matmul %0, %4, %cst_5 {dimension_numbers = #tpu.dot_dimension_numbers<[0], [0], [1], [1], [0, 1, 1, 1], [], []>} : vector<8x16xf32>, vector<8x32xf32>, vector<16x32xf32> -> vector<16x32xf32>
    %6 = arith.addf %1, %5 : vector<16x32xf32>
    %c0_6 = arith.constant 0 : index
    %c0_7 = arith.constant 0 : index
    %7 = vector.load %arg4[%c0_6, %c0_7] : memref<16x32xf32, #tpu.memory_space<vmem>>, vector<16x32xf32>
    tpu.vector_store %arg4[%c0_6, %c0_7], %6 {strides = array<i32>} : memref<16x32xf32, #tpu.memory_space<vmem>>, vector<16x32xf32>,
    return
  }
  func.func @transform_0(%arg0: i32) -> (i32, i32) {
    %c0_i32 = arith.constant 0 : i32
    %c0_i32_0 = arith.constant 0 : i32
    return %c0_i32, %arg0 : i32, i32
  }
  func.func @transform_1(%arg0: i32) -> (i32, i32) {
    %c0_i32 = arith.constant 0 : i32
    %c0_i32_0 = arith.constant 0 : i32
    return %c0_i32, %arg0 : i32, i32
  }
  func.func @transform_2(%arg0: i32) -> (i32, i32) {
    %c0_i32 = arith.constant 0 : i32
    %c0_i32_0 = arith.constant 0 : i32
    %c0_i32_1 = arith.constant 0 : i32
    return %c0_i32, %c0_i32_0 : i32, i32
  }
  func.func @transform_3(%arg0: i32) -> (i32, i32) {
    %c0_i32 = arith.constant 0 : i32
    %c0_i32_0 = arith.constant 0 : i32
    return %c0_i32, %arg0 : i32, i32
  }
}

module attributes {stable_mosaic.version = 11 : i64} {
  func.func @_measure_init_kernel(%arg0: i32, %arg1: memref<16x32xf32, #tpu.memory_space<vmem>>, %arg2: memref<8x16xf32, #tpu.memory_space<vmem>>, %arg3: memref<8x32xf32, #tpu.memory_space<vmem>>, %arg4: memref<16x32xf32, #tpu.memory_space<vmem>>) attributes {dimension_semantics = [#tpu.dimension_semantics<parallel>], iteration_bounds = array<i64: 1>, scalar_prefetch = 0 : i64, scratch_operands = 0 : i64, tpu.core_type = #tpu.core_type<tc>, window_params = [{transform_indices = @transform_0, window_bounds = array<i64: 16, 32>}, {pipeline_mode = #tpu.pipeline_mode<synchronous>, transform_indices = @transform_1, window_bounds = array<i64: 8, 16>}, {transform_indices = @transform_2, window_bounds = array<i64: 8, 32>}, {transform_indices = @transform_3, window_bounds = array<i64: 16, 32>}]} {
    %c0 = arith.constant 0 : index
    %c0_0 = arith.constant 0 : index
    %0 = vector.load %arg2[%c0, %c0_0] : memref<8x16xf32, #tpu.memory_space<vmem>>, vector<8x16xf32>
    %c0_1 = arith.constant 0 : index
    %c0_2 = arith.constant 0 : index
    %1 = vector.load %arg1[%c0_1, %c0_2] : memref<16x32xf32, #tpu.memory_space<vmem>>, vector<16x32xf32>
    %cst = arith.constant dense<0.000000e+00> : vector<8x32xf32>
    %2 = tpu.matmul %0, %1, %cst {dimension_numbers = #tpu.dot_dimension_numbers<[1], [0], [0], [1], [0, 0, 1, 1], [], []>} : vector<8x16xf32>, vector<16x32xf32>, vector<8x32xf32> -> vector<8x32xf32>
    %c0_3 = arith.constant 0 : index
    %c0_4 = arith.constant 0 : index
    %3 = vector.load %arg3[%c0_3, %c0_4] : memref<8x32xf32, #tpu.memory_space<vmem>>, vector<8x32xf32>
    tpu.vector_store %arg3[%c0_3, %c0_4], %2 {strides = array<i32>} : memref<8x32xf32, #tpu.memory_space<vmem>>, vector<8x32xf32>,
    %cst_5 = arith.constant dense<0.000000e+00> : vector<16x32xf32>
    %4 = tpu.matmul %0, %2, %cst_5 {dimension_numbers = #tpu.dot_dimension_numbers<[0], [0], [1], [1], [0, 1, 1, 1], [], []>} : vector<8x16xf32>, vector<8x32xf32>, vector<16x32xf32> -> vector<16x32xf32>
    %c0_6 = arith.constant 0 : index
    %c0_7 = arith.constant 0 : index
    %5 = vector.load %arg4[%c0_6, %c0_7] : memref<16x32xf32, #tpu.memory_space<vmem>>, vector<16x32xf32>
    tpu.vector_store %arg4[%c0_6, %c0_7], %4 {strides = array<i32>} : memref<16x32xf32, #tpu.memory_space<vmem>>, vector<16x32xf32>,
    return
  }
  func.func @transform_0(%arg0: i32) -> (i32, i32) {
    %c0_i32 = arith.constant 0 : i32
    %c0_i32_0 = arith.constant 0 : i32
    return %c0_i32, %arg0 : i32, i32
  }
  func.func @transform_1(%arg0: i32) -> (i32, i32) {
    %c0_i32 = arith.constant 0 : i32
    %c0_i32_0 = arith.constant 0 : i32
    %c0_i32_1 = arith.constant 0 : i32
    return %c0_i32, %c0_i32_0 : i32, i32
  }
  func.func @transform_2(%arg0: i32) -> (i32, i32) {
    %c0_i32 = arith.constant 0 : i32
    %c0_i32_0 = arith.constant 0 : i32
    return %c0_i32, %arg0 : i32, i32
  }
  func.func @transform_3(%arg0: i32) -> (i32, i32) {
    %c0_i32 = arith.constant 0 : i32
    %c0_i32_0 = arith.constant 0 : i32
    return %c0_i32, %arg0 : i32, i32
  }
}

module attributes {stable_mosaic.version = 11 : i64} {
  func.func @_eta_kernel(%arg0: i32, %arg1: memref<1x1x256xf32, #tpu.memory_space<vmem>>, %arg2: memref<1x1x256xf32, #tpu.memory_space<vmem>>, %arg3: memref<9x256xf32, #tpu.memory_space<vmem>>, %arg4: memref<9x8x1xbf16, #tpu.memory_space<vmem>>, %arg5: memref<8x1xf32, #tpu.memory_space<vmem>>, %arg6: memref<9x8x8xbf16, #tpu.memory_space<vmem>>, %arg7: memref<8x1xf32, #tpu.memory_space<vmem>>, %arg8: memref<9x8x8xbf16, #tpu.memory_space<vmem>>, %arg9: memref<8x1xf32, #tpu.memory_space<vmem>>, %arg10: memref<9x8x8xbf16, #tpu.memory_space<vmem>>, %arg11: memref<8x1xf32, #tpu.memory_space<vmem>>, %arg12: memref<9x8x8xbf16, #tpu.memory_space<vmem>>, %arg13: memref<8x1xf32, #tpu.memory_space<vmem>>, %arg14: memref<9x1x8xbf16, #tpu.memory_space<vmem>>, %arg15: memref<1x1xf32, #tpu.memory_space<vmem>>, %arg16: memref<1x1x256xf32, #tpu.memory_space<vmem>>) attributes {dimension_semantics = [#tpu.dimension_semantics<parallel>], iteration_bounds = array<i64: 2>, scalar_prefetch = 0 : i64, scratch_operands = 0 : i64, tpu.core_type = #tpu.core_type<tc>, window_params = [{transform_indices = @transform_0, window_bounds = array<i64: 1, 1, 256>}, {transform_indices = @transform_1, window_bounds = array<i64: 1, 1, 256>}, {pipeline_mode = #tpu.pipeline_mode<synchronous>, transform_indices = @transform_2, window_bounds = array<i64: 9, 256>}, {pipeline_mode = #tpu.pipeline_mode<synchronous>, transform_indices = @transform_3, window_bounds = array<i64: 9, 8, 1>}, {pipeline_mode = #tpu.pipeline_mode<synchronous>, transform_indices = @transform_4, window_bounds = array<i64: 8, 1>}, {pipeline_mode = #tpu.pipeline_mode<synchronous>, transform_indices = @transform_5, window_bounds = array<i64: 9, 8, 8>}, {pipeline_mode = #tpu.pipeline_mode<synchronous>, transform_indices = @transform_6, window_bounds = array<i64: 8, 1>}, {pipeline_mode = #tpu.pipeline_mode<synchronous>, transform_indices = @transform_7, window_bounds = array<i64: 9, 8, 8>}, {pipeline_mode = #tpu.pipeline_mode<synchronous>, transform_indices = @transform_8, window_bounds = array<i64: 8, 1>}, {pipeline_mode = #tpu.pipeline_mode<synchronous>, transform_indices = @transform_9, window_bounds = array<i64: 9, 8, 8>}, {pipeline_mode = #tpu.pipeline_mode<synchronous>, transform_indices = @transform_10, window_bounds = array<i64: 8, 1>}, {pipeline_mode = #tpu.pipeline_mode<synchronous>, transform_indices = @transform_11, window_bounds = array<i64: 9, 8, 8>}, {pipeline_mode = #tpu.pipeline_mode<synchronous>, transform_indices = @transform_12, window_bounds = array<i64: 8, 1>}, {pipeline_mode = #tpu.pipeline_mode<synchronous>, transform_indices = @transform_13, window_bounds = array<i64: 9, 1, 8>}, {pipeline_mode = #tpu.pipeline_mode<synchronous>, transform_indices = @transform_14, window_bounds = array<i64: 1, 1>}, {transform_indices = @transform_15, window_bounds = array<i64: 1, 1, 256>}]} {
    %c0 = arith.constant 0 : index
    %c0_0 = arith.constant 0 : index
    %0 = vector.load %arg3[%c0, %c0_0] : memref<9x256xf32, #tpu.memory_space<vmem>>, vector<9x256xf32>
    %c0_1 = arith.constant 0 : index
    %c0_2 = arith.constant 0 : index
    %c0_3 = arith.constant 0 : index
    %1 = vector.load %arg1[%c0_1, %c0_2, %c0_3] : memref<1x1x256xf32, #tpu.memory_space<vmem>>, vector<1x1x256xf32>
    %2 = vector.shape_cast %1 : vector<1x1x256xf32> to vector<1x256xf32>
    %c17_i32 = arith.constant 17 : i32
    %3 = tpu.dynamic_rotate %2 by %c17_i32 dim 1 : vector<1x256xf32>, i32 -> vector<1x256xf32>
    %4 = vector.extract_strided_slice %0 {offsets = [0, 0], sizes = [1, 256], strides = [1, 1]} : vector<9x256xf32> to vector<1x256xf32>
    %5 = arith.mulf %3, %4 : vector<1x256xf32>
    %c0_4 = arith.constant 0 : index
    %c0_5 = arith.constant 0 : index
    %c0_6 = arith.constant 0 : index
    %6 = vector.load %arg4[%c0_4, %c0_5, %c0_6] : memref<9x8x1xbf16, #tpu.memory_space<vmem>>, vector<1x8x1xbf16>
    %7 = vector.shape_cast %6 : vector<1x8x1xbf16> to vector<8x1xbf16>
    %8 = arith.extf %7 : vector<8x1xbf16> to vector<8x1xf32>
    %9 = vector.broadcast %8 : vector<8x1xf32> to vector<8x256xf32>
    %10 = vector.broadcast %5 : vector<1x256xf32> to vector<8x256xf32>
    %11 = arith.mulf %9, %10 : vector<8x256xf32>
    %c16_i32 = arith.constant 16 : i32
    %12 = tpu.dynamic_rotate %2 by %c16_i32 dim 1 : vector<1x256xf32>, i32 -> vector<1x256xf32>
    %13 = vector.extract_strided_slice %0 {offsets = [1, 0], sizes = [1, 256], strides = [1, 1]} : vector<9x256xf32> to vector<1x256xf32>
    %14 = arith.mulf %12, %13 : vector<1x256xf32>
    %c1 = arith.constant 1 : index
    %c0_7 = arith.constant 0 : index
    %c0_8 = arith.constant 0 : index
    %15 = vector.load %arg4[%c1, %c0_7, %c0_8] : memref<9x8x1xbf16, #tpu.memory_space<vmem>>, vector<1x8x1xbf16>
    %16 = vector.shape_cast %15 : vector<1x8x1xbf16> to vector<8x1xbf16>
    %17 = arith.extf %16 : vector<8x1xbf16> to vector<8x1xf32>
    %18 = vector.broadcast %17 : vector<8x1xf32> to vector<8x256xf32>
    %19 = vector.broadcast %14 : vector<1x256xf32> to vector<8x256xf32>
    %20 = arith.mulf %18, %19 : vector<8x256xf32>
    %21 = arith.addf %11, %20 : vector<8x256xf32>
    %c15_i32 = arith.constant 15 : i32
    %22 = tpu.dynamic_rotate %2 by %c15_i32 dim 1 : vector<1x256xf32>, i32 -> vector<1x256xf32>
    %23 = vector.extract_strided_slice %0 {offsets = [2, 0], sizes = [1, 256], strides = [1, 1]} : vector<9x256xf32> to vector<1x256xf32>
    %24 = arith.mulf %22, %23 : vector<1x256xf32>
    %c2 = arith.constant 2 : index
    %c0_9 = arith.constant 0 : index
    %c0_10 = arith.constant 0 : index
    %25 = vector.load %arg4[%c2, %c0_9, %c0_10] : memref<9x8x1xbf16, #tpu.memory_space<vmem>>, vector<1x8x1xbf16>
    %26 = vector.shape_cast %25 : vector<1x8x1xbf16> to vector<8x1xbf16>
    %27 = arith.extf %26 : vector<8x1xbf16> to vector<8x1xf32>
    %28 = vector.broadcast %27 : vector<8x1xf32> to vector<8x256xf32>
    %29 = vector.broadcast %24 : vector<1x256xf32> to vector<8x256xf32>
    %30 = arith.mulf %28, %29 : vector<8x256xf32>
    %31 = arith.addf %21, %30 : vector<8x256xf32>
    %c1_i32 = arith.constant 1 : i32
    %32 = tpu.dynamic_rotate %2 by %c1_i32 dim 1 : vector<1x256xf32>, i32 -> vector<1x256xf32>
    %33 = vector.extract_strided_slice %0 {offsets = [3, 0], sizes = [1, 256], strides = [1, 1]} : vector<9x256xf32> to vector<1x256xf32>
    %34 = arith.mulf %32, %33 : vector<1x256xf32>
    %c3 = arith.constant 3 : index
    %c0_11 = arith.constant 0 : index
    %c0_12 = arith.constant 0 : index
    %35 = vector.load %arg4[%c3, %c0_11, %c0_12] : memref<9x8x1xbf16, #tpu.memory_space<vmem>>, vector<1x8x1xbf16>
    %36 = vector.shape_cast %35 : vector<1x8x1xbf16> to vector<8x1xbf16>
    %37 = arith.extf %36 : vector<8x1xbf16> to vector<8x1xf32>
    %38 = vector.broadcast %37 : vector<8x1xf32> to vector<8x256xf32>
    %39 = vector.broadcast %34 : vector<1x256xf32> to vector<8x256xf32>
    %40 = arith.mulf %38, %39 : vector<8x256xf32>
    %41 = arith.addf %31, %40 : vector<8x256xf32>
    %c4 = arith.constant 4 : index
    %c0_13 = arith.constant 0 : index
    %c0_14 = arith.constant 0 : index
    %42 = vector.load %arg4[%c4, %c0_13, %c0_14] : memref<9x8x1xbf16, #tpu.memory_space<vmem>>, vector<1x8x1xbf16>
    %43 = vector.shape_cast %42 : vector<1x8x1xbf16> to vector<8x1xbf16>
    %44 = arith.extf %43 : vector<8x1xbf16> to vector<8x1xf32>
    %45 = vector.broadcast %44 : vector<8x1xf32> to vector<8x256xf32>
    %46 = vector.broadcast %2 : vector<1x256xf32> to vector<8x256xf32>
    %47 = arith.mulf %45, %46 : vector<8x256xf32>
    %48 = arith.addf %41, %47 : vector<8x256xf32>
    %c255_i32 = arith.constant 255 : i32
    %49 = tpu.dynamic_rotate %2 by %c255_i32 dim 1 : vector<1x256xf32>, i32 -> vector<1x256xf32>
    %50 = vector.extract_strided_slice %0 {offsets = [5, 0], sizes = [1, 256], strides = [1, 1]} : vector<9x256xf32> to vector<1x256xf32>
    %51 = arith.mulf %49, %50 : vector<1x256xf32>
    %c5 = arith.constant 5 : index
    %c0_15 = arith.constant 0 : index
    %c0_16 = arith.constant 0 : index
    %52 = vector.load %arg4[%c5, %c0_15, %c0_16] : memref<9x8x1xbf16, #tpu.memory_space<vmem>>, vector<1x8x1xbf16>
    %53 = vector.shape_cast %52 : vector<1x8x1xbf16> to vector<8x1xbf16>
    %54 = arith.extf %53 : vector<8x1xbf16> to vector<8x1xf32>
    %55 = vector.broadcast %54 : vector<8x1xf32> to vector<8x256xf32>
    %56 = vector.broadcast %51 : vector<1x256xf32> to vector<8x256xf32>
    %57 = arith.mulf %55, %56 : vector<8x256xf32>
    %58 = arith.addf %48, %57 : vector<8x256xf32>
    %c241_i32 = arith.constant 241 : i32
    %59 = tpu.dynamic_rotate %2 by %c241_i32 dim 1 : vector<1x256xf32>, i32 -> vector<1x256xf32>
    %60 = vector.extract_strided_slice %0 {offsets = [6, 0], sizes = [1, 256], strides = [1, 1]} : vector<9x256xf32> to vector<1x256xf32>
    %61 = arith.mulf %59, %60 : vector<1x256xf32>
    %c6 = arith.constant 6 : index
    %c0_17 = arith.constant 0 : index
    %c0_18 = arith.constant 0 : index
    %62 = vector.load %arg4[%c6, %c0_17, %c0_18] : memref<9x8x1xbf16, #tpu.memory_space<vmem>>, vector<1x8x1xbf16>
    %63 = vector.shape_cast %62 : vector<1x8x1xbf16> to vector<8x1xbf16>
    %64 = arith.extf %63 : vector<8x1xbf16> to vector<8x1xf32>
    %65 = vector.broadcast %64 : vector<8x1xf32> to vector<8x256xf32>
    %66 = vector.broadcast %61 : vector<1x256xf32> to vector<8x256xf32>
    %67 = arith.mulf %65, %66 : vector<8x256xf32>
    %68 = arith.addf %58, %67 : vector<8x256xf32>
    %c240_i32 = arith.constant 240 : i32
    %69 = tpu.dynamic_rotate %2 by %c240_i32 dim 1 : vector<1x256xf32>, i32 -> vector<1x256xf32>
    %70 = vector.extract_strided_slice %0 {offsets = [7, 0], sizes = [1, 256], strides = [1, 1]} : vector<9x256xf32> to vector<1x256xf32>
    %71 = arith.mulf %69, %70 : vector<1x256xf32>
    %c7 = arith.constant 7 : index
    %c0_19 = arith.constant 0 : index
    %c0_20 = arith.constant 0 : index
    %72 = vector.load %arg4[%c7, %c0_19, %c0_20] : memref<9x8x1xbf16, #tpu.memory_space<vmem>>, vector<1x8x1xbf16>
    %73 = vector.shape_cast %72 : vector<1x8x1xbf16> to vector<8x1xbf16>
    %74 = arith.extf %73 : vector<8x1xbf16> to vector<8x1xf32>
    %75 = vector.broadcast %74 : vector<8x1xf32> to vector<8x256xf32>
    %76 = vector.broadcast %71 : vector<1x256xf32> to vector<8x256xf32>
    %77 = arith.mulf %75, %76 : vector<8x256xf32>
    %78 = arith.addf %68, %77 : vector<8x256xf32>
    %c239_i32 = arith.constant 239 : i32
    %79 = tpu.dynamic_rotate %2 by %c239_i32 dim 1 : vector<1x256xf32>, i32 -> vector<1x256xf32>
    %80 = vector.extract_strided_slice %0 {offsets = [8, 0], sizes = [1, 256], strides = [1, 1]} : vector<9x256xf32> to vector<1x256xf32>
    %81 = arith.mulf %79, %80 : vector<1x256xf32>
    %c8 = arith.constant 8 : index
    %c0_21 = arith.constant 0 : index
    %c0_22 = arith.constant 0 : index
    %82 = vector.load %arg4[%c8, %c0_21, %c0_22] : memref<9x8x1xbf16, #tpu.memory_space<vmem>>, vector<1x8x1xbf16>
    %83 = vector.shape_cast %82 : vector<1x8x1xbf16> to vector<8x1xbf16>
    %84 = arith.extf %83 : vector<8x1xbf16> to vector<8x1xf32>
    %85 = vector.broadcast %84 : vector<8x1xf32> to vector<8x256xf32>
    %86 = vector.broadcast %81 : vector<1x256xf32> to vector<8x256xf32>
    %87 = arith.mulf %85, %86 : vector<8x256xf32>
    %88 = arith.addf %78, %87 : vector<8x256xf32>
    %c0_23 = arith.constant 0 : index
    %c0_24 = arith.constant 0 : index
    %89 = vector.load %arg5[%c0_23, %c0_24] : memref<8x1xf32, #tpu.memory_space<vmem>>, vector<8x1xf32>
    %90 = vector.broadcast %89 : vector<8x1xf32> to vector<8x256xf32>
    %91 = arith.addf %88, %90 : vector<8x256xf32>
    %cst = arith.constant 0.000000e+00 : f32
    %92 = vector.broadcast %cst : f32 to vector<8x256xf32>
    %93 = arith.maximumf %91, %92 : vector<8x256xf32>
    %c17_i32_25 = arith.constant 17 : i32
    %94 = tpu.dynamic_rotate %93 by %c17_i32_25 dim 1 : vector<8x256xf32>, i32 -> vector<8x256xf32>
    %95 = vector.extract_strided_slice %0 {offsets = [0, 0], sizes = [1, 256], strides = [1, 1]} : vector<9x256xf32> to vector<1x256xf32>
    %96 = vector.broadcast %95 : vector<1x256xf32> to vector<8x256xf32>
    %97 = arith.mulf %94, %96 : vector<8x256xf32>
    %c0_26 = arith.constant 0 : index
    %c0_27 = arith.constant 0 : index
    %c0_28 = arith.constant 0 : index
    %98 = vector.load %arg6[%c0_26, %c0_27, %c0_28] : memref<9x8x8xbf16, #tpu.memory_space<vmem>>, vector<1x8x8xbf16>
    %99 = vector.shape_cast %98 : vector<1x8x8xbf16> to vector<8x8xbf16>
    %100 = arith.truncf %97 : vector<8x256xf32> to vector<8x256xbf16>
    %cst_29 = arith.constant dense<0.000000e+00> : vector<8x256xf32>
    %101 = tpu.matmul %99, %100, %cst_29 {dimension_numbers = #tpu.dot_dimension_numbers<[1], [0], [0], [1], [0, 0, 1, 1], [], []>} : vector<8x8xbf16>, vector<8x256xbf16>, vector<8x256xf32> -> vector<8x256xf32>
    %c16_i32_30 = arith.constant 16 : i32
    %102 = tpu.dynamic_rotate %93 by %c16_i32_30 dim 1 : vector<8x256xf32>, i32 -> vector<8x256xf32>
    %103 = vector.extract_strided_slice %0 {offsets = [1, 0], sizes = [1, 256], strides = [1, 1]} : vector<9x256xf32> to vector<1x256xf32>
    %104 = vector.broadcast %103 : vector<1x256xf32> to vector<8x256xf32>
    %105 = arith.mulf %102, %104 : vector<8x256xf32>
    %c1_31 = arith.constant 1 : index
    %c0_32 = arith.constant 0 : index
    %c0_33 = arith.constant 0 : index
    %106 = vector.load %arg6[%c1_31, %c0_32, %c0_33] : memref<9x8x8xbf16, #tpu.memory_space<vmem>>, vector<1x8x8xbf16>
    %107 = vector.shape_cast %106 : vector<1x8x8xbf16> to vector<8x8xbf16>
    %108 = arith.truncf %105 : vector<8x256xf32> to vector<8x256xbf16>
    %cst_34 = arith.constant dense<0.000000e+00> : vector<8x256xf32>
    %109 = tpu.matmul %107, %108, %cst_34 {dimension_numbers = #tpu.dot_dimension_numbers<[1], [0], [0], [1], [0, 0, 1, 1], [], []>} : vector<8x8xbf16>, vector<8x256xbf16>, vector<8x256xf32> -> vector<8x256xf32>
    %110 = arith.addf %101, %109 : vector<8x256xf32>
    %c15_i32_35 = arith.constant 15 : i32
    %111 = tpu.dynamic_rotate %93 by %c15_i32_35 dim 1 : vector<8x256xf32>, i32 -> vector<8x256xf32>
    %112 = vector.extract_strided_slice %0 {offsets = [2, 0], sizes = [1, 256], strides = [1, 1]} : vector<9x256xf32> to vector<1x256xf32>
    %113 = vector.broadcast %112 : vector<1x256xf32> to vector<8x256xf32>
    %114 = arith.mulf %111, %113 : vector<8x256xf32>
    %c2_36 = arith.constant 2 : index
    %c0_37 = arith.constant 0 : index
    %c0_38 = arith.constant 0 : index
    %115 = vector.load %arg6[%c2_36, %c0_37, %c0_38] : memref<9x8x8xbf16, #tpu.memory_space<vmem>>, vector<1x8x8xbf16>
    %116 = vector.shape_cast %115 : vector<1x8x8xbf16> to vector<8x8xbf16>
    %117 = arith.truncf %114 : vector<8x256xf32> to vector<8x256xbf16>
    %cst_39 = arith.constant dense<0.000000e+00> : vector<8x256xf32>
    %118 = tpu.matmul %116, %117, %cst_39 {dimension_numbers = #tpu.dot_dimension_numbers<[1], [0], [0], [1], [0, 0, 1, 1], [], []>} : vector<8x8xbf16>, vector<8x256xbf16>, vector<8x256xf32> -> vector<8x256xf32>
    %119 = arith.addf %110, %118 : vector<8x256xf32>
    %c1_i32_40 = arith.constant 1 : i32
    %120 = tpu.dynamic_rotate %93 by %c1_i32_40 dim 1 : vector<8x256xf32>, i32 -> vector<8x256xf32>
    %121 = vector.extract_strided_slice %0 {offsets = [3, 0], sizes = [1, 256], strides = [1, 1]} : vector<9x256xf32> to vector<1x256xf32>
    %122 = vector.broadcast %121 : vector<1x256xf32> to vector<8x256xf32>
    %123 = arith.mulf %120, %122 : vector<8x256xf32>
    %c3_41 = arith.constant 3 : index
    %c0_42 = arith.constant 0 : index
    %c0_43 = arith.constant 0 : index
    %124 = vector.load %arg6[%c3_41, %c0_42, %c0_43] : memref<9x8x8xbf16, #tpu.memory_space<vmem>>, vector<1x8x8xbf16>
    %125 = vector.shape_cast %124 : vector<1x8x8xbf16> to vector<8x8xbf16>
    %126 = arith.truncf %123 : vector<8x256xf32> to vector<8x256xbf16>
    %cst_44 = arith.constant dense<0.000000e+00> : vector<8x256xf32>
    %127 = tpu.matmul %125, %126, %cst_44 {dimension_numbers = #tpu.dot_dimension_numbers<[1], [0], [0], [1], [0, 0, 1, 1], [], []>} : vector<8x8xbf16>, vector<8x256xbf16>, vector<8x256xf32> -> vector<8x256xf32>
    %128 = arith.addf %119, %127 : vector<8x256xf32>
    %c4_45 = arith.constant 4 : index
    %c0_46 = arith.constant 0 : index
    %c0_47 = arith.constant 0 : index
    %129 = vector.load %arg6[%c4_45, %c0_46, %c0_47] : memref<9x8x8xbf16, #tpu.memory_space<vmem>>, vector<1x8x8xbf16>
    %130 = vector.shape_cast %129 : vector<1x8x8xbf16> to vector<8x8xbf16>
    %131 = arith.truncf %93 : vector<8x256xf32> to vector<8x256xbf16>
    %cst_48 = arith.constant dense<0.000000e+00> : vector<8x256xf32>
    %132 = tpu.matmul %130, %131, %cst_48 {dimension_numbers = #tpu.dot_dimension_numbers<[1], [0], [0], [1], [0, 0, 1, 1], [], []>} : vector<8x8xbf16>, vector<8x256xbf16>, vector<8x256xf32> -> vector<8x256xf32>
    %133 = arith.addf %128, %132 : vector<8x256xf32>
    %c255_i32_49 = arith.constant 255 : i32
    %134 = tpu.dynamic_rotate %93 by %c255_i32_49 dim 1 : vector<8x256xf32>, i32 -> vector<8x256xf32>
    %135 = vector.extract_strided_slice %0 {offsets = [5, 0], sizes = [1, 256], strides = [1, 1]} : vector<9x256xf32> to vector<1x256xf32>
    %136 = vector.broadcast %135 : vector<1x256xf32> to vector<8x256xf32>
    %137 = arith.mulf %134, %136 : vector<8x256xf32>
    %c5_50 = arith.constant 5 : index
    %c0_51 = arith.constant 0 : index
    %c0_52 = arith.constant 0 : index
    %138 = vector.load %arg6[%c5_50, %c0_51, %c0_52] : memref<9x8x8xbf16, #tpu.memory_space<vmem>>, vector<1x8x8xbf16>
    %139 = vector.shape_cast %138 : vector<1x8x8xbf16> to vector<8x8xbf16>
    %140 = arith.truncf %137 : vector<8x256xf32> to vector<8x256xbf16>
    %cst_53 = arith.constant dense<0.000000e+00> : vector<8x256xf32>
    %141 = tpu.matmul %139, %140, %cst_53 {dimension_numbers = #tpu.dot_dimension_numbers<[1], [0], [0], [1], [0, 0, 1, 1], [], []>} : vector<8x8xbf16>, vector<8x256xbf16>, vector<8x256xf32> -> vector<8x256xf32>
    %142 = arith.addf %133, %141 : vector<8x256xf32>
    %c241_i32_54 = arith.constant 241 : i32
    %143 = tpu.dynamic_rotate %93 by %c241_i32_54 dim 1 : vector<8x256xf32>, i32 -> vector<8x256xf32>
    %144 = vector.extract_strided_slice %0 {offsets = [6, 0], sizes = [1, 256], strides = [1, 1]} : vector<9x256xf32> to vector<1x256xf32>
    %145 = vector.broadcast %144 : vector<1x256xf32> to vector<8x256xf32>
    %146 = arith.mulf %143, %145 : vector<8x256xf32>
    %c6_55 = arith.constant 6 : index
    %c0_56 = arith.constant 0 : index
    %c0_57 = arith.constant 0 : index
    %147 = vector.load %arg6[%c6_55, %c0_56, %c0_57] : memref<9x8x8xbf16, #tpu.memory_space<vmem>>, vector<1x8x8xbf16>
    %148 = vector.shape_cast %147 : vector<1x8x8xbf16> to vector<8x8xbf16>
    %149 = arith.truncf %146 : vector<8x256xf32> to vector<8x256xbf16>
    %cst_58 = arith.constant dense<0.000000e+00> : vector<8x256xf32>
    %150 = tpu.matmul %148, %149, %cst_58 {dimension_numbers = #tpu.dot_dimension_numbers<[1], [0], [0], [1], [0, 0, 1, 1], [], []>} : vector<8x8xbf16>, vector<8x256xbf16>, vector<8x256xf32> -> vector<8x256xf32>
    %151 = arith.addf %142, %150 : vector<8x256xf32>
    %c240_i32_59 = arith.constant 240 : i32
    %152 = tpu.dynamic_rotate %93 by %c240_i32_59 dim 1 : vector<8x256xf32>, i32 -> vector<8x256xf32>
    %153 = vector.extract_strided_slice %0 {offsets = [7, 0], sizes = [1, 256], strides = [1, 1]} : vector<9x256xf32> to vector<1x256xf32>
    %154 = vector.broadcast %153 : vector<1x256xf32> to vector<8x256xf32>
    %155 = arith.mulf %152, %154 : vector<8x256xf32>
    %c7_60 = arith.constant 7 : index
    %c0_61 = arith.constant 0 : index
    %c0_62 = arith.constant 0 : index
    %156 = vector.load %arg6[%c7_60, %c0_61, %c0_62] : memref<9x8x8xbf16, #tpu.memory_space<vmem>>, vector<1x8x8xbf16>
    %157 = vector.shape_cast %156 : vector<1x8x8xbf16> to vector<8x8xbf16>
    %158 = arith.truncf %155 : vector<8x256xf32> to vector<8x256xbf16>
    %cst_63 = arith.constant dense<0.000000e+00> : vector<8x256xf32>
    %159 = tpu.matmul %157, %158, %cst_63 {dimension_numbers = #tpu.dot_dimension_numbers<[1], [0], [0], [1], [0, 0, 1, 1], [], []>} : vector<8x8xbf16>, vector<8x256xbf16>, vector<8x256xf32> -> vector<8x256xf32>
    %160 = arith.addf %151, %159 : vector<8x256xf32>
    %c239_i32_64 = arith.constant 239 : i32
    %161 = tpu.dynamic_rotate %93 by %c239_i32_64 dim 1 : vector<8x256xf32>, i32 -> vector<8x256xf32>
    %162 = vector.extract_strided_slice %0 {offsets = [8, 0], sizes = [1, 256], strides = [1, 1]} : vector<9x256xf32> to vector<1x256xf32>
    %163 = vector.broadcast %162 : vector<1x256xf32> to vector<8x256xf32>
    %164 = arith.mulf %161, %163 : vector<8x256xf32>
    %c8_65 = arith.constant 8 : index
    %c0_66 = arith.constant 0 : index
    %c0_67 = arith.constant 0 : index
    %165 = vector.load %arg6[%c8_65, %c0_66, %c0_67] : memref<9x8x8xbf16, #tpu.memory_space<vmem>>, vector<1x8x8xbf16>
    %166 = vector.shape_cast %165 : vector<1x8x8xbf16> to vector<8x8xbf16>
    %167 = arith.truncf %164 : vector<8x256xf32> to vector<8x256xbf16>
    %cst_68 = arith.constant dense<0.000000e+00> : vector<8x256xf32>
    %168 = tpu.matmul %166, %167, %cst_68 {dimension_numbers = #tpu.dot_dimension_numbers<[1], [0], [0], [1], [0, 0, 1, 1], [], []>} : vector<8x8xbf16>, vector<8x256xbf16>, vector<8x256xf32> -> vector<8x256xf32>
    %169 = arith.addf %160, %168 : vector<8x256xf32>
    %c0_69 = arith.constant 0 : index
    %c0_70 = arith.constant 0 : index
    %170 = vector.load %arg7[%c0_69, %c0_70] : memref<8x1xf32, #tpu.memory_space<vmem>>, vector<8x1xf32>
    %171 = vector.broadcast %170 : vector<8x1xf32> to vector<8x256xf32>
    %172 = arith.addf %169, %171 : vector<8x256xf32>
    %cst_71 = arith.constant 0.000000e+00 : f32
    %173 = vector.broadcast %cst_71 : f32 to vector<8x256xf32>
    %174 = arith.maximumf %172, %173 : vector<8x256xf32>
    %c17_i32_72 = arith.constant 17 : i32
    %175 = tpu.dynamic_rotate %174 by %c17_i32_72 dim 1 : vector<8x256xf32>, i32 -> vector<8x256xf32>
    %176 = vector.extract_strided_slice %0 {offsets = [0, 0], sizes = [1, 256], strides = [1, 1]} : vector<9x256xf32> to vector<1x256xf32>
    %177 = vector.broadcast %176 : vector<1x256xf32> to vector<8x256xf32>
    %178 = arith.mulf %175, %177 : vector<8x256xf32>
    %c0_73 = arith.constant 0 : index
    %c0_74 = arith.constant 0 : index
    %c0_75 = arith.constant 0 : index
    %179 = vector.load %arg8[%c0_73, %c0_74, %c0_75] : memref<9x8x8xbf16, #tpu.memory_space<vmem>>, vector<1x8x8xbf16>
    %180 = vector.shape_cast %179 : vector<1x8x8xbf16> to vector<8x8xbf16>
    %181 = arith.truncf %178 : vector<8x256xf32> to vector<8x256xbf16>
    %cst_76 = arith.constant dense<0.000000e+00> : vector<8x256xf32>
    %182 = tpu.matmul %180, %181, %cst_76 {dimension_numbers = #tpu.dot_dimension_numbers<[1], [0], [0], [1], [0, 0, 1, 1], [], []>} : vector<8x8xbf16>, vector<8x256xbf16>, vector<8x256xf32> -> vector<8x256xf32>
    %c16_i32_77 = arith.constant 16 : i32
    %183 = tpu.dynamic_rotate %174 by %c16_i32_77 dim 1 : vector<8x256xf32>, i32 -> vector<8x256xf32>
    %184 = vector.extract_strided_slice %0 {offsets = [1, 0], sizes = [1, 256], strides = [1, 1]} : vector<9x256xf32> to vector<1x256xf32>
    %185 = vector.broadcast %184 : vector<1x256xf32> to vector<8x256xf32>
    %186 = arith.mulf %183, %185 : vector<8x256xf32>
    %c1_78 = arith.constant 1 : index
    %c0_79 = arith.constant 0 : index
    %c0_80 = arith.constant 0 : index
    %187 = vector.load %arg8[%c1_78, %c0_79, %c0_80] : memref<9x8x8xbf16, #tpu.memory_space<vmem>>, vector<1x8x8xbf16>
    %188 = vector.shape_cast %187 : vector<1x8x8xbf16> to vector<8x8xbf16>
    %189 = arith.truncf %186 : vector<8x256xf32> to vector<8x256xbf16>
    %cst_81 = arith.constant dense<0.000000e+00> : vector<8x256xf32>
    %190 = tpu.matmul %188, %189, %cst_81 {dimension_numbers = #tpu.dot_dimension_numbers<[1], [0], [0], [1], [0, 0, 1, 1], [], []>} : vector<8x8xbf16>, vector<8x256xbf16>, vector<8x256xf32> -> vector<8x256xf32>
    %191 = arith.addf %182, %190 : vector<8x256xf32>
    %c15_i32_82 = arith.constant 15 : i32
    %192 = tpu.dynamic_rotate %174 by %c15_i32_82 dim 1 : vector<8x256xf32>, i32 -> vector<8x256xf32>
    %193 = vector.extract_strided_slice %0 {offsets = [2, 0], sizes = [1, 256], strides = [1, 1]} : vector<9x256xf32> to vector<1x256xf32>
    %194 = vector.broadcast %193 : vector<1x256xf32> to vector<8x256xf32>
    %195 = arith.mulf %192, %194 : vector<8x256xf32>
    %c2_83 = arith.constant 2 : index
    %c0_84 = arith.constant 0 : index
    %c0_85 = arith.constant 0 : index
    %196 = vector.load %arg8[%c2_83, %c0_84, %c0_85] : memref<9x8x8xbf16, #tpu.memory_space<vmem>>, vector<1x8x8xbf16>
    %197 = vector.shape_cast %196 : vector<1x8x8xbf16> to vector<8x8xbf16>
    %198 = arith.truncf %195 : vector<8x256xf32> to vector<8x256xbf16>
    %cst_86 = arith.constant dense<0.000000e+00> : vector<8x256xf32>
    %199 = tpu.matmul %197, %198, %cst_86 {dimension_numbers = #tpu.dot_dimension_numbers<[1], [0], [0], [1], [0, 0, 1, 1], [], []>} : vector<8x8xbf16>, vector<8x256xbf16>, vector<8x256xf32> -> vector<8x256xf32>
    %200 = arith.addf %191, %199 : vector<8x256xf32>
    %c1_i32_87 = arith.constant 1 : i32
    %201 = tpu.dynamic_rotate %174 by %c1_i32_87 dim 1 : vector<8x256xf32>, i32 -> vector<8x256xf32>
    %202 = vector.extract_strided_slice %0 {offsets = [3, 0], sizes = [1, 256], strides = [1, 1]} : vector<9x256xf32> to vector<1x256xf32>
    %203 = vector.broadcast %202 : vector<1x256xf32> to vector<8x256xf32>
    %204 = arith.mulf %201, %203 : vector<8x256xf32>
    %c3_88 = arith.constant 3 : index
    %c0_89 = arith.constant 0 : index
    %c0_90 = arith.constant 0 : index
    %205 = vector.load %arg8[%c3_88, %c0_89, %c0_90] : memref<9x8x8xbf16, #tpu.memory_space<vmem>>, vector<1x8x8xbf16>
    %206 = vector.shape_cast %205 : vector<1x8x8xbf16> to vector<8x8xbf16>
    %207 = arith.truncf %204 : vector<8x256xf32> to vector<8x256xbf16>
    %cst_91 = arith.constant dense<0.000000e+00> : vector<8x256xf32>
    %208 = tpu.matmul %206, %207, %cst_91 {dimension_numbers = #tpu.dot_dimension_numbers<[1], [0], [0], [1], [0, 0, 1, 1], [], []>} : vector<8x8xbf16>, vector<8x256xbf16>, vector<8x256xf32> -> vector<8x256xf32>
    %209 = arith.addf %200, %208 : vector<8x256xf32>
    %c4_92 = arith.constant 4 : index
    %c0_93 = arith.constant 0 : index
    %c0_94 = arith.constant 0 : index
    %210 = vector.load %arg8[%c4_92, %c0_93, %c0_94] : memref<9x8x8xbf16, #tpu.memory_space<vmem>>, vector<1x8x8xbf16>
    %211 = vector.shape_cast %210 : vector<1x8x8xbf16> to vector<8x8xbf16>
    %212 = arith.truncf %174 : vector<8x256xf32> to vector<8x256xbf16>
    %cst_95 = arith.constant dense<0.000000e+00> : vector<8x256xf32>
    %213 = tpu.matmul %211, %212, %cst_95 {dimension_numbers = #tpu.dot_dimension_numbers<[1], [0], [0], [1], [0, 0, 1, 1], [], []>} : vector<8x8xbf16>, vector<8x256xbf16>, vector<8x256xf32> -> vector<8x256xf32>
    %214 = arith.addf %209, %213 : vector<8x256xf32>
    %c255_i32_96 = arith.constant 255 : i32
    %215 = tpu.dynamic_rotate %174 by %c255_i32_96 dim 1 : vector<8x256xf32>, i32 -> vector<8x256xf32>
    %216 = vector.extract_strided_slice %0 {offsets = [5, 0], sizes = [1, 256], strides = [1, 1]} : vector<9x256xf32> to vector<1x256xf32>
    %217 = vector.broadcast %216 : vector<1x256xf32> to vector<8x256xf32>
    %218 = arith.mulf %215, %217 : vector<8x256xf32>
    %c5_97 = arith.constant 5 : index
    %c0_98 = arith.constant 0 : index
    %c0_99 = arith.constant 0 : index
    %219 = vector.load %arg8[%c5_97, %c0_98, %c0_99] : memref<9x8x8xbf16, #tpu.memory_space<vmem>>, vector<1x8x8xbf16>
    %220 = vector.shape_cast %219 : vector<1x8x8xbf16> to vector<8x8xbf16>
    %221 = arith.truncf %218 : vector<8x256xf32> to vector<8x256xbf16>
    %cst_100 = arith.constant dense<0.000000e+00> : vector<8x256xf32>
    %222 = tpu.matmul %220, %221, %cst_100 {dimension_numbers = #tpu.dot_dimension_numbers<[1], [0], [0], [1], [0, 0, 1, 1], [], []>} : vector<8x8xbf16>, vector<8x256xbf16>, vector<8x256xf32> -> vector<8x256xf32>
    %223 = arith.addf %214, %222 : vector<8x256xf32>
    %c241_i32_101 = arith.constant 241 : i32
    %224 = tpu.dynamic_rotate %174 by %c241_i32_101 dim 1 : vector<8x256xf32>, i32 -> vector<8x256xf32>
    %225 = vector.extract_strided_slice %0 {offsets = [6, 0], sizes = [1, 256], strides = [1, 1]} : vector<9x256xf32> to vector<1x256xf32>
    %226 = vector.broadcast %225 : vector<1x256xf32> to vector<8x256xf32>
    %227 = arith.mulf %224, %226 : vector<8x256xf32>
    %c6_102 = arith.constant 6 : index
    %c0_103 = arith.constant 0 : index
    %c0_104 = arith.constant 0 : index
    %228 = vector.load %arg8[%c6_102, %c0_103, %c0_104] : memref<9x8x8xbf16, #tpu.memory_space<vmem>>, vector<1x8x8xbf16>
    %229 = vector.shape_cast %228 : vector<1x8x8xbf16> to vector<8x8xbf16>
    %230 = arith.truncf %227 : vector<8x256xf32> to vector<8x256xbf16>
    %cst_105 = arith.constant dense<0.000000e+00> : vector<8x256xf32>
    %231 = tpu.matmul %229, %230, %cst_105 {dimension_numbers = #tpu.dot_dimension_numbers<[1], [0], [0], [1], [0, 0, 1, 1], [], []>} : vector<8x8xbf16>, vector<8x256xbf16>, vector<8x256xf32> -> vector<8x256xf32>
    %232 = arith.addf %223, %231 : vector<8x256xf32>
    %c240_i32_106 = arith.constant 240 : i32
    %233 = tpu.dynamic_rotate %174 by %c240_i32_106 dim 1 : vector<8x256xf32>, i32 -> vector<8x256xf32>
    %234 = vector.extract_strided_slice %0 {offsets = [7, 0], sizes = [1, 256], strides = [1, 1]} : vector<9x256xf32> to vector<1x256xf32>
    %235 = vector.broadcast %234 : vector<1x256xf32> to vector<8x256xf32>
    %236 = arith.mulf %233, %235 : vector<8x256xf32>
    %c7_107 = arith.constant 7 : index
    %c0_108 = arith.constant 0 : index
    %c0_109 = arith.constant 0 : index
    %237 = vector.load %arg8[%c7_107, %c0_108, %c0_109] : memref<9x8x8xbf16, #tpu.memory_space<vmem>>, vector<1x8x8xbf16>
    %238 = vector.shape_cast %237 : vector<1x8x8xbf16> to vector<8x8xbf16>
    %239 = arith.truncf %236 : vector<8x256xf32> to vector<8x256xbf16>
    %cst_110 = arith.constant dense<0.000000e+00> : vector<8x256xf32>
    %240 = tpu.matmul %238, %239, %cst_110 {dimension_numbers = #tpu.dot_dimension_numbers<[1], [0], [0], [1], [0, 0, 1, 1], [], []>} : vector<8x8xbf16>, vector<8x256xbf16>, vector<8x256xf32> -> vector<8x256xf32>
    %241 = arith.addf %232, %240 : vector<8x256xf32>
    %c239_i32_111 = arith.constant 239 : i32
    %242 = tpu.dynamic_rotate %174 by %c239_i32_111 dim 1 : vector<8x256xf32>, i32 -> vector<8x256xf32>
    %243 = vector.extract_strided_slice %0 {offsets = [8, 0], sizes = [1, 256], strides = [1, 1]} : vector<9x256xf32> to vector<1x256xf32>
    %244 = vector.broadcast %243 : vector<1x256xf32> to vector<8x256xf32>
    %245 = arith.mulf %242, %244 : vector<8x256xf32>
    %c8_112 = arith.constant 8 : index
    %c0_113 = arith.constant 0 : index
    %c0_114 = arith.constant 0 : index
    %246 = vector.load %arg8[%c8_112, %c0_113, %c0_114] : memref<9x8x8xbf16, #tpu.memory_space<vmem>>, vector<1x8x8xbf16>
    %247 = vector.shape_cast %246 : vector<1x8x8xbf16> to vector<8x8xbf16>
    %248 = arith.truncf %245 : vector<8x256xf32> to vector<8x256xbf16>
    %cst_115 = arith.constant dense<0.000000e+00> : vector<8x256xf32>
    %249 = tpu.matmul %247, %248, %cst_115 {dimension_numbers = #tpu.dot_dimension_numbers<[1], [0], [0], [1], [0, 0, 1, 1], [], []>} : vector<8x8xbf16>, vector<8x256xbf16>, vector<8x256xf32> -> vector<8x256xf32>
    %250 = arith.addf %241, %249 : vector<8x256xf32>
    %c0_116 = arith.constant 0 : index
    %c0_117 = arith.constant 0 : index
    %251 = vector.load %arg9[%c0_116, %c0_117] : memref<8x1xf32, #tpu.memory_space<vmem>>, vector<8x1xf32>
    %252 = vector.broadcast %251 : vector<8x1xf32> to vector<8x256xf32>
    %253 = arith.addf %250, %252 : vector<8x256xf32>
    %254 = arith.addf %93, %253 : vector<8x256xf32>
    %c17_i32_118 = arith.constant 17 : i32
    %255 = tpu.dynamic_rotate %254 by %c17_i32_118 dim 1 : vector<8x256xf32>, i32 -> vector<8x256xf32>
    %256 = vector.extract_strided_slice %0 {offsets = [0, 0], sizes = [1, 256], strides = [1, 1]} : vector<9x256xf32> to vector<1x256xf32>
    %257 = vector.broadcast %256 : vector<1x256xf32> to vector<8x256xf32>
    %258 = arith.mulf %255, %257 : vector<8x256xf32>
    %c0_119 = arith.constant 0 : index
    %c0_120 = arith.constant 0 : index
    %c0_121 = arith.constant 0 : index
    %259 = vector.load %arg10[%c0_119, %c0_120, %c0_121] : memref<9x8x8xbf16, #tpu.memory_space<vmem>>, vector<1x8x8xbf16>
    %260 = vector.shape_cast %259 : vector<1x8x8xbf16> to vector<8x8xbf16>
    %261 = arith.truncf %258 : vector<8x256xf32> to vector<8x256xbf16>
    %cst_122 = arith.constant dense<0.000000e+00> : vector<8x256xf32>
    %262 = tpu.matmul %260, %261, %cst_122 {dimension_numbers = #tpu.dot_dimension_numbers<[1], [0], [0], [1], [0, 0, 1, 1], [], []>} : vector<8x8xbf16>, vector<8x256xbf16>, vector<8x256xf32> -> vector<8x256xf32>
    %c16_i32_123 = arith.constant 16 : i32
    %263 = tpu.dynamic_rotate %254 by %c16_i32_123 dim 1 : vector<8x256xf32>, i32 -> vector<8x256xf32>
    %264 = vector.extract_strided_slice %0 {offsets = [1, 0], sizes = [1, 256], strides = [1, 1]} : vector<9x256xf32> to vector<1x256xf32>
    %265 = vector.broadcast %264 : vector<1x256xf32> to vector<8x256xf32>
    %266 = arith.mulf %263, %265 : vector<8x256xf32>
    %c1_124 = arith.constant 1 : index
    %c0_125 = arith.constant 0 : index
    %c0_126 = arith.constant 0 : index
    %267 = vector.load %arg10[%c1_124, %c0_125, %c0_126] : memref<9x8x8xbf16, #tpu.memory_space<vmem>>, vector<1x8x8xbf16>
    %268 = vector.shape_cast %267 : vector<1x8x8xbf16> to vector<8x8xbf16>
    %269 = arith.truncf %266 : vector<8x256xf32> to vector<8x256xbf16>
    %cst_127 = arith.constant dense<0.000000e+00> : vector<8x256xf32>
    %270 = tpu.matmul %268, %269, %cst_127 {dimension_numbers = #tpu.dot_dimension_numbers<[1], [0], [0], [1], [0, 0, 1, 1], [], []>} : vector<8x8xbf16>, vector<8x256xbf16>, vector<8x256xf32> -> vector<8x256xf32>
    %271 = arith.addf %262, %270 : vector<8x256xf32>
    %c15_i32_128 = arith.constant 15 : i32
    %272 = tpu.dynamic_rotate %254 by %c15_i32_128 dim 1 : vector<8x256xf32>, i32 -> vector<8x256xf32>
    %273 = vector.extract_strided_slice %0 {offsets = [2, 0], sizes = [1, 256], strides = [1, 1]} : vector<9x256xf32> to vector<1x256xf32>
    %274 = vector.broadcast %273 : vector<1x256xf32> to vector<8x256xf32>
    %275 = arith.mulf %272, %274 : vector<8x256xf32>
    %c2_129 = arith.constant 2 : index
    %c0_130 = arith.constant 0 : index
    %c0_131 = arith.constant 0 : index
    %276 = vector.load %arg10[%c2_129, %c0_130, %c0_131] : memref<9x8x8xbf16, #tpu.memory_space<vmem>>, vector<1x8x8xbf16>
    %277 = vector.shape_cast %276 : vector<1x8x8xbf16> to vector<8x8xbf16>
    %278 = arith.truncf %275 : vector<8x256xf32> to vector<8x256xbf16>
    %cst_132 = arith.constant dense<0.000000e+00> : vector<8x256xf32>
    %279 = tpu.matmul %277, %278, %cst_132 {dimension_numbers = #tpu.dot_dimension_numbers<[1], [0], [0], [1], [0, 0, 1, 1], [], []>} : vector<8x8xbf16>, vector<8x256xbf16>, vector<8x256xf32> -> vector<8x256xf32>
    %280 = arith.addf %271, %279 : vector<8x256xf32>
    %c1_i32_133 = arith.constant 1 : i32
    %281 = tpu.dynamic_rotate %254 by %c1_i32_133 dim 1 : vector<8x256xf32>, i32 -> vector<8x256xf32>
    %282 = vector.extract_strided_slice %0 {offsets = [3, 0], sizes = [1, 256], strides = [1, 1]} : vector<9x256xf32> to vector<1x256xf32>
    %283 = vector.broadcast %282 : vector<1x256xf32> to vector<8x256xf32>
    %284 = arith.mulf %281, %283 : vector<8x256xf32>
    %c3_134 = arith.constant 3 : index
    %c0_135 = arith.constant 0 : index
    %c0_136 = arith.constant 0 : index
    %285 = vector.load %arg10[%c3_134, %c0_135, %c0_136] : memref<9x8x8xbf16, #tpu.memory_space<vmem>>, vector<1x8x8xbf16>
    %286 = vector.shape_cast %285 : vector<1x8x8xbf16> to vector<8x8xbf16>
    %287 = arith.truncf %284 : vector<8x256xf32> to vector<8x256xbf16>
    %cst_137 = arith.constant dense<0.000000e+00> : vector<8x256xf32>
    %288 = tpu.matmul %286, %287, %cst_137 {dimension_numbers = #tpu.dot_dimension_numbers<[1], [0], [0], [1], [0, 0, 1, 1], [], []>} : vector<8x8xbf16>, vector<8x256xbf16>, vector<8x256xf32> -> vector<8x256xf32>
    %289 = arith.addf %280, %288 : vector<8x256xf32>
    %c4_138 = arith.constant 4 : index
    %c0_139 = arith.constant 0 : index
    %c0_140 = arith.constant 0 : index
    %290 = vector.load %arg10[%c4_138, %c0_139, %c0_140] : memref<9x8x8xbf16, #tpu.memory_space<vmem>>, vector<1x8x8xbf16>
    %291 = vector.shape_cast %290 : vector<1x8x8xbf16> to vector<8x8xbf16>
    %292 = arith.truncf %254 : vector<8x256xf32> to vector<8x256xbf16>
    %cst_141 = arith.constant dense<0.000000e+00> : vector<8x256xf32>
    %293 = tpu.matmul %291, %292, %cst_141 {dimension_numbers = #tpu.dot_dimension_numbers<[1], [0], [0], [1], [0, 0, 1, 1], [], []>} : vector<8x8xbf16>, vector<8x256xbf16>, vector<8x256xf32> -> vector<8x256xf32>
    %294 = arith.addf %289, %293 : vector<8x256xf32>
    %c255_i32_142 = arith.constant 255 : i32
    %295 = tpu.dynamic_rotate %254 by %c255_i32_142 dim 1 : vector<8x256xf32>, i32 -> vector<8x256xf32>
    %296 = vector.extract_strided_slice %0 {offsets = [5, 0], sizes = [1, 256], strides = [1, 1]} : vector<9x256xf32> to vector<1x256xf32>
    %297 = vector.broadcast %296 : vector<1x256xf32> to vector<8x256xf32>
    %298 = arith.mulf %295, %297 : vector<8x256xf32>
    %c5_143 = arith.constant 5 : index
    %c0_144 = arith.constant 0 : index
    %c0_145 = arith.constant 0 : index
    %299 = vector.load %arg10[%c5_143, %c0_144, %c0_145] : memref<9x8x8xbf16, #tpu.memory_space<vmem>>, vector<1x8x8xbf16>
    %300 = vector.shape_cast %299 : vector<1x8x8xbf16> to vector<8x8xbf16>
    %301 = arith.truncf %298 : vector<8x256xf32> to vector<8x256xbf16>
    %cst_146 = arith.constant dense<0.000000e+00> : vector<8x256xf32>
    %302 = tpu.matmul %300, %301, %cst_146 {dimension_numbers = #tpu.dot_dimension_numbers<[1], [0], [0], [1], [0, 0, 1, 1], [], []>} : vector<8x8xbf16>, vector<8x256xbf16>, vector<8x256xf32> -> vector<8x256xf32>
    %303 = arith.addf %294, %302 : vector<8x256xf32>
    %c241_i32_147 = arith.constant 241 : i32
    %304 = tpu.dynamic_rotate %254 by %c241_i32_147 dim 1 : vector<8x256xf32>, i32 -> vector<8x256xf32>
    %305 = vector.extract_strided_slice %0 {offsets = [6, 0], sizes = [1, 256], strides = [1, 1]} : vector<9x256xf32> to vector<1x256xf32>
    %306 = vector.broadcast %305 : vector<1x256xf32> to vector<8x256xf32>
    %307 = arith.mulf %304, %306 : vector<8x256xf32>
    %c6_148 = arith.constant 6 : index
    %c0_149 = arith.constant 0 : index
    %c0_150 = arith.constant 0 : index
    %308 = vector.load %arg10[%c6_148, %c0_149, %c0_150] : memref<9x8x8xbf16, #tpu.memory_space<vmem>>, vector<1x8x8xbf16>
    %309 = vector.shape_cast %308 : vector<1x8x8xbf16> to vector<8x8xbf16>
    %310 = arith.truncf %307 : vector<8x256xf32> to vector<8x256xbf16>
    %cst_151 = arith.constant dense<0.000000e+00> : vector<8x256xf32>
    %311 = tpu.matmul %309, %310, %cst_151 {dimension_numbers = #tpu.dot_dimension_numbers<[1], [0], [0], [1], [0, 0, 1, 1], [], []>} : vector<8x8xbf16>, vector<8x256xbf16>, vector<8x256xf32> -> vector<8x256xf32>
    %312 = arith.addf %303, %311 : vector<8x256xf32>
    %c240_i32_152 = arith.constant 240 : i32
    %313 = tpu.dynamic_rotate %254 by %c240_i32_152 dim 1 : vector<8x256xf32>, i32 -> vector<8x256xf32>
    %314 = vector.extract_strided_slice %0 {offsets = [7, 0], sizes = [1, 256], strides = [1, 1]} : vector<9x256xf32> to vector<1x256xf32>
    %315 = vector.broadcast %314 : vector<1x256xf32> to vector<8x256xf32>
    %316 = arith.mulf %313, %315 : vector<8x256xf32>
    %c7_153 = arith.constant 7 : index
    %c0_154 = arith.constant 0 : index
    %c0_155 = arith.constant 0 : index
    %317 = vector.load %arg10[%c7_153, %c0_154, %c0_155] : memref<9x8x8xbf16, #tpu.memory_space<vmem>>, vector<1x8x8xbf16>
    %318 = vector.shape_cast %317 : vector<1x8x8xbf16> to vector<8x8xbf16>
    %319 = arith.truncf %316 : vector<8x256xf32> to vector<8x256xbf16>
    %cst_156 = arith.constant dense<0.000000e+00> : vector<8x256xf32>
    %320 = tpu.matmul %318, %319, %cst_156 {dimension_numbers = #tpu.dot_dimension_numbers<[1], [0], [0], [1], [0, 0, 1, 1], [], []>} : vector<8x8xbf16>, vector<8x256xbf16>, vector<8x256xf32> -> vector<8x256xf32>
    %321 = arith.addf %312, %320 : vector<8x256xf32>
    %c239_i32_157 = arith.constant 239 : i32
    %322 = tpu.dynamic_rotate %254 by %c239_i32_157 dim 1 : vector<8x256xf32>, i32 -> vector<8x256xf32>
    %323 = vector.extract_strided_slice %0 {offsets = [8, 0], sizes = [1, 256], strides = [1, 1]} : vector<9x256xf32> to vector<1x256xf32>
    %324 = vector.broadcast %323 : vector<1x256xf32> to vector<8x256xf32>
    %325 = arith.mulf %322, %324 : vector<8x256xf32>
    %c8_158 = arith.constant 8 : index
    %c0_159 = arith.constant 0 : index
    %c0_160 = arith.constant 0 : index
    %326 = vector.load %arg10[%c8_158, %c0_159, %c0_160] : memref<9x8x8xbf16, #tpu.memory_space<vmem>>, vector<1x8x8xbf16>
    %327 = vector.shape_cast %326 : vector<1x8x8xbf16> to vector<8x8xbf16>
    %328 = arith.truncf %325 : vector<8x256xf32> to vector<8x256xbf16>
    %cst_161 = arith.constant dense<0.000000e+00> : vector<8x256xf32>
    %329 = tpu.matmul %327, %328, %cst_161 {dimension_numbers = #tpu.dot_dimension_numbers<[1], [0], [0], [1], [0, 0, 1, 1], [], []>} : vector<8x8xbf16>, vector<8x256xbf16>, vector<8x256xf32> -> vector<8x256xf32>
    %330 = arith.addf %321, %329 : vector<8x256xf32>
    %c0_162 = arith.constant 0 : index
    %c0_163 = arith.constant 0 : index
    %331 = vector.load %arg11[%c0_162, %c0_163] : memref<8x1xf32, #tpu.memory_space<vmem>>, vector<8x1xf32>
    %332 = vector.broadcast %331 : vector<8x1xf32> to vector<8x256xf32>
    %333 = arith.addf %330, %332 : vector<8x256xf32>
    %cst_164 = arith.constant 0.000000e+00 : f32
    %334 = vector.broadcast %cst_164 : f32 to vector<8x256xf32>
    %335 = arith.maximumf %333, %334 : vector<8x256xf32>
    %c17_i32_165 = arith.constant 17 : i32
    %336 = tpu.dynamic_rotate %335 by %c17_i32_165 dim 1 : vector<8x256xf32>, i32 -> vector<8x256xf32>
    %337 = vector.extract_strided_slice %0 {offsets = [0, 0], sizes = [1, 256], strides = [1, 1]} : vector<9x256xf32> to vector<1x256xf32>
    %338 = vector.broadcast %337 : vector<1x256xf32> to vector<8x256xf32>
    %339 = arith.mulf %336, %338 : vector<8x256xf32>
    %c0_166 = arith.constant 0 : index
    %c0_167 = arith.constant 0 : index
    %c0_168 = arith.constant 0 : index
    %340 = vector.load %arg12[%c0_166, %c0_167, %c0_168] : memref<9x8x8xbf16, #tpu.memory_space<vmem>>, vector<1x8x8xbf16>
    %341 = vector.shape_cast %340 : vector<1x8x8xbf16> to vector<8x8xbf16>
    %342 = arith.truncf %339 : vector<8x256xf32> to vector<8x256xbf16>
    %cst_169 = arith.constant dense<0.000000e+00> : vector<8x256xf32>
    %343 = tpu.matmul %341, %342, %cst_169 {dimension_numbers = #tpu.dot_dimension_numbers<[1], [0], [0], [1], [0, 0, 1, 1], [], []>} : vector<8x8xbf16>, vector<8x256xbf16>, vector<8x256xf32> -> vector<8x256xf32>
    %c16_i32_170 = arith.constant 16 : i32
    %344 = tpu.dynamic_rotate %335 by %c16_i32_170 dim 1 : vector<8x256xf32>, i32 -> vector<8x256xf32>
    %345 = vector.extract_strided_slice %0 {offsets = [1, 0], sizes = [1, 256], strides = [1, 1]} : vector<9x256xf32> to vector<1x256xf32>
    %346 = vector.broadcast %345 : vector<1x256xf32> to vector<8x256xf32>
    %347 = arith.mulf %344, %346 : vector<8x256xf32>
    %c1_171 = arith.constant 1 : index
    %c0_172 = arith.constant 0 : index
    %c0_173 = arith.constant 0 : index
    %348 = vector.load %arg12[%c1_171, %c0_172, %c0_173] : memref<9x8x8xbf16, #tpu.memory_space<vmem>>, vector<1x8x8xbf16>
    %349 = vector.shape_cast %348 : vector<1x8x8xbf16> to vector<8x8xbf16>
    %350 = arith.truncf %347 : vector<8x256xf32> to vector<8x256xbf16>
    %cst_174 = arith.constant dense<0.000000e+00> : vector<8x256xf32>
    %351 = tpu.matmul %349, %350, %cst_174 {dimension_numbers = #tpu.dot_dimension_numbers<[1], [0], [0], [1], [0, 0, 1, 1], [], []>} : vector<8x8xbf16>, vector<8x256xbf16>, vector<8x256xf32> -> vector<8x256xf32>
    %352 = arith.addf %343, %351 : vector<8x256xf32>
    %c15_i32_175 = arith.constant 15 : i32
    %353 = tpu.dynamic_rotate %335 by %c15_i32_175 dim 1 : vector<8x256xf32>, i32 -> vector<8x256xf32>
    %354 = vector.extract_strided_slice %0 {offsets = [2, 0], sizes = [1, 256], strides = [1, 1]} : vector<9x256xf32> to vector<1x256xf32>
    %355 = vector.broadcast %354 : vector<1x256xf32> to vector<8x256xf32>
    %356 = arith.mulf %353, %355 : vector<8x256xf32>
    %c2_176 = arith.constant 2 : index
    %c0_177 = arith.constant 0 : index
    %c0_178 = arith.constant 0 : index
    %357 = vector.load %arg12[%c2_176, %c0_177, %c0_178] : memref<9x8x8xbf16, #tpu.memory_space<vmem>>, vector<1x8x8xbf16>
    %358 = vector.shape_cast %357 : vector<1x8x8xbf16> to vector<8x8xbf16>
    %359 = arith.truncf %356 : vector<8x256xf32> to vector<8x256xbf16>
    %cst_179 = arith.constant dense<0.000000e+00> : vector<8x256xf32>
    %360 = tpu.matmul %358, %359, %cst_179 {dimension_numbers = #tpu.dot_dimension_numbers<[1], [0], [0], [1], [0, 0, 1, 1], [], []>} : vector<8x8xbf16>, vector<8x256xbf16>, vector<8x256xf32> -> vector<8x256xf32>
    %361 = arith.addf %352, %360 : vector<8x256xf32>
    %c1_i32_180 = arith.constant 1 : i32
    %362 = tpu.dynamic_rotate %335 by %c1_i32_180 dim 1 : vector<8x256xf32>, i32 -> vector<8x256xf32>
    %363 = vector.extract_strided_slice %0 {offsets = [3, 0], sizes = [1, 256], strides = [1, 1]} : vector<9x256xf32> to vector<1x256xf32>
    %364 = vector.broadcast %363 : vector<1x256xf32> to vector<8x256xf32>
    %365 = arith.mulf %362, %364 : vector<8x256xf32>
    %c3_181 = arith.constant 3 : index
    %c0_182 = arith.constant 0 : index
    %c0_183 = arith.constant 0 : index
    %366 = vector.load %arg12[%c3_181, %c0_182, %c0_183] : memref<9x8x8xbf16, #tpu.memory_space<vmem>>, vector<1x8x8xbf16>
    %367 = vector.shape_cast %366 : vector<1x8x8xbf16> to vector<8x8xbf16>
    %368 = arith.truncf %365 : vector<8x256xf32> to vector<8x256xbf16>
    %cst_184 = arith.constant dense<0.000000e+00> : vector<8x256xf32>
    %369 = tpu.matmul %367, %368, %cst_184 {dimension_numbers = #tpu.dot_dimension_numbers<[1], [0], [0], [1], [0, 0, 1, 1], [], []>} : vector<8x8xbf16>, vector<8x256xbf16>, vector<8x256xf32> -> vector<8x256xf32>
    %370 = arith.addf %361, %369 : vector<8x256xf32>
    %c4_185 = arith.constant 4 : index
    %c0_186 = arith.constant 0 : index
    %c0_187 = arith.constant 0 : index
    %371 = vector.load %arg12[%c4_185, %c0_186, %c0_187] : memref<9x8x8xbf16, #tpu.memory_space<vmem>>, vector<1x8x8xbf16>
    %372 = vector.shape_cast %371 : vector<1x8x8xbf16> to vector<8x8xbf16>
    %373 = arith.truncf %335 : vector<8x256xf32> to vector<8x256xbf16>
    %cst_188 = arith.constant dense<0.000000e+00> : vector<8x256xf32>
    %374 = tpu.matmul %372, %373, %cst_188 {dimension_numbers = #tpu.dot_dimension_numbers<[1], [0], [0], [1], [0, 0, 1, 1], [], []>} : vector<8x8xbf16>, vector<8x256xbf16>, vector<8x256xf32> -> vector<8x256xf32>
    %375 = arith.addf %370, %374 : vector<8x256xf32>
    %c255_i32_189 = arith.constant 255 : i32
    %376 = tpu.dynamic_rotate %335 by %c255_i32_189 dim 1 : vector<8x256xf32>, i32 -> vector<8x256xf32>
    %377 = vector.extract_strided_slice %0 {offsets = [5, 0], sizes = [1, 256], strides = [1, 1]} : vector<9x256xf32> to vector<1x256xf32>
    %378 = vector.broadcast %377 : vector<1x256xf32> to vector<8x256xf32>
    %379 = arith.mulf %376, %378 : vector<8x256xf32>
    %c5_190 = arith.constant 5 : index
    %c0_191 = arith.constant 0 : index
    %c0_192 = arith.constant 0 : index
    %380 = vector.load %arg12[%c5_190, %c0_191, %c0_192] : memref<9x8x8xbf16, #tpu.memory_space<vmem>>, vector<1x8x8xbf16>
    %381 = vector.shape_cast %380 : vector<1x8x8xbf16> to vector<8x8xbf16>
    %382 = arith.truncf %379 : vector<8x256xf32> to vector<8x256xbf16>
    %cst_193 = arith.constant dense<0.000000e+00> : vector<8x256xf32>
    %383 = tpu.matmul %381, %382, %cst_193 {dimension_numbers = #tpu.dot_dimension_numbers<[1], [0], [0], [1], [0, 0, 1, 1], [], []>} : vector<8x8xbf16>, vector<8x256xbf16>, vector<8x256xf32> -> vector<8x256xf32>
    %384 = arith.addf %375, %383 : vector<8x256xf32>
    %c241_i32_194 = arith.constant 241 : i32
    %385 = tpu.dynamic_rotate %335 by %c241_i32_194 dim 1 : vector<8x256xf32>, i32 -> vector<8x256xf32>
    %386 = vector.extract_strided_slice %0 {offsets = [6, 0], sizes = [1, 256], strides = [1, 1]} : vector<9x256xf32> to vector<1x256xf32>
    %387 = vector.broadcast %386 : vector<1x256xf32> to vector<8x256xf32>
    %388 = arith.mulf %385, %387 : vector<8x256xf32>
    %c6_195 = arith.constant 6 : index
    %c0_196 = arith.constant 0 : index
    %c0_197 = arith.constant 0 : index
    %389 = vector.load %arg12[%c6_195, %c0_196, %c0_197] : memref<9x8x8xbf16, #tpu.memory_space<vmem>>, vector<1x8x8xbf16>
    %390 = vector.shape_cast %389 : vector<1x8x8xbf16> to vector<8x8xbf16>
    %391 = arith.truncf %388 : vector<8x256xf32> to vector<8x256xbf16>
    %cst_198 = arith.constant dense<0.000000e+00> : vector<8x256xf32>
    %392 = tpu.matmul %390, %391, %cst_198 {dimension_numbers = #tpu.dot_dimension_numbers<[1], [0], [0], [1], [0, 0, 1, 1], [], []>} : vector<8x8xbf16>, vector<8x256xbf16>, vector<8x256xf32> -> vector<8x256xf32>
    %393 = arith.addf %384, %392 : vector<8x256xf32>
    %c240_i32_199 = arith.constant 240 : i32
    %394 = tpu.dynamic_rotate %335 by %c240_i32_199 dim 1 : vector<8x256xf32>, i32 -> vector<8x256xf32>
    %395 = vector.extract_strided_slice %0 {offsets = [7, 0], sizes = [1, 256], strides = [1, 1]} : vector<9x256xf32> to vector<1x256xf32>
    %396 = vector.broadcast %395 : vector<1x256xf32> to vector<8x256xf32>
    %397 = arith.mulf %394, %396 : vector<8x256xf32>
    %c7_200 = arith.constant 7 : index
    %c0_201 = arith.constant 0 : index
    %c0_202 = arith.constant 0 : index
    %398 = vector.load %arg12[%c7_200, %c0_201, %c0_202] : memref<9x8x8xbf16, #tpu.memory_space<vmem>>, vector<1x8x8xbf16>
    %399 = vector.shape_cast %398 : vector<1x8x8xbf16> to vector<8x8xbf16>
    %400 = arith.truncf %397 : vector<8x256xf32> to vector<8x256xbf16>
    %cst_203 = arith.constant dense<0.000000e+00> : vector<8x256xf32>
    %401 = tpu.matmul %399, %400, %cst_203 {dimension_numbers = #tpu.dot_dimension_numbers<[1], [0], [0], [1], [0, 0, 1, 1], [], []>} : vector<8x8xbf16>, vector<8x256xbf16>, vector<8x256xf32> -> vector<8x256xf32>
    %402 = arith.addf %393, %401 : vector<8x256xf32>
    %c239_i32_204 = arith.constant 239 : i32
    %403 = tpu.dynamic_rotate %335 by %c239_i32_204 dim 1 : vector<8x256xf32>, i32 -> vector<8x256xf32>
    %404 = vector.extract_strided_slice %0 {offsets = [8, 0], sizes = [1, 256], strides = [1, 1]} : vector<9x256xf32> to vector<1x256xf32>
    %405 = vector.broadcast %404 : vector<1x256xf32> to vector<8x256xf32>
    %406 = arith.mulf %403, %405 : vector<8x256xf32>
    %c8_205 = arith.constant 8 : index
    %c0_206 = arith.constant 0 : index
    %c0_207 = arith.constant 0 : index
    %407 = vector.load %arg12[%c8_205, %c0_206, %c0_207] : memref<9x8x8xbf16, #tpu.memory_space<vmem>>, vector<1x8x8xbf16>
    %408 = vector.shape_cast %407 : vector<1x8x8xbf16> to vector<8x8xbf16>
    %409 = arith.truncf %406 : vector<8x256xf32> to vector<8x256xbf16>
    %cst_208 = arith.constant dense<0.000000e+00> : vector<8x256xf32>
    %410 = tpu.matmul %408, %409, %cst_208 {dimension_numbers = #tpu.dot_dimension_numbers<[1], [0], [0], [1], [0, 0, 1, 1], [], []>} : vector<8x8xbf16>, vector<8x256xbf16>, vector<8x256xf32> -> vector<8x256xf32>
    %411 = arith.addf %402, %410 : vector<8x256xf32>
    %c0_209 = arith.constant 0 : index
    %c0_210 = arith.constant 0 : index
    %412 = vector.load %arg13[%c0_209, %c0_210] : memref<8x1xf32, #tpu.memory_space<vmem>>, vector<8x1xf32>
    %413 = vector.broadcast %412 : vector<8x1xf32> to vector<8x256xf32>
    %414 = arith.addf %411, %413 : vector<8x256xf32>
    %415 = arith.addf %254, %414 : vector<8x256xf32>
    %c17_i32_211 = arith.constant 17 : i32
    %416 = tpu.dynamic_rotate %415 by %c17_i32_211 dim 1 : vector<8x256xf32>, i32 -> vector<8x256xf32>
    %417 = vector.extract_strided_slice %0 {offsets = [0, 0], sizes = [1, 256], strides = [1, 1]} : vector<9x256xf32> to vector<1x256xf32>
    %418 = vector.broadcast %417 : vector<1x256xf32> to vector<8x256xf32>
    %419 = arith.mulf %416, %418 : vector<8x256xf32>
    %c0_212 = arith.constant 0 : index
    %c0_213 = arith.constant 0 : index
    %c0_214 = arith.constant 0 : index
    %420 = vector.load %arg14[%c0_212, %c0_213, %c0_214] : memref<9x1x8xbf16, #tpu.memory_space<vmem>>, vector<1x1x8xbf16>
    %421 = vector.shape_cast %420 : vector<1x1x8xbf16> to vector<1x8xbf16>
    %422 = arith.truncf %419 : vector<8x256xf32> to vector<8x256xbf16>
    %cst_215 = arith.constant dense<0.000000e+00> : vector<1x256xf32>
    %423 = tpu.matmul %421, %422, %cst_215 {dimension_numbers = #tpu.dot_dimension_numbers<[1], [0], [0], [1], [0, 0, 1, 1], [], []>} : vector<1x8xbf16>, vector<8x256xbf16>, vector<1x256xf32> -> vector<1x256xf32>
    %c16_i32_216 = arith.constant 16 : i32
    %424 = tpu.dynamic_rotate %415 by %c16_i32_216 dim 1 : vector<8x256xf32>, i32 -> vector<8x256xf32>
    %425 = vector.extract_strided_slice %0 {offsets = [1, 0], sizes = [1, 256], strides = [1, 1]} : vector<9x256xf32> to vector<1x256xf32>
    %426 = vector.broadcast %425 : vector<1x256xf32> to vector<8x256xf32>
    %427 = arith.mulf %424, %426 : vector<8x256xf32>
    %c1_217 = arith.constant 1 : index
    %c0_218 = arith.constant 0 : index
    %c0_219 = arith.constant 0 : index
    %428 = vector.load %arg14[%c1_217, %c0_218, %c0_219] : memref<9x1x8xbf16, #tpu.memory_space<vmem>>, vector<1x1x8xbf16>
    %429 = vector.shape_cast %428 : vector<1x1x8xbf16> to vector<1x8xbf16>
    %430 = arith.truncf %427 : vector<8x256xf32> to vector<8x256xbf16>
    %cst_220 = arith.constant dense<0.000000e+00> : vector<1x256xf32>
    %431 = tpu.matmul %429, %430, %cst_220 {dimension_numbers = #tpu.dot_dimension_numbers<[1], [0], [0], [1], [0, 0, 1, 1], [], []>} : vector<1x8xbf16>, vector<8x256xbf16>, vector<1x256xf32> -> vector<1x256xf32>
    %432 = arith.addf %423, %431 : vector<1x256xf32>
    %c15_i32_221 = arith.constant 15 : i32
    %433 = tpu.dynamic_rotate %415 by %c15_i32_221 dim 1 : vector<8x256xf32>, i32 -> vector<8x256xf32>
    %434 = vector.extract_strided_slice %0 {offsets = [2, 0], sizes = [1, 256], strides = [1, 1]} : vector<9x256xf32> to vector<1x256xf32>
    %435 = vector.broadcast %434 : vector<1x256xf32> to vector<8x256xf32>
    %436 = arith.mulf %433, %435 : vector<8x256xf32>
    %c2_222 = arith.constant 2 : index
    %c0_223 = arith.constant 0 : index
    %c0_224 = arith.constant 0 : index
    %437 = vector.load %arg14[%c2_222, %c0_223, %c0_224] : memref<9x1x8xbf16, #tpu.memory_space<vmem>>, vector<1x1x8xbf16>
    %438 = vector.shape_cast %437 : vector<1x1x8xbf16> to vector<1x8xbf16>
    %439 = arith.truncf %436 : vector<8x256xf32> to vector<8x256xbf16>
    %cst_225 = arith.constant dense<0.000000e+00> : vector<1x256xf32>
    %440 = tpu.matmul %438, %439, %cst_225 {dimension_numbers = #tpu.dot_dimension_numbers<[1], [0], [0], [1], [0, 0, 1, 1], [], []>} : vector<1x8xbf16>, vector<8x256xbf16>, vector<1x256xf32> -> vector<1x256xf32>
    %441 = arith.addf %432, %440 : vector<1x256xf32>
    %c1_i32_226 = arith.constant 1 : i32
    %442 = tpu.dynamic_rotate %415 by %c1_i32_226 dim 1 : vector<8x256xf32>, i32 -> vector<8x256xf32>
    %443 = vector.extract_strided_slice %0 {offsets = [3, 0], sizes = [1, 256], strides = [1, 1]} : vector<9x256xf32> to vector<1x256xf32>
    %444 = vector.broadcast %443 : vector<1x256xf32> to vector<8x256xf32>
    %445 = arith.mulf %442, %444 : vector<8x256xf32>
    %c3_227 = arith.constant 3 : index
    %c0_228 = arith.constant 0 : index
    %c0_229 = arith.constant 0 : index
    %446 = vector.load %arg14[%c3_227, %c0_228, %c0_229] : memref<9x1x8xbf16, #tpu.memory_space<vmem>>, vector<1x1x8xbf16>
    %447 = vector.shape_cast %446 : vector<1x1x8xbf16> to vector<1x8xbf16>
    %448 = arith.truncf %445 : vector<8x256xf32> to vector<8x256xbf16>
    %cst_230 = arith.constant dense<0.000000e+00> : vector<1x256xf32>
    %449 = tpu.matmul %447, %448, %cst_230 {dimension_numbers = #tpu.dot_dimension_numbers<[1], [0], [0], [1], [0, 0, 1, 1], [], []>} : vector<1x8xbf16>, vector<8x256xbf16>, vector<1x256xf32> -> vector<1x256xf32>
    %450 = arith.addf %441, %449 : vector<1x256xf32>
    %c4_231 = arith.constant 4 : index
    %c0_232 = arith.constant 0 : index
    %c0_233 = arith.constant 0 : index
    %451 = vector.load %arg14[%c4_231, %c0_232, %c0_233] : memref<9x1x8xbf16, #tpu.memory_space<vmem>>, vector<1x1x8xbf16>
    %452 = vector.shape_cast %451 : vector<1x1x8xbf16> to vector<1x8xbf16>
    %453 = arith.truncf %415 : vector<8x256xf32> to vector<8x256xbf16>
    %cst_234 = arith.constant dense<0.000000e+00> : vector<1x256xf32>
    %454 = tpu.matmul %452, %453, %cst_234 {dimension_numbers = #tpu.dot_dimension_numbers<[1], [0], [0], [1], [0, 0, 1, 1], [], []>} : vector<1x8xbf16>, vector<8x256xbf16>, vector<1x256xf32> -> vector<1x256xf32>
    %455 = arith.addf %450, %454 : vector<1x256xf32>
    %c255_i32_235 = arith.constant 255 : i32
    %456 = tpu.dynamic_rotate %415 by %c255_i32_235 dim 1 : vector<8x256xf32>, i32 -> vector<8x256xf32>
    %457 = vector.extract_strided_slice %0 {offsets = [5, 0], sizes = [1, 256], strides = [1, 1]} : vector<9x256xf32> to vector<1x256xf32>
    %458 = vector.broadcast %457 : vector<1x256xf32> to vector<8x256xf32>
    %459 = arith.mulf %456, %458 : vector<8x256xf32>
    %c5_236 = arith.constant 5 : index
    %c0_237 = arith.constant 0 : index
    %c0_238 = arith.constant 0 : index
    %460 = vector.load %arg14[%c5_236, %c0_237, %c0_238] : memref<9x1x8xbf16, #tpu.memory_space<vmem>>, vector<1x1x8xbf16>
    %461 = vector.shape_cast %460 : vector<1x1x8xbf16> to vector<1x8xbf16>
    %462 = arith.truncf %459 : vector<8x256xf32> to vector<8x256xbf16>
    %cst_239 = arith.constant dense<0.000000e+00> : vector<1x256xf32>
    %463 = tpu.matmul %461, %462, %cst_239 {dimension_numbers = #tpu.dot_dimension_numbers<[1], [0], [0], [1], [0, 0, 1, 1], [], []>} : vector<1x8xbf16>, vector<8x256xbf16>, vector<1x256xf32> -> vector<1x256xf32>
    %464 = arith.addf %455, %463 : vector<1x256xf32>
    %c241_i32_240 = arith.constant 241 : i32
    %465 = tpu.dynamic_rotate %415 by %c241_i32_240 dim 1 : vector<8x256xf32>, i32 -> vector<8x256xf32>
    %466 = vector.extract_strided_slice %0 {offsets = [6, 0], sizes = [1, 256], strides = [1, 1]} : vector<9x256xf32> to vector<1x256xf32>
    %467 = vector.broadcast %466 : vector<1x256xf32> to vector<8x256xf32>
    %468 = arith.mulf %465, %467 : vector<8x256xf32>
    %c6_241 = arith.constant 6 : index
    %c0_242 = arith.constant 0 : index
    %c0_243 = arith.constant 0 : index
    %469 = vector.load %arg14[%c6_241, %c0_242, %c0_243] : memref<9x1x8xbf16, #tpu.memory_space<vmem>>, vector<1x1x8xbf16>
    %470 = vector.shape_cast %469 : vector<1x1x8xbf16> to vector<1x8xbf16>
    %471 = arith.truncf %468 : vector<8x256xf32> to vector<8x256xbf16>
    %cst_244 = arith.constant dense<0.000000e+00> : vector<1x256xf32>
    %472 = tpu.matmul %470, %471, %cst_244 {dimension_numbers = #tpu.dot_dimension_numbers<[1], [0], [0], [1], [0, 0, 1, 1], [], []>} : vector<1x8xbf16>, vector<8x256xbf16>, vector<1x256xf32> -> vector<1x256xf32>
    %473 = arith.addf %464, %472 : vector<1x256xf32>
    %c240_i32_245 = arith.constant 240 : i32
    %474 = tpu.dynamic_rotate %415 by %c240_i32_245 dim 1 : vector<8x256xf32>, i32 -> vector<8x256xf32>
    %475 = vector.extract_strided_slice %0 {offsets = [7, 0], sizes = [1, 256], strides = [1, 1]} : vector<9x256xf32> to vector<1x256xf32>
    %476 = vector.broadcast %475 : vector<1x256xf32> to vector<8x256xf32>
    %477 = arith.mulf %474, %476 : vector<8x256xf32>
    %c7_246 = arith.constant 7 : index
    %c0_247 = arith.constant 0 : index
    %c0_248 = arith.constant 0 : index
    %478 = vector.load %arg14[%c7_246, %c0_247, %c0_248] : memref<9x1x8xbf16, #tpu.memory_space<vmem>>, vector<1x1x8xbf16>
    %479 = vector.shape_cast %478 : vector<1x1x8xbf16> to vector<1x8xbf16>
    %480 = arith.truncf %477 : vector<8x256xf32> to vector<8x256xbf16>
    %cst_249 = arith.constant dense<0.000000e+00> : vector<1x256xf32>
    %481 = tpu.matmul %479, %480, %cst_249 {dimension_numbers = #tpu.dot_dimension_numbers<[1], [0], [0], [1], [0, 0, 1, 1], [], []>} : vector<1x8xbf16>, vector<8x256xbf16>, vector<1x256xf32> -> vector<1x256xf32>
    %482 = arith.addf %473, %481 : vector<1x256xf32>
    %c239_i32_250 = arith.constant 239 : i32
    %483 = tpu.dynamic_rotate %415 by %c239_i32_250 dim 1 : vector<8x256xf32>, i32 -> vector<8x256xf32>
    %484 = vector.extract_strided_slice %0 {offsets = [8, 0], sizes = [1, 256], strides = [1, 1]} : vector<9x256xf32> to vector<1x256xf32>
    %485 = vector.broadcast %484 : vector<1x256xf32> to vector<8x256xf32>
    %486 = arith.mulf %483, %485 : vector<8x256xf32>
    %c8_251 = arith.constant 8 : index
    %c0_252 = arith.constant 0 : index
    %c0_253 = arith.constant 0 : index
    %487 = vector.load %arg14[%c8_251, %c0_252, %c0_253] : memref<9x1x8xbf16, #tpu.memory_space<vmem>>, vector<1x1x8xbf16>
    %488 = vector.shape_cast %487 : vector<1x1x8xbf16> to vector<1x8xbf16>
    %489 = arith.truncf %486 : vector<8x256xf32> to vector<8x256xbf16>
    %cst_254 = arith.constant dense<0.000000e+00> : vector<1x256xf32>
    %490 = tpu.matmul %488, %489, %cst_254 {dimension_numbers = #tpu.dot_dimension_numbers<[1], [0], [0], [1], [0, 0, 1, 1], [], []>} : vector<1x8xbf16>, vector<8x256xbf16>, vector<1x256xf32> -> vector<1x256xf32>
    %491 = arith.addf %482, %490 : vector<1x256xf32>
    %c0_255 = arith.constant 0 : index
    %c0_256 = arith.constant 0 : index
    %492 = vector.load %arg15[%c0_255, %c0_256] : memref<1x1xf32, #tpu.memory_space<vmem>>, vector<1x1xf32>
    %493 = vector.broadcast %492 : vector<1x1xf32> to vector<1x256xf32>
    %494 = arith.addf %491, %493 : vector<1x256xf32>
    %cst_257 = arith.constant 0.000000e+00 : f32
    %495 = vector.broadcast %cst_257 : f32 to vector<1x256xf32>
    %496 = arith.maximumf %494, %495 : vector<1x256xf32>
    %c0_258 = arith.constant 0 : index
    %c0_259 = arith.constant 0 : index
    %c0_260 = arith.constant 0 : index
    %497 = vector.load %arg2[%c0_258, %c0_259, %c0_260] : memref<1x1x256xf32, #tpu.memory_space<vmem>>, vector<1x1x256xf32>
    %498 = vector.shape_cast %497 : vector<1x1x256xf32> to vector<1x256xf32>
    %499 = arith.addf %498, %496 : vector<1x256xf32>
    %c0_261 = arith.constant 0 : index
    %c0_262 = arith.constant 0 : index
    %c0_263 = arith.constant 0 : index
    %500 = vector.load %arg16[%c0_261, %c0_262, %c0_263] : memref<1x1x256xf32, #tpu.memory_space<vmem>>, vector<1x1x256xf32>
    %501 = vector.shape_cast %500 : vector<1x1x256xf32> to vector<1x256xf32>
    %502 = vector.shape_cast %499 : vector<1x256xf32> to vector<1x1x256xf32>
    tpu.vector_store %arg16[%c0_261, %c0_262, %c0_263], %502 {strides = array<i32>} : memref<1x1x256xf32, #tpu.memory_space<vmem>>, vector<1x1x256xf32>,
    return
  }
  func.func @transform_0(%arg0: i32) -> (i32, i32, i32) {
    %c0_i32 = arith.constant 0 : i32
    %c0_i32_0 = arith.constant 0 : i32
    %c0_i32_1 = arith.constant 0 : i32
    return %arg0, %c0_i32, %c0_i32_0 : i32, i32, i32
  }
  func.func @transform_1(%arg0: i32) -> (i32, i32, i32) {
    %c0_i32 = arith.constant 0 : i32
    %c0_i32_0 = arith.constant 0 : i32
    %c0_i32_1 = arith.constant 0 : i32
    return %arg0, %c0_i32, %c0_i32_0 : i32, i32, i32
  }
  func.func @transform_2(%arg0: i32) -> (i32, i32) {
    %c0_i32 = arith.constant 0 : i32
    %c0_i32_0 = arith.constant 0 : i32
    %c0_i32_1 = arith.constant 0 : i32
    return %c0_i32, %c0_i32_0 : i32, i32
  }
  func.func @transform_3(%arg0: i32) -> (i32, i32, i32) {
    %c0_i32 = arith.constant 0 : i32
    %c0_i32_0 = arith.constant 0 : i32
    %c0_i32_1 = arith.constant 0 : i32
    %c0_i32_2 = arith.constant 0 : i32
    return %c0_i32, %c0_i32_0, %c0_i32_1 : i32, i32, i32
  }
  func.func @transform_4(%arg0: i32) -> (i32, i32) {
    %c0_i32 = arith.constant 0 : i32
    %c0_i32_0 = arith.constant 0 : i32
    %c0_i32_1 = arith.constant 0 : i32
    return %c0_i32, %c0_i32_0 : i32, i32
  }
  func.func @transform_5(%arg0: i32) -> (i32, i32, i32) {
    %c0_i32 = arith.constant 0 : i32
    %c0_i32_0 = arith.constant 0 : i32
    %c0_i32_1 = arith.constant 0 : i32
    %c0_i32_2 = arith.constant 0 : i32
    return %c0_i32, %c0_i32_0, %c0_i32_1 : i32, i32, i32
  }
  func.func @transform_6(%arg0: i32) -> (i32, i32) {
    %c0_i32 = arith.constant 0 : i32
    %c0_i32_0 = arith.constant 0 : i32
    %c0_i32_1 = arith.constant 0 : i32
    return %c0_i32, %c0_i32_0 : i32, i32
  }
  func.func @transform_7(%arg0: i32) -> (i32, i32, i32) {
    %c0_i32 = arith.constant 0 : i32
    %c0_i32_0 = arith.constant 0 : i32
    %c0_i32_1 = arith.constant 0 : i32
    %c0_i32_2 = arith.constant 0 : i32
    return %c0_i32, %c0_i32_0, %c0_i32_1 : i32, i32, i32
  }
  func.func @transform_8(%arg0: i32) -> (i32, i32) {
    %c0_i32 = arith.constant 0 : i32
    %c0_i32_0 = arith.constant 0 : i32
    %c0_i32_1 = arith.constant 0 : i32
    return %c0_i32, %c0_i32_0 : i32, i32
  }
  func.func @transform_9(%arg0: i32) -> (i32, i32, i32) {
    %c0_i32 = arith.constant 0 : i32
    %c0_i32_0 = arith.constant 0 : i32
    %c0_i32_1 = arith.constant 0 : i32
    %c0_i32_2 = arith.constant 0 : i32
    return %c0_i32, %c0_i32_0, %c0_i32_1 : i32, i32, i32
  }
  func.func @transform_10(%arg0: i32) -> (i32, i32) {
    %c0_i32 = arith.constant 0 : i32
    %c0_i32_0 = arith.constant 0 : i32
    %c0_i32_1 = arith.constant 0 : i32
    return %c0_i32, %c0_i32_0 : i32, i32
  }
  func.func @transform_11(%arg0: i32) -> (i32, i32, i32) {
    %c0_i32 = arith.constant 0 : i32
    %c0_i32_0 = arith.constant 0 : i32
    %c0_i32_1 = arith.constant 0 : i32
    %c0_i32_2 = arith.constant 0 : i32
    return %c0_i32, %c0_i32_0, %c0_i32_1 : i32, i32, i32
  }
  func.func @transform_12(%arg0: i32) -> (i32, i32) {
    %c0_i32 = arith.constant 0 : i32
    %c0_i32_0 = arith.constant 0 : i32
    %c0_i32_1 = arith.constant 0 : i32
    return %c0_i32, %c0_i32_0 : i32, i32
  }
  func.func @transform_13(%arg0: i32) -> (i32, i32, i32) {
    %c0_i32 = arith.constant 0 : i32
    %c0_i32_0 = arith.constant 0 : i32
    %c0_i32_1 = arith.constant 0 : i32
    %c0_i32_2 = arith.constant 0 : i32
    return %c0_i32, %c0_i32_0, %c0_i32_1 : i32, i32, i32
  }
  func.func @transform_14(%arg0: i32) -> (i32, i32) {
    %c0_i32 = arith.constant 0 : i32
    %c0_i32_0 = arith.constant 0 : i32
    %c0_i32_1 = arith.constant 0 : i32
    return %c0_i32, %c0_i32_0 : i32, i32
  }
  func.func @transform_15(%arg0: i32) -> (i32, i32, i32) {
    %c0_i32 = arith.constant 0 : i32
    %c0_i32_0 = arith.constant 0 : i32
    %c0_i32_1 = arith.constant 0 : i32
    return %arg0, %c0_i32, %c0_i32_0 : i32, i32, i32
  }
}

</mosaic_0001>

<bundles_post_ra>
// kernel: squeeze.1
= control target key start
LH: loop header
LB: loop body
LE: loop exit
PB: predicated region body
PF: predicated region fallthrough
CT: control target
= control target key end

     0   :  { %vm3_vm0 = vcmask 31744   ;;  %s399_s12 = smov 124   ;;  %s401_s15 = smov 116   ;;  %s552_s0 = inlined_call_operand.vmem [shape: f32[2,1,16,16], index: 0, kind: input, shape index: {}]   ;;  %s553_s1 = inlined_call_operand.vmem [shape: f32[2,4,4,4,4], index: 1, kind: output, shape index: {}]  }
   0x1   :  { %v357_v0 = vld [vmem:[%s552_s0 + $0x10] sm:$0xff]   ;;  %v27_v1 = vld [vmem:[%s552_s0] sm:$0xff]   ;;  %v358_v2 = vld [vmem:[%s552_s0 + $0x18] sm:$0xff]  }
   0x2   :  { %46 = vrot.lane.b32.xlu1 %v357_v0, %s399_s12  ;;  %28 = vrot.lane.b32.xlu0 %v27_v1, %s399_s12  ;;  %v356_v3 = vld [vmem:[%s552_s0 + $0x8] sm:$0xff]   ;;  %4 = vst.msk [vmem:[#allocation0] ss:$8 sm:$0xf] %vm3_vm0, %v27_v1   ;;  %s400_s0 = smov 120  }
   0x3   :  { %5 = vst.msk [vmem:[#allocation0] ss:$8 sm:$0xf0] %vm3_vm0, %v27_v1   ;;  %24 = vst.msk [vmem:[#allocation0 + $0xc0] ss:$8 sm:$0xf] %vm3_vm0, %v358_v2  }
   0x4   :  { %26 = vst.msk [vmem:[#allocation0 + $0xc0] ss:$8 sm:$0xf0] %vm3_vm0, %v358_v2   ;;  %17 = vst.msk [vmem:[#allocation0 + $0x80] ss:$8 sm:$0xf] %vm3_vm0, %v357_v0  }
   0x5   :  { %19 = vst.msk [vmem:[#allocation0 + $0x80] ss:$8 sm:$0xf0] %vm3_vm0, %v357_v0   ;;  %12 = vst.msk [vmem:[#allocation0 + $0x40] ss:$8 sm:$0xf0] %vm3_vm0, %v356_v3  }
   0x6   :  { %10 = vst.msk [vmem:[#allocation0 + $0x40] ss:$8 sm:$0xf] %vm3_vm0, %v356_v3   ;;  %55 = vrot.lane.b32.xlu1 %v358_v2, %s399_s12  ;;  %37 = vrot.lane.b32.xlu0 %v356_v3, %s399_s12 }
   0xa   :  { %72 = vrot.lane.b32.xlu1 %v356_v3, %s400_s0  ;;  %63 = vrot.lane.b32.xlu0 %v27_v1, %s400_s0 }
   0xe   :  { %90 = vrot.lane.b32.xlu1 %v358_v2, %s400_s0  ;;  %81 = vrot.lane.b32.xlu0 %v357_v0, %s400_s0 }
  0x12   :  { %107 = vrot.lane.b32.xlu1 %v356_v3, %s401_s15  ;;  %98 = vrot.lane.b32.xlu0 %v27_v1, %s401_s15 }
  0x16   :  { %125 = vrot.lane.b32.xlu1 %v358_v2, %s401_s15  ;;  %116 = vrot.lane.b32.xlu0 %v357_v0, %s401_s15 }
  0x74   :  { %v47_v4 = vpop.permute.xlu1 %46   ;;  %v29_v5 = vpop.permute.xlu0 %28  }
  0x75   :  { %50 = vst.msk [vmem:[#allocation0 + $0x81] ss:$8 sm:$0xf] %vm3_vm0, %v47_v4   ;;  %52 = vst.msk [vmem:[#allocation0 + $0x81] ss:$8 sm:$0xf0] %vm3_vm0, %v47_v4  }
  0x76   :  { %32 = vst.msk [vmem:[#allocation0 + $0x1] ss:$8 sm:$0xf] %vm3_vm0, %v29_v5   ;;  %34 = vst.msk [vmem:[#allocation0 + $0x1] ss:$8 sm:$0xf0] %vm3_vm0, %v29_v5  }
  0x78   :  { %v56_v6 = vpop.permute.xlu1 %55   ;;  %v38_v7 = vpop.permute.xlu0 %37  }
  0x79   :  { %59 = vst.msk [vmem:[#allocation0 + $0xc1] ss:$8 sm:$0xf] %vm3_vm0, %v56_v6   ;;  %61 = vst.msk [vmem:[#allocation0 + $0xc1] ss:$8 sm:$0xf0] %vm3_vm0, %v56_v6  }
  0x7a   :  { %41 = vst.msk [vmem:[#allocation0 + $0x41] ss:$8 sm:$0xf] %vm3_vm0, %v38_v7   ;;  %43 = vst.msk [vmem:[#allocation0 + $0x41] ss:$8 sm:$0xf0] %vm3_vm0, %v38_v7  }
  0x7c   :  { %v73_v8 = vpop.permute.xlu1 %72   ;;  %v64_v9 = vpop.permute.xlu0 %63  }
  0x7d   :  { %76 = vst.msk [vmem:[#allocation0 + $0x42] ss:$8 sm:$0xf] %vm3_vm0, %v73_v8   ;;  %78 = vst.msk [vmem:[#allocation0 + $0x42] ss:$8 sm:$0xf0] %vm3_vm0, %v73_v8  }
  0x7e   :  { %67 = vst.msk [vmem:[#allocation0 + $0x2] ss:$8 sm:$0xf] %vm3_vm0, %v64_v9   ;;  %69 = vst.msk [vmem:[#allocation0 + $0x2] ss:$8 sm:$0xf0] %vm3_vm0, %v64_v9  }
  0x80   :  { %v91_v10 = vpop.permute.xlu1 %90   ;;  %v82_v11 = vpop.permute.xlu0 %81  }
  0x81   :  { %94 = vst.msk [vmem:[#allocation0 + $0xc2] ss:$8 sm:$0xf] %vm3_vm0, %v91_v10   ;;  %96 = vst.msk [vmem:[#allocation0 + $0xc2] ss:$8 sm:$0xf0] %vm3_vm0, %v91_v10  }
  0x82   :  { %85 = vst.msk [vmem:[#allocation0 + $0x82] ss:$8 sm:$0xf] %vm3_vm0, %v82_v11   ;;  %87 = vst.msk [vmem:[#allocation0 + $0x82] ss:$8 sm:$0xf0] %vm3_vm0, %v82_v11  }
  0x84   :  { %v108_v12 = vpop.permute.xlu1 %107   ;;  %v99_v13 = vpop.permute.xlu0 %98  }
  0x85   :  { %111 = vst.msk [vmem:[#allocation0 + $0x43] ss:$8 sm:$0xf] %vm3_vm0, %v108_v12   ;;  %113 = vst.msk [vmem:[#allocation0 + $0x43] ss:$8 sm:$0xf0] %vm3_vm0, %v108_v12  }
  0x86   :  { %102 = vst.msk [vmem:[#allocation0 + $0x3] ss:$8 sm:$0xf] %vm3_vm0, %v99_v13   ;;  %104 = vst.msk [vmem:[#allocation0 + $0x3] ss:$8 sm:$0xf0] %vm3_vm0, %v99_v13  }
  0x88   :  { %v126_v14 = vpop.permute.xlu1 %125   ;;  %v117_v15 = vpop.permute.xlu0 %116  }
  0x89   :  { %129 = vst.msk [vmem:[#allocation0 + $0xc3] ss:$8 sm:$0xf] %vm3_vm0, %v126_v14   ;;  %131 = vst.msk [vmem:[#allocation0 + $0xc3] ss:$8 sm:$0xf0] %vm3_vm0, %v126_v14  }
  0x8a   :  { %120 = vst.msk [vmem:[#allocation0 + $0x83] ss:$8 sm:$0xf] %vm3_vm0, %v117_v15   ;;  %122 = vst.msk [vmem:[#allocation0 + $0x83] ss:$8 sm:$0xf0] %vm3_vm0, %v117_v15  }
  0x8c   :  { %v180_v16 = vld [vmem:[#allocation0 + $0x40] sm:$0xf]  ;;  %v186_v17 = vld [vmem:[#allocation0 + $0x48] sm:$0xf]  ;;  %v192_v18 = vld [vmem:[#allocation0 + $0x50] sm:$0xf] }
  0x8d   :  { %372 = vst [vmem:[%s553_s1 + $0x20] sm:$0xf] %v180_v16  ;;  %373 = vst [vmem:[%s553_s1 + $0x24] sm:$0xf] %v186_v17  ;;  %v198_v19 = vld [vmem:[#allocation0 + $0x58] sm:$0xf] }
  0x8e   :  { %374 = vst [vmem:[%s553_s1 + $0x28] sm:$0xf] %v192_v18  ;;  %v204_v20 = vld [vmem:[#allocation0 + $0x60] sm:$0xf]  ;;  %v210_v21 = vld [vmem:[#allocation0 + $0x68] sm:$0xf] }
  0x8f   :  { %375 = vst [vmem:[%s553_s1 + $0x2c] sm:$0xf] %v198_v19  ;;  %v216_v22 = vld [vmem:[#allocation0 + $0x70] sm:$0xf]  ;;  %v222_v23 = vld [vmem:[#allocation0 + $0x78] sm:$0xf] }
  0x90   :  { %v135_v24 = vld [vmem:[#allocation0] sm:$0xf]  ;;  %376 = vst [vmem:[%s553_s1 + $0x30] sm:$0xf] %v204_v20  ;;  %377 = vst [vmem:[%s553_s1 + $0x34] sm:$0xf] %v210_v21 }
  0x91   :  { %137 = vst [vmem:[%s553_s1] sm:$0xf] %v135_v24  ;;  %v139_v25 = vld [vmem:[#allocation0 + $0x8] sm:$0xf]  ;;  %v144_v26 = vld [vmem:[#allocation0 + $0x10] sm:$0xf] }
  0x92   :  { %v150_v27 = vld [vmem:[#allocation0 + $0x18] sm:$0xf]  ;;  %378 = vst [vmem:[%s553_s1 + $0x38] sm:$0xf] %v216_v22  ;;  %379 = vst [vmem:[%s553_s1 + $0x3c] sm:$0xf] %v222_v23 }
  0x93   :  { %365 = vst [vmem:[%s553_s1 + $0x4] sm:$0xf] %v139_v25  ;;  %366 = vst [vmem:[%s553_s1 + $0x8] sm:$0xf] %v144_v26  ;;  %v156_v28 = vld [vmem:[#allocation0 + $0x20] sm:$0xf] }
  0x94   :  { %367 = vst [vmem:[%s553_s1 + $0xc] sm:$0xf] %v150_v27  ;;  %v162_v29 = vld [vmem:[#allocation0 + $0x28] sm:$0xf]  ;;  %v168_v30 = vld [vmem:[#allocation0 + $0x30] sm:$0xf] }
  0x95   :  { %368 = vst [vmem:[%s553_s1 + $0x10] sm:$0xf] %v156_v28  ;;  %369 = vst [vmem:[%s553_s1 + $0x14] sm:$0xf] %v162_v29  ;;  %v174_v31 = vld [vmem:[#allocation0 + $0x38] sm:$0xf] }
  0x96   :  { %370 = vst [vmem:[%s553_s1 + $0x18] sm:$0xf] %v168_v30  ;;  %v276_v32 = vld [vmem:[#allocation0 + $0xc0] sm:$0xf]  ;;  %v282_v33 = vld [vmem:[#allocation0 + $0xc8] sm:$0xf] }
  0x97   :  { %371 = vst [vmem:[%s553_s1 + $0x1c] sm:$0xf] %v174_v31  ;;  %388 = vst [vmem:[%s553_s1 + $0x60] sm:$0xf] %v276_v32  ;;  %v288_v34 = vld [vmem:[#allocation0 + $0xd0] sm:$0xf] }
  0x98   :  { %389 = vst [vmem:[%s553_s1 + $0x64] sm:$0xf] %v282_v33  ;;  %v294_v35 = vld [vmem:[#allocation0 + $0xd8] sm:$0xf]  ;;  %v300_v36 = vld [vmem:[#allocation0 + $0xe0] sm:$0xf] }
  0x99   :  { %390 = vst [vmem:[%s553_s1 + $0x68] sm:$0xf] %v288_v34  ;;  %391 = vst [vmem:[%s553_s1 + $0x6c] sm:$0xf] %v294_v35  ;;  %v306_v37 = vld [vmem:[#allocation0 + $0xe8] sm:$0xf] }
  0x9a   :  { %392 = vst [vmem:[%s553_s1 + $0x70] sm:$0xf] %v300_v36  ;;  %v312_v38 = vld [vmem:[#allocation0 + $0xf0] sm:$0xf]  ;;  %v318_v39 = vld [vmem:[#allocation0 + $0xf8] sm:$0xf] }
  0x9b   :  { %393 = vst [vmem:[%s553_s1 + $0x74] sm:$0xf] %v306_v37  ;;  %394 = vst [vmem:[%s553_s1 + $0x78] sm:$0xf] %v312_v38  ;;  %v228_v40 = vld [vmem:[#allocation0 + $0x80] sm:$0xf] }
  0x9c   :  { %395 = vst [vmem:[%s553_s1 + $0x7c] sm:$0xf] %v318_v39  ;;  %v234_v41 = vld [vmem:[#allocation0 + $0x88] sm:$0xf]  ;;  %v240_v42 = vld [vmem:[#allocation0 + $0x90] sm:$0xf] }
  0x9d   :  { %380 = vst [vmem:[%s553_s1 + $0x40] sm:$0xf] %v228_v40  ;;  %381 = vst [vmem:[%s553_s1 + $0x44] sm:$0xf] %v234_v41  ;;  %v246_v43 = vld [vmem:[#allocation0 + $0x98] sm:$0xf] }
  0x9e   :  { %382 = vst [vmem:[%s553_s1 + $0x48] sm:$0xf] %v240_v42  ;;  %v252_v44 = vld [vmem:[#allocation0 + $0xa0] sm:$0xf]  ;;  %v258_v45 = vld [vmem:[#allocation0 + $0xa8] sm:$0xf] }
  0x9f   :  { %383 = vst [vmem:[%s553_s1 + $0x4c] sm:$0xf] %v246_v43  ;;  %384 = vst [vmem:[%s553_s1 + $0x50] sm:$0xf] %v252_v44  ;;  %v264_v46 = vld [vmem:[#allocation0 + $0xb0] sm:$0xf] }
  0xa0   :  { %385 = vst [vmem:[%s553_s1 + $0x54] sm:$0xf] %v258_v45  ;;  %v270_v47 = vld [vmem:[#allocation0 + $0xb8] sm:$0xf]  ;;  %386 = vst [vmem:[%s553_s1 + $0x58] sm:$0xf] %v264_v46 }
  0xa1   :  { %387 = vst [vmem:[%s553_s1 + $0x5c] sm:$0xf] %v270_v47 }

// kernel: loamp_forward.5
= control target key start
LH: loop header
LB: loop body
LE: loop exit
PB: predicated region body
PF: predicated region fallthrough
CT: control target
= control target key end

     0   :  { %v243_v0 = vmov 0.0|0.0   ;;  %vm244_vm0 = vmmov 0   ;;  %v245_v3 = vmov 0.0   ;;  %vm16_vm1 = vcmask 130048   ;;  %s284_s0 = inlined_call_operand.vmem [shape: f32[16,32], index: 0, kind: input, shape index: {}]   ;;  %s285_s1 = inlined_call_operand.vmem [shape: f32[8,16], index: 1, kind: input, shape index: {}]   ;;  %s286_s2 = inlined_call_operand.vmem [shape: f32[8,32], index: 2, kind: output, shape index: {0}]   ;;  %s287_s3 = inlined_call_operand.vmem [shape: f32[16,32], index: 3, kind: output, shape index: {1}]  }
   0x1   :  { %237 = vmatprep.subr.bf16.mxu0 %v243_v0  ;;  %v14_v1 = vld [vmem:[%s284_s0] sm:$0xff]  ;;  %v15_v2 = vld [vmem:[%s284_s0 + $0x8] sm:$0xff]  ;;  %229 = vmatprep.mubr.msk.f32.mxu0 %vm244_vm0, %v245_v3  ;;  %vm124_vm2 = vcmask 64512   ;;  %vm90_vm3 = vcmask 261120  }
   0x2   :  { %v13_v4 = vld [vmem:[%s285_s1] sm:$0xff]  ;;  %v238_v5 = vpack.c.bf16 %v15_v2, %v14_v1 }
   0x3   :  { %92 = vxpose.xlu0.b32.start.end [1/1] (short) (narrow) %v13_v4, 16 }
   0x4   :  { %239 = vmatpush3.bf16.msra.mxu0 %v238_v5 }
   0x7   :  { %230 = vmatmul.mubr.msk.f32.vlgmr.msra.gmra.mrb[0].mxu0 %vm16_vm1, %v13_v4 }
  0x83   :  { %v108_v6 = vpop.trf.xlu0 }
  0x84   :  { %234 = vmatprep.mubr.msk.f32.mxu1 %vm124_vm2, %v108_v6 }
  0x87   :  { %v109_v8 = vpop.trf.xlu0 }
  0xda   :  { %v86_v7 = vpop.f32.mrb[0].mxu0 }
  0xdb   :  { %91 = vst.msk [vmem:[%s286_s2] sm:$0xff] %vm90_vm3, %v86_v7  ;;  %v231_v9 = vpop.f32.mrb[1].mxu0  ;;  %232 = vmatprep.subr.mxu1 %v86_v7 }
  0xdc   :  { %233 = vmatpush3.msra.mxu1 %v86_v7 }
  0xdd   :  { %235 = vmatmul.mubr.msk.f32.vlgmr.msra.gmra.mrb[0].mxu1 %vm124_vm2, %v109_v8 }
 0x1b0   :  { %v236_v10 = vpop.f32.mrb[0].mxu1 }
 0x1b1   :  { %207 = vst.msk [vmem:[%s287_s3 + $0x8] sm:$0xff] %vm90_vm3, %v236_v10  ;;  %v197_v11 = vpop.f32.mrb[1].mxu1 }
 0x1b2   :  { %206 = vst.msk [vmem:[%s287_s3] sm:$0xff] %vm90_vm3, %v197_v11 }

// kernel: loamp_forward.6
= control target key start
LH: loop header
LB: loop body
LE: loop exit
PB: predicated region body
PF: predicated region fallthrough
CT: control target
= control target key end

     0   :  { %v243_v0 = vmov 0.0|0.0   ;;  %vm244_vm0 = vmmov 0   ;;  %v245_v3 = vmov 0.0   ;;  %vm18_vm1 = vcmask 130048   ;;  %s284_s0 = inlined_call_operand.vmem [shape: f32[16,32], index: 0, kind: input, shape index: {}, may-alias: {0,3}]   ;;  %s285_s2 = inlined_call_operand.vmem [shape: f32[8,16], index: 2, kind: input, shape index: {}]   ;;  %s286_s1 = inlined_call_operand.vmem [shape: f32[8,32], index: 1, kind: input, shape index: {}]   ;;  %s287_s3 = inlined_call_operand.vmem [shape: f32[16,32], index: 3, kind: output, shape index: {}, may-alias: {0,3}]  }
   0x1   :  { %237 = vmatprep.subr.bf16.mxu0 %v243_v0  ;;  %v15_v1 = vld [vmem:[%s284_s0] sm:$0xff]  ;;  %v16_v2 = vld [vmem:[%s284_s0 + $0x8] sm:$0xff]  ;;  %229 = vmatprep.mubr.msk.f32.mxu0 %vm244_vm0, %v245_v3  ;;  %vm125_vm2 = vcmask 64512   ;;  %vm209_vm3 = vcmask 261120  }
   0x2   :  { %v14_v4 = vld [vmem:[%s285_s2] sm:$0xff]  ;;  %v238_v5 = vpack.c.bf16 %v16_v2, %v15_v1 }
   0x3   :  { %93 = vxpose.xlu0.b32.start.end [1/1] (short) (narrow) %v14_v4, 16  ;;  %v17_v7 = vld [vmem:[%s286_s1] sm:$0xff] }
   0x4   :  { %239 = vmatpush3.bf16.msra.mxu0 %v238_v5 }
   0x7   :  { %230 = vmatmul.mubr.msk.f32.vlgmr.msra.gmra.mrb[0].mxu0 %vm18_vm1, %v14_v4 }
  0x83   :  { %v109_v6 = vpop.trf.xlu0 }
  0x84   :  { %234 = vmatprep.mubr.msk.f32.mxu1 %vm125_vm2, %v109_v6 }
  0x87   :  { %v110_v11 = vpop.trf.xlu0 }
  0xda   :  { %v88_v8 = vpop.f32.mrb[0].mxu0 }
  0xdb   :  { %v92_v9 = vsub.f32 %v17_v7, %v88_v8  ;;  %v231_v10 = vpop.f32.mrb[1].mxu0 }
  0xdd   :  { %232 = vmatprep.subr.mxu1 %v92_v9 }
  0xde   :  { %233 = vmatpush3.msra.mxu1 %v92_v9 }
  0xdf   :  { %235 = vmatmul.mubr.msk.f32.vlgmr.msra.gmra.mrb[0].mxu1 %vm125_vm2, %v110_v11 }
 0x1b2   :  { %v236_v12 = vpop.f32.mrb[0].mxu1 }
 0x1b3   :  { %v208_v13 = vadd.f32 %v236_v12, %v16_v2  ;;  %v198_v14 = vpop.f32.mrb[1].mxu1 }
 0x1b4   :  { %v207_v15 = vadd.f32 %v198_v14, %v15_v1 }
 0x1b5   :  { %211 = vst.msk [vmem:[%s287_s3 + $0x8] sm:$0xff] %vm209_vm3, %v208_v13 }
 0x1b6   :  { %210 = vst.msk [vmem:[%s287_s3] sm:$0xff] %vm209_vm3, %v207_v15 }

// kernel: loamp_forward.7
= control target key start
LH: loop header
LB: loop body
LE: loop exit
PB: predicated region body
PF: predicated region fallthrough
CT: control target
= control target key end

     0   :  { %s4119_s20 = smov 0   ;;  %s5157_s0 = inlined_call_operand.vmem [shape: f32[2,1,256], index: 0, kind: input, shape index: {}]   ;;  %s5158_s1 = inlined_call_operand.vmem [shape: f32[2,1,256], index: 1, kind: input, shape index: {}]   ;;  %s5159_s2 = inlined_call_operand.vmem [shape: f32[9,256], index: 2, kind: input, shape index: {}]   ;;  %s5160_s3 = inlined_call_operand.vmem [shape: bf16[9,8,1], index: 3, kind: input, shape index: {}]   ;;  %s5161_s4 = inlined_call_operand.vmem [shape: f32[8,1], index: 4, kind: input, shape index: {}]   ;;  %s5162_s5 = inlined_call_operand.vmem [shape: bf16[9,8,8], index: 5, kind: input, shape index: {}]   ;;  %s5163_s6 = inlined_call_operand.vmem [shape: f32[8,1], index: 6, kind: input, shape index: {}]   ;;  %s5164_s7 = inlined_call_operand.vmem [shape: bf16[9,8,8], index: 7, kind: input, shape index: {}]   ;;  %s5165_s8 = inlined_call_operand.vmem [shape: f32[8,1], index: 8, kind: input, shape index: {}]   ;;  %s5166_s9 = inlined_call_operand.vmem [shape: bf16[9,8,8], index: 9, kind: input, shape index: {}]   ;;  %s5167_s10 = inlined_call_operand.vmem [shape: f32[8,1], index: 10, kind: input, shape index: {}]   ;;  %s5168_s11 = inlined_call_operand.vmem [shape: bf16[9,8,8], index: 11, kind: input, shape index: {}]   ;;  %s5169_s12 = inlined_call_operand.vmem [shape: f32[8,1], index: 12, kind: input, shape index: {}]   ;;  %s5170_s13 = inlined_call_operand.vmem [shape: bf16[9,1,8], index: 13, kind: input, shape index: {}]   ;;  %s5171_s14 = inlined_call_operand.<no memory space> [shape: f32[1,1], index: 14, kind: input, shape index: {}]   ;;  %s5172_s15 = inlined_call_operand.vmem [shape: f32[2,1,256], index: 15, kind: output, shape index: {}]  }
   0x1   :  { %v20_v0 = vstv %s5171_s14 }
   0x2   :  { %21 = vst [vmem:[#allocation2] sm:$0x1] %v20_v0 }
   0x3 LB: > { %s3830_s21 = sadd.s32 4294967295, %s4024_s20   ;;  %p3834_p0 = scmp.ge.s32.totalorder %s4024_s20, 1  ;;  %s4024_s20 = sphi %s4119_s20, %s27_s20  }
   0x4   : > { %p447_p1 = scmp.lt.s32.totalorder %s4024_s20, 3 }
   0x6   : > { %p448_p2 = pnand %p3834_p0, %p447_p1 }
   0x7   : > { %v3839_v1 = vld [vmem:[%s5160_s3 + $0x8] sm:$0xff] (!%p448_p2)   ;;  %v537_v2 = vld [vmem:[%s5160_s3] sm:$0xff] (!%p448_p2)   ;;  %p497_p3 = scmp.lt.s32.totalorder (!%p448_p2), %s3830_s21, 1  ;;  %v516_v3 = vlaneseq (!%p448_p2)  ;;  %v4026_v4 = vmov (!%p448_p2), 0   ;;  %s4027_s29 = smov (!%p448_p2), 17   ;;  %v3841_v17 = vld [vmem:[%s5160_s3 + $0x10] sm:$0xff] (!%p448_p2)  }
   0x8   : > { %451 = sbr.rel (%p448_p2) target bundleno = 2082 (0x822), region = 80  ;;  %4002 = vset.pattern.permute.xlu1 (!%p448_p2), %v4026_v4  ;;  %3996 = vset.pattern.permute.xlu0 (!%p448_p2), %v4026_v4  ;;  %v604_v5 = vunpack.c.l.bf16 (!%p448_p2), %v3839_v1  ;;  %v637_v6 = vunpack.c.h.bf16 (!%p448_p2), %v3839_v1  ;;  %v538_v7 = vunpack.c.l.bf16 (!%p448_p2), %v537_v2  ;;  %v571_v8 = vunpack.c.h.bf16 (!%p448_p2), %v537_v2  ;;  %s4028_s30 = smov (!%p448_p2), 16   ;;  %v3843_v20 = vld [vmem:[%s5160_s3 + $0x18] sm:$0xff] (!%p448_p2)   ;;  %v3845_v25 = vld [vmem:[%s5160_s3 + $0x20] sm:$0xf] (!%p448_p2)  ;;  %v4218_v38 = vld [vmem:[%s5159_s2 + $0x8] sm:$0xff] (!%p448_p2) }
   0x9   : > { %v4136_v9 = vshrl.u32 (!%p448_p2), %v516_v3, 7  ;;  %887 = vmatprep.mubr.bf16.mxu0 (!%p448_p2), %v4026_v4  ;;  %937 = vmatprep.mubr.bf16.mxu1 (!%p448_p2), %v4026_v4  ;;  %s4029_s18 = smov (!%p448_p2), 15   ;;  %v657_v18 = vunpack.c.l.bf16 (!%p448_p2), %v3841_v17  ;;  %v682_v19 = vunpack.c.h.bf16 (!%p448_p2), %v3841_v17  ;;  %s4030_s22 = smov (!%p448_p2), 1   ;;  %v715_v22 = vunpack.c.l.bf16 (!%p448_p2), %v3843_v20  ;;  %v795_v27 = vld [vmem:[%s5161_s4] sm:$0xff] (!%p448_p2) }
   0xa   : > { %v4003_v10 = vpack.i.bf16 (!%p448_p2), %v637_v6, %v604_v5  ;;  %v3997_v11 = vpack.i.bf16 (!%p448_p2), %v571_v8, %v538_v7  ;;  %v748_v23 = vunpack.c.h.bf16 (!%p448_p2), %v3843_v20  ;;  %s4031_s23 = smov (!%p448_p2), 127   ;;  %s4032_s14 = smov (!%p448_p2), 113   ;;  %v777_v26 = vunpack.c.l.bf16 (!%p448_p2), %v3845_v25  ;;  %v4213_v37 = vld [vmem:[%s5159_s2] sm:$0xff] (!%p448_p2) }
   0xb   : > { %v4143_v12 = vsub.s32 (!%p448_p2), 0, %v4136_v9  ;;  %v4146_v13 = vsub.s32 (!%p448_p2), 1, %v4136_v9  ;;  %v4008_v21 = vpack.i.bf16 (!%p448_p2), %v682_v19, %v657_v18  ;;  %s4033_s27 = smov (!%p448_p2), 112   ;;  %v4207_v34 = vand.u32 (!%p448_p2), 127, %v516_v3 }
   0xc   : > { %4004 = vperm.xlu1 (!%p448_p2), %4002, %v4003_v10   ;;  %3998 = vperm.xlu0 (!%p448_p2), %3996, %v3997_v11   ;;  %v4013_v24 = vpack.i.bf16 (!%p448_p2), %v748_v23, %v715_v22  ;;  %v563_v39 = vrot.slane (!%p448_p2), %v4213_v37, 1  ;;  %v564_v40 = vrot.slane (!%p448_p2), %v4218_v38, 1  ;;  %v596_v45 = vrot.slane (!%p448_p2), %v4213_v37, 2 }
   0xd   : > { %vm558_vm0 = vcmp.lt.s32.totalorder (!%p448_p2), %v4207_v34, 16  ;;  %vm532_vm1 = vcmp.lt.s32.totalorder (!%p448_p2), %v4207_v34, 17  ;;  %vm593_vm2 = vcmp.lt.s32.totalorder (!%p448_p2), %v4207_v34, 15  ;;  %v597_v46 = vrot.slane (!%p448_p2), %v4218_v38, 2 }
   0xe   : > { %vm626_vm3 = vcmp.lt.s32.totalorder (!%p448_p2), %v4207_v34, 1  ;;  %v629_v55 = vrot.slane (!%p448_p2), %v4213_v37, 3  ;;  %v630_v56 = vrot.slane (!%p448_p2), %v4218_v38, 3  ;;  %vm671_vm4 = vcmp.lt.s32.totalorder (!%p448_p2), %v4207_v34, 127 }
   0xf   : > { %s5174_s21 = smov (!%p497_p3, %s3830_s21), 1  ;;  %v674_v1 = vrot.slane %v4213_v37, 5  ;;  %v675_v2 = vrot.slane %v4218_v38, 5  ;;  %vm704_vm5 = vcmp.lt.s32.totalorder %v4207_v34, 113  ;;  %v708_v22 = vrot.slane %v4218_v38, 6 }
  0x10   : > { %s4140_s25 = sshll.u32 %s5174_s21, 1  ;;  %vm737_vm6 = vcmp.lt.s32.totalorder %v4207_v34, 112  ;;  %vm770_vm7 = vcmp.lt.s32.totalorder %v4207_v34, 111  ;;  %vm848_vm8 = vcmask 1043456   ;;  %vm844_vm9 = vcmask 64512  }
  0x11   : > { %s500_s28 = scalar_lea.vmem %s5157_s0, %s4140_s25  ;;  %s508_s17 = scalar_lea.vmem %s5172_s15, %s4140_s25  ;;  %vm3762_vm10 = vcmp.lt.s32.totalorder %v516_v3, 256 }
  0x12   : > { %v514_v14 = vld [vmem:[%s500_s28] sm:$0x3]  ;;  %s4034_s28 = smov 111  }
  0x13   : > { %v4153_v15 = vrot.slane %v514_v14, %v4146_v13  ;;  %v4156_v16 = vrot.slane %v514_v14, %v4143_v12 }
  0x15   : > { %528 = vrot.lane.b32.xlu1 %v4153_v15, %s4027_s29  ;;  %526 = vrot.lane.b32.xlu0 %v4156_v16, %s4027_s29 }
  0x19   : > { %554 = vrot.lane.b32.xlu1 %v4156_v16, %s4028_s30  ;;  %556 = vrot.lane.b32.xlu0 %v4153_v15, %s4028_s30 }
  0x1d   : > { %591 = vrot.lane.b32.xlu1 %v4153_v15, %s4029_s18  ;;  %589 = vrot.lane.b32.xlu0 %v4156_v16, %s4029_s18 }
  0x21   : > { %624 = vrot.lane.b32.xlu1 %v4153_v15, %s4030_s22  ;;  %622 = vrot.lane.b32.xlu0 %v4156_v16, %s4030_s22 }
  0x25   : > { %667 = vrot.lane.b32.xlu1 %v4156_v16, %s4031_s23  ;;  %4009 = vperm.xlu0 %3996, %v4008_v21   ;;  %v707_v21 = vrot.slane %v4213_v37, 6 }
  0x29   : > { %4014 = vperm.xlu1 %4002, %v4013_v24   ;;  %669 = vrot.lane.b32.xlu0 %v4153_v15, %s4031_s23 }
  0x2d   : > { %702 = vrot.lane.b32.xlu1 %v4153_v15, %s4032_s14  ;;  %700 = vrot.lane.b32.xlu0 %v4156_v16, %s4032_s14 }
  0x31   : > { %735 = vrot.lane.b32.xlu1 %v4153_v15, %s4033_s27  ;;  %733 = vrot.lane.b32.xlu0 %v4156_v16, %s4033_s27 }
  0x35   : > { %766 = vrot.lane.b32.xlu1 %v4156_v16, %s4034_s28  ;;  %780 = vperm.xlu0 %3996, %v777_v26  }
  0x39   : > { %798 = vperm.xlu1 %4002, %v795_v27   ;;  %768 = vrot.lane.b32.xlu0 %v4153_v15, %s4034_s28 }
  0x8b   : > { %v4202_v28 = vpop.permute.xlu1 %4004  ;;  %v4204_v29 = vpop.permute.xlu0 %3998 }
  0x8c   : > { %v4001_v5 = vunpack.i.h.bf16 %v4204_v29  ;;  %v4006_v19 = vunpack.i.l.bf16 %v4202_v28  ;;  %v4000_v20 = vunpack.i.l.bf16 %v4204_v29  ;;  %v4007_v27 = vunpack.i.h.bf16 %v4202_v28 }
  0x8f   : > { %v529_v30 = vpop.permute.xlu1 %528  ;;  %v527_v31 = vpop.permute.xlu0 %526 }
  0x90   : > { %v533_v43 = vsel %vm532_vm1, %v527_v31, %v529_v30  ;;  %v534_v44 = vsel %vm532_vm1, %v529_v30, %v527_v31 }
  0x91   : > { %v535_v53 = vmul.f32 %v534_v44, %v4213_v37  ;;  %v536_v54 = vmul.f32 %v533_v43, %v4218_v38 }
  0x93   : > { %v555_v32 = vpop.permute.xlu1 %554  ;;  %v557_v33 = vpop.permute.xlu0 %556  ;;  %v547_v8 = vrot.slane %v535_v53, %v4143_v12  ;;  %v551_v10 = vrot.slane %v536_v54, %v4143_v12 }
  0x94   : > { %v559_v41 = vsel %vm558_vm0, %v555_v32, %v557_v33  ;;  %v560_v42 = vsel %vm558_vm0, %v557_v33, %v555_v32 }
  0x95   : > { %v567_v51 = vmul.f32 %v563_v39, %v560_v42  ;;  %v568_v52 = vmul.f32 %v564_v40, %v559_v41  ;;  %v552_v29 = vmul.f32 %v4000_v20, %v547_v8  ;;  %v553_v32 = vmul.f32 %v4000_v20, %v551_v10 }
  0x97   : > { %v592_v35 = vpop.permute.xlu1 %591  ;;  %v590_v36 = vpop.permute.xlu0 %589  ;;  %v580_v63 = vrot.slane %v567_v51, %v4143_v12  ;;  %v584_v0 = vrot.slane %v568_v52, %v4143_v12 }
  0x98   : > { %v594_v49 = vsel %vm593_vm2, %v590_v36, %v592_v35  ;;  %v595_v50 = vsel %vm593_vm2, %v592_v35, %v590_v36 }
  0x99   : > { %v600_v57 = vmul.f32 %v596_v45, %v595_v50  ;;  %v601_v58 = vmul.f32 %v597_v46, %v594_v49  ;;  %v585_v23 = vmul.f32 %v4001_v5, %v580_v63  ;;  %v586_v24 = vmul.f32 %v4001_v5, %v584_v0 }
  0x9a   : > { %v740_v45 = vrot.slane %v4213_v37, 7  ;;  %v741_v46 = vrot.slane %v4218_v38, 7 }
  0x9b   : > { %v625_v47 = vpop.permute.xlu1 %624  ;;  %v623_v48 = vpop.permute.xlu0 %622  ;;  %v613_v11 = vrot.slane %v600_v57, %v4143_v12  ;;  %v617_v14 = vrot.slane %v601_v58, %v4143_v12  ;;  %v587_v43 = vadd.f32 %v585_v23, %v552_v29  ;;  %v588_v44 = vadd.f32 %v586_v24, %v553_v32 }
  0x9c   : > { %v627_v59 = vsel %vm626_vm3, %v623_v48, %v625_v47  ;;  %v628_v60 = vsel %vm626_vm3, %v625_v47, %v623_v48 }
  0x9d   : > { %v633_v6 = vmul.f32 %v629_v55, %v628_v60  ;;  %v634_v7 = vmul.f32 %v630_v56, %v627_v59  ;;  %v618_v33 = vmul.f32 %v4006_v19, %v613_v11  ;;  %v619_v35 = vmul.f32 %v4006_v19, %v617_v14 }
  0x9f   : > { %v668_v61 = vpop.permute.xlu1 %667  ;;  %v646_v30 = vrot.slane %v633_v6, %v4143_v12  ;;  %v650_v31 = vrot.slane %v634_v7, %v4143_v12  ;;  %v620_v50 = vadd.f32 %v618_v33, %v587_v43  ;;  %v621_v51 = vadd.f32 %v619_v35, %v588_v44 }
  0xa1   : > { %v651_v47 = vmul.f32 %v4007_v27, %v646_v30  ;;  %v652_v48 = vmul.f32 %v4007_v27, %v650_v31 }
  0xa3   : > { %v653_v0 = vadd.f32 %v651_v47, %v620_v50 }
  0xa4   : > { %v4247_v62 = vpop.permute.xlu0 %4009 }
  0xa5   : > { %v4011_v49 = vunpack.i.l.bf16 %v4247_v62  ;;  %v4012_v60 = vunpack.i.h.bf16 %v4247_v62 }
  0xa7   : > { %v664_v5 = vmul.f32 %v4011_v49, %v4153_v15  ;;  %v4299_v15 = vld [vmem:[%s5159_s2 + $0x10] sm:$0x1] }
  0xa8   : > { %v4260_v17 = vpop.permute.xlu1 %4014  ;;  %v670_v18 = vpop.permute.xlu0 %669 }
  0xa9   : > { %v672_v25 = vsel %vm671_vm4, %v668_v61, %v670_v18  ;;  %v673_v26 = vsel %vm671_vm4, %v670_v18, %v668_v61  ;;  %v4016_v14 = vunpack.i.l.bf16 %v4260_v17 }
  0xaa   : > { %v678_v40 = vmul.f32 %v674_v1, %v672_v25  ;;  %v679_v41 = vmul.f32 %v675_v2, %v673_v26  ;;  %v654_v1 = vadd.f32 %v652_v48, %v621_v51  ;;  %v663_v2 = vmul.f32 %v4011_v49, %v4156_v16  ;;  %v4304_v16 = vld [vmem:[%s5159_s2 + $0x18] sm:$0x1]  ;;  %v1434_v51 = vld [vmem:[%s5163_s6] sm:$0xff] }
  0xac   : > { %v703_v36 = vpop.permute.xlu1 %702  ;;  %v701_v39 = vpop.permute.xlu0 %700  ;;  %v691_v56 = vrot.slane %v678_v40, %v4143_v12  ;;  %v695_v57 = vrot.slane %v679_v41, %v4143_v12  ;;  %v665_v19 = vadd.f32 %v663_v2, %v653_v0  ;;  %v666_v20 = vadd.f32 %v664_v5, %v654_v1 }
  0xad   : > { %v705_v42 = vsel %vm704_vm5, %v701_v39, %v703_v36  ;;  %v706_v28 = vsel %vm704_vm5, %v703_v36, %v701_v39 }
  0xae   : > { %v711_v52 = vmul.f32 %v707_v21, %v705_v42  ;;  %v712_v53 = vmul.f32 %v708_v22, %v706_v28  ;;  %v696_v10 = vmul.f32 %v4012_v60, %v691_v56  ;;  %v697_v11 = vmul.f32 %v4012_v60, %v695_v57 }
  0xaf   : > { %v4017_v21 = vunpack.i.h.bf16 %v4260_v17  ;;  %v4370_v60 = vrot.slane %v4213_v37, %v4143_v12 }
  0xb0   : > { %v736_v54 = vpop.permute.xlu1 %735  ;;  %v734_v55 = vpop.permute.xlu0 %733  ;;  %v724_v6 = vrot.slane %v711_v52, %v4143_v12  ;;  %v728_v7 = vrot.slane %v712_v53, %v4143_v12  ;;  %v698_v26 = vadd.f32 %v696_v10, %v665_v19  ;;  %v699_v27 = vadd.f32 %v697_v11, %v666_v20 }
  0xb1   : > { %v738_v58 = vsel %vm737_vm6, %v734_v55, %v736_v54  ;;  %v739_v59 = vsel %vm737_vm6, %v736_v54, %v734_v55  ;;  %v4356_v52 = vrot.slane %v4213_v37, %v4146_v13  ;;  %v4360_v53 = vrot.slane %v4218_v38, %v4146_v13 }
  0xb2   : > { %v744_v61 = vmul.f32 %v740_v45, %v738_v58  ;;  %v745_v63 = vmul.f32 %v741_v46, %v739_v59  ;;  %v729_v22 = vmul.f32 %v4016_v14, %v724_v6  ;;  %v730_v23 = vmul.f32 %v4016_v14, %v728_v7 }
  0xb3   : > { %v954_v58 = vsub.s32 2, %v4136_v9  ;;  %v4375_v13 = vrot.slane %v4218_v38, %v4143_v12 }
  0xb4   : > { %v781_v8 = vpop.permute.xlu0 %780  ;;  %v757_v18 = vrot.slane %v744_v61, %v4143_v12  ;;  %v761_v62 = vrot.slane %v745_v63, %v4143_v12  ;;  %v767_v24 = vpop.permute.xlu1 %766  ;;  %v731_v36 = vadd.f32 %v729_v22, %v698_v26  ;;  %v732_v17 = vadd.f32 %v730_v23, %v699_v27 }
  0xb5   : > { %v4382_v7 = vrot.slane %v4213_v37, %v954_v58  ;;  %v4389_v14 = vrot.slane %v4218_v38, %v954_v58  ;;  %v1154_v26 = vsub.s32 5, %v4136_v9 }
  0xb6   : > { %v762_v29 = vmul.f32 %v4017_v21, %v757_v18  ;;  %v763_v32 = vmul.f32 %v4017_v21, %v761_v62  ;;  %v3846_v62 = vld [vmem:[%s5162_s5 + $0x4] sm:$0xf] }
  0xb8   : > { %v769_v25 = vpop.permute.xlu0 %768  ;;  %v764_v41 = vadd.f32 %v762_v29, %v731_v36  ;;  %v765_v42 = vadd.f32 %v763_v32, %v732_v17  ;;  %v799_v46 = vpop.permute.xlu1 %798  ;;  %v821_v32 = vld [vmem:[%s5162_s5] sm:$0xf] }
  0xb9   : > { %v771_v30 = vsel %vm770_vm7, %v767_v24, %v769_v25  ;;  %v772_v31 = vsel %vm770_vm7, %v769_v25, %v767_v24 }
  0xba   : > { %v773_v33 = vmul.f32 %v771_v30, %v4299_v15  ;;  %v774_v35 = vmul.f32 %v772_v31, %v4304_v16 }
  0xbc   : > { %v786_v39 = vrot.slane %v773_v33, %v4143_v12  ;;  %v790_v40 = vrot.slane %v774_v35, %v4143_v12 }
  0xbe   : > { %v791_v28 = vmul.f32 %v786_v39, %v781_v8  ;;  %v792_v43 = vmul.f32 %v790_v40, %v781_v8  ;;  %v1026_v8 = vsub.s32 3, %v4136_v9 }
  0xc0   : > { %v793_v44 = vadd.f32 %v791_v28, %v764_v41  ;;  %v794_v45 = vadd.f32 %v792_v43, %v765_v42  ;;  %v4400_v25 = vrot.slane %v4213_v37, %v1026_v8  ;;  %v4409_v29 = vrot.slane %v4218_v38, %v1026_v8 }
  0xc1   : > { %v4424_v28 = vrot.slane %v4213_v37, %v1154_v26  ;;  %v1226_v43 = vsub.s32 6, %v4136_v9 }
  0xc2   : > { %v801_v47 = vadd.f32 %v799_v46, %v793_v44  ;;  %v802_v48 = vadd.f32 %v799_v46, %v794_v45 }
  0xc4   : > { %v4315_v49 = vmax.f32 %v801_v47, 0.0  ;;  %v4317_v50 = vmax.f32 %v802_v48, 0.0  ;;  %v4433_v47 = vrot.slane %v4218_v38, %v1154_v26  ;;  %v3851_v48 = vld [vmem:[%s5162_s5 + $0x8] sm:$0xf]  ;;  %v3857_v26 = vld [vmem:[%s5162_s5 + $0x10] sm:$0xf] }
  0xc6   : > { %826 = vrot.lane.b32.xlu1 %v4317_v50, %s4028_s30  ;;  %824 = vrot.lane.b32.xlu0 %v4315_v49, %s4028_s30  ;;  %v1093_v39 = vpack.c.bf16 %v4317_v50, %v4317_v50  ;;  %v1092_v40 = vpack.c.bf16 %v4315_v49, %v4315_v49 }
  0xca   : > { %807 = vrot.lane.b32.xlu1 %v4317_v50, %s4027_s29  ;;  %805 = vrot.lane.b32.xlu0 %v4315_v49, %s4027_s29 }
  0xce   : > { %948 = vrot.lane.b32.xlu1 %v4317_v50, %s4029_s18  ;;  %946 = vrot.lane.b32.xlu0 %v4315_v49, %s4029_s18 }
  0xd2   : > { %1020 = vrot.lane.b32.xlu1 %v4317_v50, %s4030_s22  ;;  %1018 = vrot.lane.b32.xlu0 %v4315_v49, %s4030_s22 }
  0xd6   : > { %1148 = vrot.lane.b32.xlu1 %v4317_v50, %s4031_s23  ;;  %1146 = vrot.lane.b32.xlu0 %v4315_v49, %s4031_s23 }
  0xda   : > { %1220 = vrot.lane.b32.xlu1 %v4317_v50, %s4032_s14  ;;  %1218 = vrot.lane.b32.xlu0 %v4315_v49, %s4032_s14 }
  0xde   : > { %1292 = vrot.lane.b32.xlu1 %v4317_v50, %s4033_s27  ;;  %1290 = vrot.lane.b32.xlu0 %v4315_v49, %s4033_s27 }
  0xe2   : > { %1364 = vrot.lane.b32.xlu1 %v4317_v50, %s4034_s28  ;;  %1362 = vrot.lane.b32.xlu0 %v4315_v49, %s4034_s28 }
  0xe6   : > { %1437 = vperm.xlu0 %3996, %v1434_v51  }
 0x138   : > { %v827_v54 = vpop.permute.xlu1 %826  ;;  %v825_v55 = vpop.permute.xlu0 %824 }
 0x139   : > { %v828_v56 = vsel %vm558_vm0, %v825_v55, %v827_v54  ;;  %v829_v57 = vsel %vm558_vm0, %v827_v54, %v825_v55 }
 0x13a   : > { %v838_v59 = vmul.f32 %v4356_v52, %v829_v57  ;;  %v839_v61 = vmul.f32 %v4360_v53, %v828_v56  ;;  %v1098_v57 = vsel %vm848_vm8, %v1092_v40, 0 }
 0x13c   : > { %v808_v63 = vpop.permute.xlu1 %807  ;;  %v806_v0 = vpop.permute.xlu0 %805  ;;  %v843_v1 = vpack.c.bf16 %v839_v61, %v839_v61  ;;  %v842_v2 = vpack.c.bf16 %v838_v59, %v838_v59  ;;  %v4446_v61 = vrot.slane %v4213_v37, %v1226_v43 }
 0x13d   : > { %v809_v5 = vsel %vm532_vm1, %v806_v0, %v808_v63  ;;  %v810_v6 = vsel %vm532_vm1, %v808_v63, %v806_v0  ;;  %v1298_v63 = vsub.s32 7, %v4136_v9 }
 0x13e   : > { %v819_v10 = vmul.f32 %v4370_v60, %v810_v6  ;;  %3847 = vmatprep.subr.msk.bf16.mxu0 %vm848_vm8, %v843_v1  ;;  %v850_v11 = vsel %vm848_vm8, %v842_v2, 0  ;;  %v820_v18 = vmul.f32 %v4375_v13, %v809_v5  ;;  %v4455_v5 = vrot.slane %v4218_v38, %v1226_v43  ;;  %v3854_v6 = vld [vmem:[%s5162_s5 + $0xc] sm:$0xf] }
 0x13f   : > { %856 = vmatpush1.bf16.msra.mxu0 %v850_v11 }
 0x140   : > { %v949_v19 = vpop.permute.xlu1 %948  ;;  %v947_v20 = vpop.permute.xlu0 %946  ;;  %v823_v21 = vpack.c.bf16 %v820_v18, %v820_v18  ;;  %v822_v22 = vpack.c.bf16 %v819_v10, %v819_v10 }
 0x141   : > { %v950_v23 = vsel %vm593_vm2, %v947_v20, %v949_v19  ;;  %v951_v24 = vsel %vm593_vm2, %v949_v19, %v947_v20  ;;  %v4466_v20 = vrot.slane %v4213_v37, %v1298_v63 }
 0x142   : > { %v960_v27 = vmul.f32 %v4382_v7, %v951_v24  ;;  %v961_v30 = vmul.f32 %v4389_v14, %v950_v23  ;;  %3848 = vmatmul.mubr.msk.bf16.vlgmr.msra.gmra.mrb[0].mxu0 %vm844_vm9, %v3846_v62  ;;  %3849 = vmatprep.subr.msk.bf16.mxu1 %vm848_vm8, %v823_v21  ;;  %v900_v31 = vsel %vm848_vm8, %v822_v22, 0  ;;  %v4474_v24 = vrot.slane %v4218_v38, %v1298_v63 }
 0x143   : > { %906 = vmatpush1.bf16.msra.mxu1 %v900_v31  ;;  %1007 = vmatprep.mubr.bf16.mxu0 %v4026_v4 }
 0x144   : > { %v964_v33 = vpack.c.bf16 %v960_v27, %v960_v27  ;;  %v965_v35 = vpack.c.bf16 %v961_v30, %v961_v30  ;;  %v1021_v36 = vpop.permute.xlu1 %1020  ;;  %v1019_v17 = vpop.permute.xlu0 %1018 }
 0x145   : > { %v1022_v41 = vsel %vm626_vm3, %v1019_v17, %v1021_v36  ;;  %v1023_v42 = vsel %vm626_vm3, %v1021_v36, %v1019_v17 }
 0x146   : > { %v1032_v44 = vmul.f32 %v4400_v25, %v1023_v42  ;;  %v1033_v45 = vmul.f32 %v4409_v29, %v1022_v41  ;;  %3850 = vmatmul.mubr.msk.bf16.vlgmr.msra.gmra.mrb[0].mxu1 %vm844_vm9, %v821_v32  ;;  %3852 = vmatprep.subr.msk.bf16.mxu0 %vm848_vm8, %v965_v35  ;;  %v970_v46 = vsel %vm848_vm8, %v964_v33, 0  ;;  %v4482_v32 = vrot.slane %v4299_v15, %v4143_v12 }
 0x147   : > { %976 = vmatpush1.bf16.msra.mxu0 %v970_v46  ;;  %1079 = vmatprep.mubr.bf16.mxu1 %v4026_v4  ;;  %v4490_v35 = vrot.slane %v4304_v16, %v4143_v12 }
 0x148   : > { %v1036_v51 = vpack.c.bf16 %v1032_v44, %v1032_v44  ;;  %v1037_v54 = vpack.c.bf16 %v1033_v45, %v1033_v45  ;;  %v1149_v55 = vpop.permute.xlu1 %1148  ;;  %3858 = vmatprep.subr.msk.bf16.mxu0 %vm848_vm8, %v1093_v39  ;;  %v1147_v56 = vpop.permute.xlu0 %1146  ;;  %v3860_v39 = vld [vmem:[%s5162_s5 + $0x14] sm:$0xf] }
 0x149   : > { %v1150_v58 = vsel %vm671_vm4, %v1147_v56, %v1149_v55  ;;  %v1151_v59 = vsel %vm671_vm4, %v1149_v55, %v1147_v56 }
 0x14a   : > { %v1160_v0 = vmul.f32 %v4424_v28, %v1150_v58  ;;  %v1161_v1 = vmul.f32 %v4433_v47, %v1151_v59  ;;  %3853 = vmatmul.mubr.msk.bf16.vlgmr.msra.gmra.mrb[4].mxu0 %vm844_vm9, %v3851_v48  ;;  %3855 = vmatprep.subr.msk.bf16.mxu1 %vm848_vm8, %v1037_v54  ;;  %v1042_v2 = vsel %vm848_vm8, %v1036_v51, 0  ;;  %v3863_v51 = vld [vmem:[%s5162_s5 + $0x18] sm:$0xf]  ;;  %v3869_v58 = vld [vmem:[%s5162_s5 + $0x20] sm:$0xf] }
 0x14b   : > { %1048 = vmatpush1.bf16.msra.mxu1 %v1042_v2  ;;  %1104 = vmatpush1.bf16.msra.mxu0 %v1098_v57  ;;  %v3866_v57 = vld [vmem:[%s5162_s5 + $0x1c] sm:$0xf] }
 0x14c   : > { %v1164_v8 = vpack.c.bf16 %v1160_v0, %v1160_v0  ;;  %v1165_v10 = vpack.c.bf16 %v1161_v1, %v1161_v1  ;;  %v1221_v11 = vpop.permute.xlu1 %1220  ;;  %v1219_v18 = vpop.permute.xlu0 %1218  ;;  %1135 = vmatprep.mubr.bf16.mxu0 %v4026_v4 }
 0x14d   : > { %v1222_v62 = vsel %vm704_vm5, %v1219_v18, %v1221_v11  ;;  %v1223_v19 = vsel %vm704_vm5, %v1221_v11, %v1219_v18 }
 0x14e   : > { %v1232_v21 = vmul.f32 %v4446_v61, %v1222_v62  ;;  %v1233_v22 = vmul.f32 %v4455_v5, %v1223_v19  ;;  %3856 = vmatmul.mubr.msk.bf16.vlgmr.msra.gmra.mrb[4].mxu1 %vm844_vm9, %v3854_v6  ;;  %3861 = vmatprep.subr.msk.bf16.mxu1 %vm848_vm8, %v1165_v10  ;;  %v1170_v23 = vsel %vm848_vm8, %v1164_v8, 0 }
 0x14f   : > { %1176 = vmatpush1.bf16.msra.mxu1 %v1170_v23  ;;  %1207 = vmatprep.mubr.bf16.mxu1 %v4026_v4 }
 0x150   : > { %v1236_v37 = vpack.c.bf16 %v1232_v21, %v1232_v21  ;;  %v1237_v27 = vpack.c.bf16 %v1233_v22, %v1233_v22  ;;  %v1293_v30 = vpop.permute.xlu1 %1292  ;;  %v1291_v31 = vpop.permute.xlu0 %1290 }
 0x151   : > { %v1294_v33 = vsel %vm737_vm6, %v1291_v31, %v1293_v30  ;;  %v1295_v38 = vsel %vm737_vm6, %v1293_v30, %v1291_v31 }
 0x152   : > { %v1304_v36 = vmul.f32 %v4466_v20, %v1294_v33  ;;  %v1305_v17 = vmul.f32 %v4474_v24, %v1295_v38  ;;  %3859 = vmatmul.mubr.msk.bf16.vlgmr.msra.gmra.mrb[8].mxu0 %vm844_vm9, %v3857_v26  ;;  %3864 = vmatprep.subr.msk.bf16.mxu0 %vm848_vm8, %v1237_v27  ;;  %v1242_v15 = vsel %vm848_vm8, %v1236_v37, 0 }
 0x153   : > { %1248 = vmatpush1.bf16.msra.mxu0 %v1242_v15  ;;  %1279 = vmatprep.mubr.bf16.mxu0 %v4026_v4 }
 0x154   : > { %v1308_v40 = vpack.c.bf16 %v1304_v36, %v1304_v36  ;;  %v1309_v16 = vpack.c.bf16 %v1305_v17, %v1305_v17  ;;  %v1365_v41 = vpop.permute.xlu1 %1364  ;;  %v1363_v42 = vpop.permute.xlu0 %1362 }
 0x155   : > { %v1366_v43 = vsel %vm770_vm7, %v1363_v42, %v1365_v41  ;;  %v1367_v44 = vsel %vm770_vm7, %v1365_v41, %v1363_v42 }
 0x156   : > { %v1376_v45 = vmul.f32 %v4482_v32, %v1366_v43  ;;  %v1377_v46 = vmul.f32 %v4490_v35, %v1367_v44  ;;  %3862 = vmatmul.mubr.msk.bf16.vlgmr.msra.gmra.mrb[8].mxu1 %vm844_vm9, %v3860_v39  ;;  %3867 = vmatprep.subr.msk.bf16.mxu1 %vm848_vm8, %v1309_v16  ;;  %v1314_v48 = vsel %vm848_vm8, %v1308_v40, 0 }
 0x157   : > { %1320 = vmatpush1.bf16.msra.mxu1 %v1314_v48  ;;  %1351 = vmatprep.mubr.bf16.mxu1 %v4026_v4 }
 0x158   : > { %v1380_v54 = vpack.c.bf16 %v1376_v45, %v1376_v45  ;;  %v1381_v55 = vpack.c.bf16 %v1377_v46, %v1377_v46 }
 0x15a   : > { %3865 = vmatmul.mubr.msk.bf16.vlgmr.msra.gmra.mrb[12].mxu0 %vm844_vm9, %v3863_v51  ;;  %3870 = vmatprep.subr.msk.bf16.mxu0 %vm848_vm8, %v1381_v55  ;;  %v1386_v56 = vsel %vm848_vm8, %v1380_v54, 0 }
 0x15b   : > { %1392 = vmatpush1.bf16.msra.mxu0 %v1386_v56  ;;  %1423 = vmatprep.mubr.bf16.mxu0 %v4026_v4 }
 0x15e   : > { %3868 = vmatmul.mubr.msk.bf16.vlgmr.msra.gmra.mrb[12].mxu1 %vm844_vm9, %v3866_v57 }
 0x15f   : > { %1508 = vmatprep.mubr.bf16.mxu1 %v4026_v4 }
 0x162   : > { %3871 = vmatmul.mubr.msk.bf16.vlgmr.msra.gmra.mrb[16].mxu0 %vm844_vm9, %v3869_v58 }
 0x163   : > { %1558 = vmatprep.mubr.bf16.mxu0 %v4026_v4 }
 0x215   : > { %v889_v59 = vpop.f32.mrb[0].mxu0 }
 0x216   : > { %v891_v63 = vpop.f32.mrb[1].mxu0 }
 0x217   : > { %v893_v0 = vpop.f32.mrb[2].mxu0 }
 0x218   : > { %v894_v1 = vpop.f32.mrb[3].mxu0 }
 0x219   : > { %v939_v2 = vpop.f32.mrb[0].mxu1 }
 0x21a   : > { %v940_v6 = vadd.f32 %v939_v2, %v889_v59  ;;  %v941_v8 = vpop.f32.mrb[1].mxu1 }
 0x21b   : > { %v942_v10 = vadd.f32 %v941_v8, %v891_v63  ;;  %v943_v11 = vpop.f32.mrb[2].mxu1 }
 0x21c   : > { %v944_v18 = vpop.f32.mrb[3].mxu1  ;;  %v1438_v11 = vpop.permute.xlu0 %1437 }
 0x21d   : > { %v1009_v62 = vpop.f32.mrb[4].mxu0 }
 0x21e   : > { %v1016_v19 = vadd.f32 %v1009_v62, %v940_v6  ;;  %v1011_v21 = vpop.f32.mrb[5].mxu0 }
 0x21f   : > { %v1017_v22 = vadd.f32 %v1011_v21, %v942_v10  ;;  %v1013_v23 = vpop.f32.mrb[6].mxu0 }
 0x220   : > { %v1014_v26 = vpop.f32.mrb[7].mxu0 }
 0x221   : > { %v1081_v37 = vpop.f32.mrb[4].mxu1 }
 0x222   : > { %v1088_v27 = vadd.f32 %v1081_v37, %v1016_v19  ;;  %v1083_v30 = vpop.f32.mrb[5].mxu1  ;;  %v2007_v37 = vld [vmem:[%s5165_s8] sm:$0xff] }
 0x223   : > { %v1089_v31 = vadd.f32 %v1083_v30, %v1017_v22  ;;  %v1085_v33 = vpop.f32.mrb[6].mxu1 }
 0x224   : > { %v1086_v38 = vpop.f32.mrb[7].mxu1 }
 0x225   : > { %v1137_v36 = vpop.f32.mrb[8].mxu0 }
 0x226   : > { %v1144_v17 = vadd.f32 %v1137_v36, %v1088_v27  ;;  %v1139_v15 = vpop.f32.mrb[9].mxu0 }
 0x227   : > { %v1145_v39 = vadd.f32 %v1139_v15, %v1089_v31  ;;  %v1141_v40 = vpop.f32.mrb[10].mxu0 }
 0x228   : > { %v1142_v16 = vpop.f32.mrb[11].mxu0 }
 0x229   : > { %v1209_v41 = vpop.f32.mrb[8].mxu1 }
 0x22a   : > { %v1216_v42 = vadd.f32 %v1209_v41, %v1144_v17  ;;  %v1211_v43 = vpop.f32.mrb[9].mxu1 }
 0x22b   : > { %v1217_v44 = vadd.f32 %v1211_v43, %v1145_v39  ;;  %v1213_v45 = vpop.f32.mrb[10].mxu1 }
 0x22c   : > { %v1214_v46 = vpop.f32.mrb[11].mxu1 }
 0x22d   : > { %v1281_v48 = vpop.f32.mrb[12].mxu0  ;;  %v3872_v46 = vld [vmem:[%s5164_s7 + $0x4] sm:$0xf] }
 0x22e   : > { %v1288_v51 = vadd.f32 %v1281_v48, %v1216_v42  ;;  %v1283_v54 = vpop.f32.mrb[13].mxu0 }
 0x22f   : > { %v1289_v55 = vadd.f32 %v1283_v54, %v1217_v44  ;;  %v1285_v56 = vpop.f32.mrb[14].mxu0 }
 0x230   : > { %v1286_v57 = vpop.f32.mrb[15].mxu0 }
 0x231   : > { %v1353_v58 = vpop.f32.mrb[12].mxu1 }
 0x232   : > { %v1360_v59 = vadd.f32 %v1353_v58, %v1288_v51  ;;  %v1355_v63 = vpop.f32.mrb[13].mxu1 }
 0x233   : > { %v1361_v0 = vadd.f32 %v1355_v63, %v1289_v55  ;;  %v1357_v1 = vpop.f32.mrb[14].mxu1 }
 0x234   : > { %v1358_v2 = vpop.f32.mrb[15].mxu1 }
 0x235   : > { %v1425_v6 = vpop.f32.mrb[16].mxu0 }
 0x236   : > { %v1432_v8 = vadd.f32 %v1425_v6, %v1360_v59  ;;  %v1427_v10 = vpop.f32.mrb[17].mxu0 }
 0x237   : > { %v1433_v18 = vadd.f32 %v1427_v10, %v1361_v0  ;;  %v1429_v62 = vpop.f32.mrb[18].mxu0  ;;  %v1452_v0 = vld [vmem:[%s5164_s7] sm:$0xf] }
 0x238   : > { %v1440_v19 = vadd.f32 %v1438_v11, %v1432_v8  ;;  %v1430_v21 = vpop.f32.mrb[19].mxu0 }
 0x239   : > { %v1441_v22 = vadd.f32 %v1438_v11, %v1433_v18 }
 0x23a   : > { %v4528_v23 = vmax.f32 %v1440_v19, 0.0 }
 0x23b   : > { %v4530_v26 = vmax.f32 %v1441_v22, 0.0 }
 0x23c   : > { %1455 = vrot.lane.b32.xlu1 %v4528_v23, %s4028_s30  ;;  %v1697_v11 = vpack.c.bf16 %v4528_v23, %v4528_v23 }
 0x23d   : > { %1457 = vrot.lane.b32.xlu0 %v4530_v26, %s4028_s30  ;;  %v1698_v21 = vpack.c.bf16 %v4530_v26, %v4530_v26 }
 0x240   : > { %1444 = vrot.lane.b32.xlu1 %v4528_v23, %s4027_s29 }
 0x241   : > { %1446 = vrot.lane.b32.xlu0 %v4530_v26, %s4027_s29 }
 0x244   : > { %1567 = vrot.lane.b32.xlu1 %v4528_v23, %s4029_s18 }
 0x245   : > { %1569 = vrot.lane.b32.xlu0 %v4530_v26, %s4029_s18 }
 0x248   : > { %1631 = vrot.lane.b32.xlu1 %v4528_v23, %s4030_s22 }
 0x249   : > { %1633 = vrot.lane.b32.xlu0 %v4530_v26, %s4030_s22 }
 0x24c   : > { %1751 = vrot.lane.b32.xlu1 %v4528_v23, %s4031_s23 }
 0x24d   : > { %1753 = vrot.lane.b32.xlu0 %v4530_v26, %s4031_s23 }
 0x250   : > { %1815 = vrot.lane.b32.xlu1 %v4528_v23, %s4032_s14 }
 0x251   : > { %1817 = vrot.lane.b32.xlu0 %v4530_v26, %s4032_s14 }
 0x254   : > { %1879 = vrot.lane.b32.xlu1 %v4528_v23, %s4033_s27 }
 0x255   : > { %1881 = vrot.lane.b32.xlu0 %v4530_v26, %s4033_s27 }
 0x258   : > { %1943 = vrot.lane.b32.xlu1 %v4528_v23, %s4034_s28 }
 0x259   : > { %1945 = vrot.lane.b32.xlu0 %v4530_v26, %s4034_s28 }
 0x25c   : > { %2010 = vperm.xlu1 %4002, %v2007_v37   ;;  %v3877_v37 = vld [vmem:[%s5164_s7 + $0x8] sm:$0xf] }
 0x2ae   : > { %v1456_v27 = vpop.permute.xlu1 %1455 }
 0x2af   : > { %v1458_v30 = vpop.permute.xlu0 %1457 }
 0x2b0   : > { %v1459_v31 = vsel %vm558_vm0, %v1456_v27, %v1458_v30  ;;  %v1460_v33 = vsel %vm558_vm0, %v1458_v30, %v1456_v27 }
 0x2b1   : > { %v1461_v38 = vmul.f32 %v1460_v33, %v4356_v52  ;;  %v1462_v36 = vmul.f32 %v1459_v31, %v4360_v53 }
 0x2b2   : > { %v1445_v17 = vpop.permute.xlu1 %1444 }
 0x2b3   : > { %v1465_v15 = vpack.c.bf16 %v1461_v38, %v1461_v38  ;;  %v1466_v39 = vpack.c.bf16 %v1462_v36, %v1462_v36  ;;  %v1447_v40 = vpop.permute.xlu0 %1446 }
 0x2b4   : > { %v1448_v16 = vsel %vm532_vm1, %v1445_v17, %v1447_v40  ;;  %v1449_v41 = vsel %vm532_vm1, %v1447_v40, %v1445_v17  ;;  %v1703_v17 = vsel %vm848_vm8, %v1697_v11, 0 }
 0x2b5   : > { %v1450_v42 = vmul.f32 %v1449_v41, %v4370_v60  ;;  %v1451_v43 = vmul.f32 %v1448_v16, %v4375_v13  ;;  %3873 = vmatprep.subr.msk.bf16.mxu1 %vm848_vm8, %v1466_v39  ;;  %v1471_v44 = vsel %vm848_vm8, %v1465_v15, 0  ;;  %v3880_v39 = vld [vmem:[%s5164_s7 + $0xc] sm:$0xf] }
 0x2b6   : > { %v1568_v45 = vpop.permute.xlu1 %1567  ;;  %1477 = vmatpush1.bf16.msra.mxu1 %v1471_v44 }
 0x2b7   : > { %v1453_v48 = vpack.c.bf16 %v1450_v42, %v1450_v42  ;;  %v1454_v51 = vpack.c.bf16 %v1451_v43, %v1451_v43  ;;  %v1570_v54 = vpop.permute.xlu0 %1569 }
 0x2b8   : > { %v1571_v55 = vsel %vm593_vm2, %v1568_v45, %v1570_v54  ;;  %v1572_v56 = vsel %vm593_vm2, %v1570_v54, %v1568_v45 }
 0x2b9   : > { %v1573_v57 = vmul.f32 %v1572_v56, %v4382_v7  ;;  %v1574_v58 = vmul.f32 %v1571_v55, %v4389_v14  ;;  %3874 = vmatmul.mubr.msk.bf16.vlgmr.msra.gmra.mrb[16].mxu1 %vm844_vm9, %v3872_v46  ;;  %3875 = vmatprep.subr.msk.bf16.mxu0 %vm848_vm8, %v1454_v51  ;;  %v1521_v59 = vsel %vm848_vm8, %v1453_v48, 0  ;;  %v3883_v51 = vld [vmem:[%s5164_s7 + $0x10] sm:$0xf] }
 0x2ba   : > { %v1632_v63 = vpop.permute.xlu1 %1631  ;;  %1527 = vmatpush1.bf16.msra.mxu0 %v1521_v59  ;;  %1620 = vmatprep.mubr.bf16.mxu1 %v4026_v4 }
 0x2bb   : > { %v1577_v1 = vpack.c.bf16 %v1573_v57, %v1573_v57  ;;  %v1578_v2 = vpack.c.bf16 %v1574_v58, %v1574_v58  ;;  %v1634_v6 = vpop.permute.xlu0 %1633 }
 0x2bc   : > { %v1635_v8 = vsel %vm626_vm3, %v1632_v63, %v1634_v6  ;;  %v1636_v10 = vsel %vm626_vm3, %v1634_v6, %v1632_v63 }
 0x2bd   : > { %v1637_v18 = vmul.f32 %v1636_v10, %v4400_v25  ;;  %v1638_v62 = vmul.f32 %v1635_v8, %v4409_v29  ;;  %3876 = vmatmul.mubr.msk.bf16.vlgmr.msra.gmra.mrb[20].mxu0 %vm844_vm9, %v1452_v0  ;;  %3878 = vmatprep.subr.msk.bf16.mxu1 %vm848_vm8, %v1578_v2  ;;  %v1583_v19 = vsel %vm848_vm8, %v1577_v1, 0  ;;  %v3886_v2 = vld [vmem:[%s5164_s7 + $0x14] sm:$0xf] }
 0x2be   : > { %v1752_v22 = vpop.permute.xlu1 %1751  ;;  %1589 = vmatpush1.bf16.msra.mxu1 %v1583_v19  ;;  %1684 = vmatprep.mubr.bf16.mxu0 %v4026_v4 }
 0x2bf   : > { %v1641_v23 = vpack.c.bf16 %v1637_v18, %v1637_v18  ;;  %v1642_v27 = vpack.c.bf16 %v1638_v62, %v1638_v62  ;;  %v1754_v30 = vpop.permute.xlu0 %1753  ;;  %3884 = vmatprep.subr.msk.bf16.mxu1 %vm848_vm8, %v1698_v21 }
 0x2c0   : > { %v1755_v31 = vsel %vm671_vm4, %v1752_v22, %v1754_v30  ;;  %v1756_v33 = vsel %vm671_vm4, %v1754_v30, %v1752_v22  ;;  %v3889_v22 = vld [vmem:[%s5164_s7 + $0x18] sm:$0xf]  ;;  %v3892_v30 = vld [vmem:[%s5164_s7 + $0x1c] sm:$0xf] }
 0x2c1   : > { %v1757_v26 = vmul.f32 %v1755_v31, %v4424_v28  ;;  %v1758_v38 = vmul.f32 %v1756_v33, %v4433_v47  ;;  %3879 = vmatmul.mubr.msk.bf16.vlgmr.msra.gmra.mrb[20].mxu1 %vm844_vm9, %v3877_v37  ;;  %3881 = vmatprep.subr.msk.bf16.mxu0 %vm848_vm8, %v1642_v27  ;;  %v1647_v36 = vsel %vm848_vm8, %v1641_v23, 0  ;;  %v3895_v31 = vld [vmem:[%s5164_s7 + $0x20] sm:$0xf] }
 0x2c2   : > { %v1816_v15 = vpop.permute.xlu1 %1815  ;;  %1653 = vmatpush1.bf16.msra.mxu0 %v1647_v36  ;;  %1709 = vmatpush1.bf16.msra.mxu1 %v1703_v17 }
 0x2c3   : > { %v1761_v40 = vpack.c.bf16 %v1757_v26, %v1757_v26  ;;  %v1762_v16 = vpack.c.bf16 %v1758_v38, %v1758_v38  ;;  %v1818_v41 = vpop.permute.xlu0 %1817  ;;  %1740 = vmatprep.mubr.bf16.mxu1 %v4026_v4 }
 0x2c4   : > { %v1819_v42 = vsel %vm704_vm5, %v1816_v15, %v1818_v41  ;;  %v1820_v43 = vsel %vm704_vm5, %v1818_v41, %v1816_v15 }
 0x2c5   : > { %v1821_v44 = vmul.f32 %v1819_v42, %v4446_v61  ;;  %v1822_v45 = vmul.f32 %v1820_v43, %v4455_v5  ;;  %3882 = vmatmul.mubr.msk.bf16.vlgmr.msra.gmra.mrb[24].mxu0 %vm844_vm9, %v3880_v39  ;;  %3887 = vmatprep.subr.msk.bf16.mxu0 %vm848_vm8, %v1762_v16  ;;  %v1767_v46 = vsel %vm848_vm8, %v1761_v40, 0 }
 0x2c6   : > { %v1880_v48 = vpop.permute.xlu1 %1879  ;;  %1773 = vmatpush1.bf16.msra.mxu0 %v1767_v46  ;;  %1804 = vmatprep.mubr.bf16.mxu0 %v4026_v4 }
 0x2c7   : > { %v1825_v54 = vpack.c.bf16 %v1821_v44, %v1821_v44  ;;  %v1826_v55 = vpack.c.bf16 %v1822_v45, %v1822_v45  ;;  %v1882_v56 = vpop.permute.xlu0 %1881 }
 0x2c8   : > { %v1883_v57 = vsel %vm737_vm6, %v1880_v48, %v1882_v56  ;;  %v1884_v58 = vsel %vm737_vm6, %v1882_v56, %v1880_v48 }
 0x2c9   : > { %v1885_v59 = vmul.f32 %v1883_v57, %v4466_v20  ;;  %v1886_v63 = vmul.f32 %v1884_v58, %v4474_v24  ;;  %3885 = vmatmul.mubr.msk.bf16.vlgmr.msra.gmra.mrb[24].mxu1 %vm844_vm9, %v3883_v51  ;;  %3890 = vmatprep.subr.msk.bf16.mxu1 %vm848_vm8, %v1826_v55  ;;  %v1831_v0 = vsel %vm848_vm8, %v1825_v54, 0 }
 0x2ca   : > { %v1944_v1 = vpop.permute.xlu1 %1943  ;;  %1837 = vmatpush1.bf16.msra.mxu1 %v1831_v0  ;;  %1868 = vmatprep.mubr.bf16.mxu1 %v4026_v4 }
 0x2cb   : > { %v1889_v6 = vpack.c.bf16 %v1885_v59, %v1885_v59  ;;  %v1890_v8 = vpack.c.bf16 %v1886_v63, %v1886_v63  ;;  %v1946_v10 = vpop.permute.xlu0 %1945 }
 0x2cc   : > { %v1947_v11 = vsel %vm770_vm7, %v1944_v1, %v1946_v10  ;;  %v1948_v18 = vsel %vm770_vm7, %v1946_v10, %v1944_v1 }
 0x2cd   : > { %v1949_v62 = vmul.f32 %v1947_v11, %v4482_v32  ;;  %v1950_v19 = vmul.f32 %v1948_v18, %v4490_v35  ;;  %3888 = vmatmul.mubr.msk.bf16.vlgmr.msra.gmra.mrb[28].mxu0 %vm844_vm9, %v3886_v2  ;;  %3893 = vmatprep.subr.msk.bf16.mxu0 %vm848_vm8, %v1890_v8  ;;  %v1895_v21 = vsel %vm848_vm8, %v1889_v6, 0 }
 0x2ce   : > { %1901 = vmatpush1.bf16.msra.mxu0 %v1895_v21  ;;  %1932 = vmatprep.mubr.bf16.mxu0 %v4026_v4 }
 0x2cf   : > { %v1953_v37 = vpack.c.bf16 %v1949_v62, %v1949_v62  ;;  %v1954_v23 = vpack.c.bf16 %v1950_v19, %v1950_v19 }
 0x2d1   : > { %3891 = vmatmul.mubr.msk.bf16.vlgmr.msra.gmra.mrb[28].mxu1 %vm844_vm9, %v3889_v22  ;;  %3896 = vmatprep.subr.msk.bf16.mxu1 %vm848_vm8, %v1954_v23  ;;  %v1959_v27 = vsel %vm848_vm8, %v1953_v37, 0 }
 0x2d2   : > { %1965 = vmatpush1.bf16.msra.mxu1 %v1959_v27  ;;  %1996 = vmatprep.mubr.bf16.mxu1 %v4026_v4 }
 0x2d5   : > { %3894 = vmatmul.mubr.msk.bf16.vlgmr.msra.gmra.mrb[32].mxu0 %vm844_vm9, %v3892_v30 }
 0x2d6   : > { %2081 = vmatprep.mubr.bf16.mxu0 %v4026_v4 }
 0x2d9   : > { %3897 = vmatmul.mubr.msk.bf16.vlgmr.msra.gmra.mrb[32].mxu1 %vm844_vm9, %v3895_v31 }
 0x2da   : > { %2131 = vmatprep.mubr.bf16.mxu1 %v4026_v4 }
 0x38c   : > { %v1510_v33 = vpop.f32.mrb[16].mxu1 }
 0x38d   : > { %v1512_v26 = vpop.f32.mrb[17].mxu1 }
 0x38e   : > { %v1514_v38 = vpop.f32.mrb[18].mxu1 }
 0x38f   : > { %v1515_v36 = vpop.f32.mrb[19].mxu1 }
 0x390   : > { %v1560_v17 = vpop.f32.mrb[20].mxu0 }
 0x391   : > { %v1561_v15 = vadd.f32 %v1560_v17, %v1510_v33  ;;  %v1562_v39 = vpop.f32.mrb[21].mxu0 }
 0x392   : > { %v1563_v40 = vadd.f32 %v1562_v39, %v1512_v26  ;;  %v1564_v16 = vpop.f32.mrb[22].mxu0 }
 0x393   : > { %v1565_v41 = vpop.f32.mrb[23].mxu0  ;;  %v2011_v16 = vpop.permute.xlu1 %2010 }
 0x394   : > { %v1622_v42 = vpop.f32.mrb[20].mxu1 }
 0x395   : > { %v1629_v43 = vadd.f32 %v1622_v42, %v1561_v15  ;;  %v1624_v44 = vpop.f32.mrb[21].mxu1 }
 0x396   : > { %v1630_v45 = vadd.f32 %v1624_v44, %v1563_v40  ;;  %v1626_v46 = vpop.f32.mrb[22].mxu1 }
 0x397   : > { %v1627_v48 = vpop.f32.mrb[23].mxu1 }
 0x398   : > { %v1686_v51 = vpop.f32.mrb[24].mxu0 }
 0x399   : > { %v1693_v54 = vadd.f32 %v1686_v51, %v1629_v43  ;;  %v1688_v55 = vpop.f32.mrb[25].mxu0 }
 0x39a   : > { %v1694_v56 = vadd.f32 %v1688_v55, %v1630_v45  ;;  %v1690_v57 = vpop.f32.mrb[26].mxu0 }
 0x39b   : > { %v1691_v58 = vpop.f32.mrb[27].mxu0 }
 0x39c   : > { %v1742_v59 = vpop.f32.mrb[24].mxu1 }
 0x39d   : > { %v1749_v63 = vadd.f32 %v1742_v59, %v1693_v54  ;;  %v1744_v0 = vpop.f32.mrb[25].mxu1 }
 0x39e   : > { %v1750_v1 = vadd.f32 %v1744_v0, %v1694_v56  ;;  %v1746_v2 = vpop.f32.mrb[26].mxu1 }
 0x39f   : > { %v1747_v6 = vpop.f32.mrb[27].mxu1 }
 0x3a0   : > { %v1806_v8 = vpop.f32.mrb[28].mxu0 }
 0x3a1   : > { %v1813_v10 = vadd.f32 %v1806_v8, %v1749_v63  ;;  %v1808_v11 = vpop.f32.mrb[29].mxu0 }
 0x3a2   : > { %v1814_v18 = vadd.f32 %v1808_v11, %v1750_v1  ;;  %v1810_v62 = vpop.f32.mrb[30].mxu0 }
 0x3a3   : > { %v1811_v19 = vpop.f32.mrb[31].mxu0 }
 0x3a4   : > { %v1870_v21 = vpop.f32.mrb[28].mxu1 }
 0x3a5   : > { %v1877_v22 = vadd.f32 %v1870_v21, %v1813_v10  ;;  %v1872_v37 = vpop.f32.mrb[29].mxu1 }
 0x3a6   : > { %v1878_v23 = vadd.f32 %v1872_v37, %v1814_v18  ;;  %v1874_v27 = vpop.f32.mrb[30].mxu1  ;;  %v3898_v18 = vld [vmem:[%s5166_s9 + $0x4] sm:$0xf] }
 0x3a7   : > { %v1875_v30 = vpop.f32.mrb[31].mxu1 }
 0x3a8   : > { %v1934_v31 = vpop.f32.mrb[32].mxu0 }
 0x3a9   : > { %v1941_v33 = vadd.f32 %v1934_v31, %v1877_v22  ;;  %v1936_v26 = vpop.f32.mrb[33].mxu0 }
 0x3aa   : > { %v1942_v38 = vadd.f32 %v1936_v26, %v1878_v23  ;;  %v1938_v36 = vpop.f32.mrb[34].mxu0 }
 0x3ab   : > { %v1939_v17 = vpop.f32.mrb[35].mxu0 }
 0x3ac   : > { %v1998_v15 = vpop.f32.mrb[32].mxu1 }
 0x3ad   : > { %v2005_v39 = vadd.f32 %v1998_v15, %v1941_v33  ;;  %v2000_v40 = vpop.f32.mrb[33].mxu1  ;;  %v2025_v33 = vld [vmem:[%s5166_s9] sm:$0xf] }
 0x3ae   : > { %v2006_v41 = vadd.f32 %v2000_v40, %v1942_v38  ;;  %v2002_v42 = vpop.f32.mrb[34].mxu1 }
 0x3af   : > { %v2013_v43 = vadd.f32 %v2011_v16, %v2005_v39  ;;  %v2003_v44 = vpop.f32.mrb[35].mxu1 }
 0x3b0   : > { %v2014_v45 = vadd.f32 %v2011_v16, %v2006_v41  ;;  %v3903_v44 = vld [vmem:[%s5166_s9 + $0x8] sm:$0xf] }
 0x3b1   : > { %v4683_v46 = vadd.f32 %v2013_v43, %v4315_v49  ;;  %v2580_v49 = vld [vmem:[%s5167_s10] sm:$0xff] }
 0x3b2   : > { %v4686_v48 = vadd.f32 %v2014_v45, %v4317_v50 }
 0x3b3   : > { %2028 = vrot.lane.b32.xlu0 %v4683_v46, %s4028_s30  ;;  %v2270_v39 = vpack.c.bf16 %v4683_v46, %v4683_v46 }
 0x3b4   : > { %2030 = vrot.lane.b32.xlu1 %v4686_v48, %s4028_s30  ;;  %v2271_v42 = vpack.c.bf16 %v4686_v48, %v4686_v48 }
 0x3b7   : > { %2017 = vrot.lane.b32.xlu0 %v4683_v46, %s4027_s29 }
 0x3b8   : > { %2019 = vrot.lane.b32.xlu1 %v4686_v48, %s4027_s29 }
 0x3bb   : > { %2140 = vrot.lane.b32.xlu0 %v4683_v46, %s4029_s18 }
 0x3bc   : > { %2142 = vrot.lane.b32.xlu1 %v4686_v48, %s4029_s18 }
 0x3bf   : > { %2204 = vrot.lane.b32.xlu0 %v4683_v46, %s4030_s22 }
 0x3c0   : > { %2206 = vrot.lane.b32.xlu1 %v4686_v48, %s4030_s22 }
 0x3c3   : > { %2324 = vrot.lane.b32.xlu0 %v4683_v46, %s4031_s23 }
 0x3c4   : > { %2326 = vrot.lane.b32.xlu1 %v4686_v48, %s4031_s23 }
 0x3c7   : > { %2388 = vrot.lane.b32.xlu0 %v4683_v46, %s4032_s14 }
 0x3c8   : > { %2390 = vrot.lane.b32.xlu1 %v4686_v48, %s4032_s14 }
 0x3cb   : > { %2452 = vrot.lane.b32.xlu0 %v4683_v46, %s4033_s27 }
 0x3cc   : > { %2454 = vrot.lane.b32.xlu1 %v4686_v48, %s4033_s27 }
 0x3cf   : > { %2516 = vrot.lane.b32.xlu0 %v4683_v46, %s4034_s28 }
 0x3d0   : > { %2518 = vrot.lane.b32.xlu1 %v4686_v48, %s4034_s28 }
 0x3d3   : > { %2583 = vperm.xlu0 %3996, %v2580_v49  }
 0x425   : > { %v2029_v50 = vpop.permute.xlu0 %2028 }
 0x426   : > { %v2031_v51 = vpop.permute.xlu1 %2030 }
 0x427   : > { %v2032_v54 = vsel %vm558_vm0, %v2029_v50, %v2031_v51  ;;  %v2033_v55 = vsel %vm558_vm0, %v2031_v51, %v2029_v50 }
 0x428   : > { %v2034_v56 = vmul.f32 %v2033_v55, %v4356_v52  ;;  %v2035_v57 = vmul.f32 %v2032_v54, %v4360_v53 }
 0x429   : > { %v2018_v58 = vpop.permute.xlu0 %2017 }
 0x42a   : > { %v2038_v59 = vpack.c.bf16 %v2034_v56, %v2034_v56  ;;  %v2039_v63 = vpack.c.bf16 %v2035_v57, %v2035_v57  ;;  %v2020_v0 = vpop.permute.xlu1 %2019 }
 0x42b   : > { %v2021_v1 = vsel %vm532_vm1, %v2018_v58, %v2020_v0  ;;  %v2022_v2 = vsel %vm532_vm1, %v2020_v0, %v2018_v58  ;;  %v2276_v58 = vsel %vm848_vm8, %v2270_v39, 0 }
 0x42c   : > { %v2023_v6 = vmul.f32 %v2022_v2, %v4370_v60  ;;  %v2024_v8 = vmul.f32 %v2021_v1, %v4375_v13  ;;  %3899 = vmatprep.subr.msk.bf16.mxu0 %vm848_vm8, %v2039_v63  ;;  %v2044_v10 = vsel %vm848_vm8, %v2038_v59, 0  ;;  %v3906_v63 = vld [vmem:[%s5166_s9 + $0xc] sm:$0xf] }
 0x42d   : > { %2050 = vmatpush1.bf16.msra.mxu0 %v2044_v10  ;;  %v2141_v11 = vpop.permute.xlu0 %2140 }
 0x42e   : > { %v2026_v62 = vpack.c.bf16 %v2023_v6, %v2023_v6  ;;  %v2027_v19 = vpack.c.bf16 %v2024_v8, %v2024_v8  ;;  %v2143_v21 = vpop.permute.xlu1 %2142 }
 0x42f   : > { %v2144_v22 = vsel %vm593_vm2, %v2141_v11, %v2143_v21  ;;  %v2145_v37 = vsel %vm593_vm2, %v2143_v21, %v2141_v11 }
 0x430   : > { %v2146_v23 = vmul.f32 %v2145_v37, %v4382_v7  ;;  %v2147_v27 = vmul.f32 %v2144_v22, %v4389_v14  ;;  %3900 = vmatmul.mubr.msk.bf16.vlgmr.msra.gmra.mrb[36].mxu0 %vm844_vm9, %v3898_v18  ;;  %3901 = vmatprep.subr.msk.bf16.mxu1 %vm848_vm8, %v2027_v19  ;;  %v2094_v30 = vsel %vm848_vm8, %v2026_v62, 0  ;;  %v3909_v19 = vld [vmem:[%s5166_s9 + $0x10] sm:$0xf] }
 0x431   : > { %2100 = vmatpush1.bf16.msra.mxu1 %v2094_v30  ;;  %v2205_v31 = vpop.permute.xlu0 %2204  ;;  %2193 = vmatprep.mubr.bf16.mxu0 %v4026_v4 }
 0x432   : > { %v2150_v26 = vpack.c.bf16 %v2146_v23, %v2146_v23  ;;  %v2151_v38 = vpack.c.bf16 %v2147_v27, %v2147_v27  ;;  %v2207_v36 = vpop.permute.xlu1 %2206 }
 0x433   : > { %v2208_v17 = vsel %vm626_vm3, %v2205_v31, %v2207_v36  ;;  %v2209_v15 = vsel %vm626_vm3, %v2207_v36, %v2205_v31 }
 0x434   : > { %v2210_v40 = vmul.f32 %v2209_v15, %v4400_v25  ;;  %v2211_v16 = vmul.f32 %v2208_v17, %v4409_v29  ;;  %3902 = vmatmul.mubr.msk.bf16.vlgmr.msra.gmra.mrb[36].mxu1 %vm844_vm9, %v2025_v33  ;;  %3904 = vmatprep.subr.msk.bf16.mxu0 %vm848_vm8, %v2151_v38  ;;  %v2156_v41 = vsel %vm848_vm8, %v2150_v26, 0  ;;  %v3912_v38 = vld [vmem:[%s5166_s9 + $0x14] sm:$0xf] }
 0x435   : > { %2162 = vmatpush1.bf16.msra.mxu0 %v2156_v41  ;;  %v2325_v43 = vpop.permute.xlu0 %2324  ;;  %2257 = vmatprep.mubr.bf16.mxu1 %v4026_v4 }
 0x436   : > { %v2214_v45 = vpack.c.bf16 %v2210_v40, %v2210_v40  ;;  %v2215_v49 = vpack.c.bf16 %v2211_v16, %v2211_v16  ;;  %v2327_v50 = vpop.permute.xlu1 %2326  ;;  %3910 = vmatprep.subr.msk.bf16.mxu0 %vm848_vm8, %v2271_v42 }
 0x437   : > { %v2328_v51 = vsel %vm671_vm4, %v2325_v43, %v2327_v50  ;;  %v2329_v54 = vsel %vm671_vm4, %v2327_v50, %v2325_v43  ;;  %v3915_v43 = vld [vmem:[%s5166_s9 + $0x18] sm:$0xf]  ;;  %v3918_v50 = vld [vmem:[%s5166_s9 + $0x1c] sm:$0xf] }
 0x438   : > { %v2330_v55 = vmul.f32 %v2328_v51, %v4424_v28  ;;  %v2331_v56 = vmul.f32 %v2329_v54, %v4433_v47  ;;  %3905 = vmatmul.mubr.msk.bf16.vlgmr.msra.gmra.mrb[40].mxu0 %vm844_vm9, %v3903_v44  ;;  %3907 = vmatprep.subr.msk.bf16.mxu1 %vm848_vm8, %v2215_v49  ;;  %v2220_v57 = vsel %vm848_vm8, %v2214_v45, 0  ;;  %v3921_v51 = vld [vmem:[%s5166_s9 + $0x20] sm:$0xf] }
 0x439   : > { %2226 = vmatpush1.bf16.msra.mxu1 %v2220_v57  ;;  %v2389_v59 = vpop.permute.xlu0 %2388  ;;  %2282 = vmatpush1.bf16.msra.mxu0 %v2276_v58 }
 0x43a   : > { %v2334_v0 = vpack.c.bf16 %v2330_v55, %v2330_v55  ;;  %v2335_v1 = vpack.c.bf16 %v2331_v56, %v2331_v56  ;;  %v2391_v2 = vpop.permute.xlu1 %2390  ;;  %2313 = vmatprep.mubr.bf16.mxu0 %v4026_v4 }
 0x43b   : > { %v2392_v6 = vsel %vm704_vm5, %v2389_v59, %v2391_v2  ;;  %v2393_v8 = vsel %vm704_vm5, %v2391_v2, %v2389_v59 }
 0x43c   : > { %v2394_v10 = vmul.f32 %v2392_v6, %v4446_v61  ;;  %v2395_v11 = vmul.f32 %v2393_v8, %v4455_v5  ;;  %3908 = vmatmul.mubr.msk.bf16.vlgmr.msra.gmra.mrb[40].mxu1 %vm844_vm9, %v3906_v63  ;;  %3913 = vmatprep.subr.msk.bf16.mxu1 %vm848_vm8, %v2335_v1  ;;  %v2340_v18 = vsel %vm848_vm8, %v2334_v0, 0 }
 0x43d   : > { %2346 = vmatpush1.bf16.msra.mxu1 %v2340_v18  ;;  %v2453_v62 = vpop.permute.xlu0 %2452  ;;  %2377 = vmatprep.mubr.bf16.mxu1 %v4026_v4 }
 0x43e   : > { %v2398_v21 = vpack.c.bf16 %v2394_v10, %v2394_v10  ;;  %v2399_v22 = vpack.c.bf16 %v2395_v11, %v2395_v11  ;;  %v2455_v37 = vpop.permute.xlu1 %2454 }
 0x43f   : > { %v2456_v23 = vsel %vm737_vm6, %v2453_v62, %v2455_v37  ;;  %v2457_v27 = vsel %vm737_vm6, %v2455_v37, %v2453_v62 }
 0x440   : > { %v2458_v30 = vmul.f32 %v2456_v23, %v4466_v20  ;;  %v2459_v31 = vmul.f32 %v2457_v27, %v4474_v24  ;;  %3911 = vmatmul.mubr.msk.bf16.vlgmr.msra.gmra.mrb[44].mxu0 %vm844_vm9, %v3909_v19  ;;  %3916 = vmatprep.subr.msk.bf16.mxu0 %vm848_vm8, %v2399_v22  ;;  %v2404_v33 = vsel %vm848_vm8, %v2398_v21, 0 }
 0x441   : > { %v2517_v26 = vpop.permute.xlu0 %2516  ;;  %2410 = vmatpush1.bf16.msra.mxu0 %v2404_v33  ;;  %2441 = vmatprep.mubr.bf16.mxu0 %v4026_v4 }
 0x442   : > { %v2462_v36 = vpack.c.bf16 %v2458_v30, %v2458_v30  ;;  %v2463_v17 = vpack.c.bf16 %v2459_v31, %v2459_v31  ;;  %v2519_v15 = vpop.permute.xlu1 %2518 }
 0x443   : > { %v2520_v39 = vsel %vm770_vm7, %v2517_v26, %v2519_v15  ;;  %v2521_v40 = vsel %vm770_vm7, %v2519_v15, %v2517_v26 }
 0x444   : > { %v2522_v16 = vmul.f32 %v2520_v39, %v4482_v32  ;;  %v2523_v41 = vmul.f32 %v2521_v40, %v4490_v35  ;;  %3914 = vmatmul.mubr.msk.bf16.vlgmr.msra.gmra.mrb[44].mxu1 %vm844_vm9, %v3912_v38  ;;  %3919 = vmatprep.subr.msk.bf16.mxu1 %vm848_vm8, %v2463_v17  ;;  %v2468_v42 = vsel %vm848_vm8, %v2462_v36, 0 }
 0x445   : > { %2474 = vmatpush1.bf16.msra.mxu1 %v2468_v42  ;;  %2505 = vmatprep.mubr.bf16.mxu1 %v4026_v4 }
 0x446   : > { %v2526_v44 = vpack.c.bf16 %v2522_v16, %v2522_v16  ;;  %v2527_v45 = vpack.c.bf16 %v2523_v41, %v2523_v41 }
 0x448   : > { %3917 = vmatmul.mubr.msk.bf16.vlgmr.msra.gmra.mrb[48].mxu0 %vm844_vm9, %v3915_v43  ;;  %3922 = vmatprep.subr.msk.bf16.mxu0 %vm848_vm8, %v2527_v45  ;;  %v2532_v49 = vsel %vm848_vm8, %v2526_v44, 0 }
 0x449   : > { %2538 = vmatpush1.bf16.msra.mxu0 %v2532_v49  ;;  %2569 = vmatprep.mubr.bf16.mxu0 %v4026_v4 }
 0x44c   : > { %3920 = vmatmul.mubr.msk.bf16.vlgmr.msra.gmra.mrb[48].mxu1 %vm844_vm9, %v3918_v50 }
 0x44d   : > { %2654 = vmatprep.mubr.bf16.mxu1 %v4026_v4 }
 0x450   : > { %3923 = vmatmul.mubr.msk.bf16.vlgmr.msra.gmra.mrb[52].mxu0 %vm844_vm9, %v3921_v51 }
 0x451   : > { %2704 = vmatprep.mubr.bf16.mxu0 %v4026_v4 }
 0x503   : > { %v2083_v54 = vpop.f32.mrb[36].mxu0 }
 0x504   : > { %v2085_v55 = vpop.f32.mrb[37].mxu0 }
 0x505   : > { %v2087_v56 = vpop.f32.mrb[38].mxu0 }
 0x506   : > { %v2088_v57 = vpop.f32.mrb[39].mxu0 }
 0x507   : > { %v2133_v58 = vpop.f32.mrb[36].mxu1 }
 0x508   : > { %v2134_v59 = vadd.f32 %v2133_v58, %v2083_v54  ;;  %v2135_v63 = vpop.f32.mrb[37].mxu1 }
 0x509   : > { %v2136_v0 = vadd.f32 %v2135_v63, %v2085_v55  ;;  %v2137_v1 = vpop.f32.mrb[38].mxu1 }
 0x50a   : > { %v2138_v2 = vpop.f32.mrb[39].mxu1  ;;  %v2584_v1 = vpop.permute.xlu0 %2583 }
 0x50b   : > { %v2195_v6 = vpop.f32.mrb[40].mxu0 }
 0x50c   : > { %v2202_v8 = vadd.f32 %v2195_v6, %v2134_v59  ;;  %v2197_v10 = vpop.f32.mrb[41].mxu0 }
 0x50d   : > { %v2203_v11 = vadd.f32 %v2197_v10, %v2136_v0  ;;  %v2199_v18 = vpop.f32.mrb[42].mxu0 }
 0x50e   : > { %v2200_v62 = vpop.f32.mrb[43].mxu0 }
 0x50f   : > { %v2259_v19 = vpop.f32.mrb[40].mxu1 }
 0x510   : > { %v2266_v21 = vadd.f32 %v2259_v19, %v2202_v8  ;;  %v2261_v22 = vpop.f32.mrb[41].mxu1  ;;  %v3153_v19 = vld [vmem:[%s5169_s12] sm:$0xff] }
 0x511   : > { %v2267_v37 = vadd.f32 %v2261_v22, %v2203_v11  ;;  %v2263_v23 = vpop.f32.mrb[42].mxu1 }
 0x512   : > { %v2264_v27 = vpop.f32.mrb[43].mxu1 }
 0x513   : > { %v2315_v30 = vpop.f32.mrb[44].mxu0 }
 0x514   : > { %v2322_v31 = vadd.f32 %v2315_v30, %v2266_v21  ;;  %v2317_v33 = vpop.f32.mrb[45].mxu0 }
 0x515   : > { %v2323_v26 = vadd.f32 %v2317_v33, %v2267_v37  ;;  %v2319_v38 = vpop.f32.mrb[46].mxu0 }
 0x516   : > { %v2320_v36 = vpop.f32.mrb[47].mxu0 }
 0x517   : > { %v2379_v17 = vpop.f32.mrb[44].mxu1 }
 0x518   : > { %v2386_v15 = vadd.f32 %v2379_v17, %v2322_v31  ;;  %v2381_v39 = vpop.f32.mrb[45].mxu1 }
 0x519   : > { %v2387_v40 = vadd.f32 %v2381_v39, %v2323_v26  ;;  %v2383_v16 = vpop.f32.mrb[46].mxu1 }
 0x51a   : > { %v2384_v41 = vpop.f32.mrb[47].mxu1 }
 0x51b   : > { %v2443_v42 = vpop.f32.mrb[48].mxu0  ;;  %v3924_v41 = vld [vmem:[%s5168_s11 + $0x4] sm:$0xf] }
 0x51c   : > { %v2450_v43 = vadd.f32 %v2443_v42, %v2386_v15  ;;  %v2445_v44 = vpop.f32.mrb[49].mxu0 }
 0x51d   : > { %v2451_v45 = vadd.f32 %v2445_v44, %v2387_v40  ;;  %v2447_v49 = vpop.f32.mrb[50].mxu0 }
 0x51e   : > { %v2448_v50 = vpop.f32.mrb[51].mxu0 }
 0x51f   : > { %v2507_v51 = vpop.f32.mrb[48].mxu1 }
 0x520   : > { %v2514_v54 = vadd.f32 %v2507_v51, %v2450_v43  ;;  %v2509_v55 = vpop.f32.mrb[49].mxu1 }
 0x521   : > { %v2515_v56 = vadd.f32 %v2509_v55, %v2451_v45  ;;  %v2511_v57 = vpop.f32.mrb[50].mxu1 }
 0x522   : > { %v2512_v58 = vpop.f32.mrb[51].mxu1 }
 0x523   : > { %v2571_v59 = vpop.f32.mrb[52].mxu0 }
 0x524   : > { %v2578_v63 = vadd.f32 %v2571_v59, %v2514_v54  ;;  %v2573_v0 = vpop.f32.mrb[53].mxu0 }
 0x525   : > { %v2579_v2 = vadd.f32 %v2573_v0, %v2515_v56  ;;  %v2575_v6 = vpop.f32.mrb[54].mxu0  ;;  %v2598_v56 = vld [vmem:[%s5168_s11] sm:$0xf] }
 0x526   : > { %v2586_v8 = vadd.f32 %v2584_v1, %v2578_v63  ;;  %v2576_v10 = vpop.f32.mrb[55].mxu0 }
 0x527   : > { %v2587_v11 = vadd.f32 %v2584_v1, %v2579_v2 }
 0x528   : > { %v4838_v18 = vmax.f32 %v2586_v8, 0.0 }
 0x529   : > { %v4840_v62 = vmax.f32 %v2587_v11, 0.0 }
 0x52a   : > { %2601 = vrot.lane.b32.xlu1 %v4838_v18, %s4028_s30  ;;  %v2843_v1 = vpack.c.bf16 %v4838_v18, %v4838_v18 }
 0x52b   : > { %2603 = vrot.lane.b32.xlu0 %v4840_v62, %s4028_s30  ;;  %v2844_v10 = vpack.c.bf16 %v4840_v62, %v4840_v62 }
 0x52e   : > { %2590 = vrot.lane.b32.xlu1 %v4838_v18, %s4027_s29 }
 0x52f   : > { %2592 = vrot.lane.b32.xlu0 %v4840_v62, %s4027_s29 }
 0x532   : > { %2713 = vrot.lane.b32.xlu1 %v4838_v18, %s4029_s18 }
 0x533   : > { %2715 = vrot.lane.b32.xlu0 %v4840_v62, %s4029_s18 }
 0x536   : > { %2777 = vrot.lane.b32.xlu1 %v4838_v18, %s4030_s22 }
 0x537   : > { %2779 = vrot.lane.b32.xlu0 %v4840_v62, %s4030_s22 }
 0x53a   : > { %2897 = vrot.lane.b32.xlu1 %v4838_v18, %s4031_s23 }
 0x53b   : > { %2899 = vrot.lane.b32.xlu0 %v4840_v62, %s4031_s23 }
 0x53e   : > { %2961 = vrot.lane.b32.xlu1 %v4838_v18, %s4032_s14 }
 0x53f   : > { %2963 = vrot.lane.b32.xlu0 %v4840_v62, %s4032_s14 }
 0x542   : > { %3025 = vrot.lane.b32.xlu1 %v4838_v18, %s4033_s27 }
 0x543   : > { %3027 = vrot.lane.b32.xlu0 %v4840_v62, %s4033_s27 }
 0x546   : > { %3089 = vrot.lane.b32.xlu1 %v4838_v18, %s4034_s28 }
 0x547   : > { %3091 = vrot.lane.b32.xlu0 %v4840_v62, %s4034_s28 }
 0x54a   : > { %3156 = vperm.xlu1 %4002, %v3153_v19   ;;  %v3929_v19 = vld [vmem:[%s5168_s11 + $0x8] sm:$0xf] }
 0x59c   : > { %v2602_v21 = vpop.permute.xlu1 %2601 }
 0x59d   : > { %v2604_v22 = vpop.permute.xlu0 %2603 }
 0x59e   : > { %v2605_v37 = vsel %vm558_vm0, %v2602_v21, %v2604_v22  ;;  %v2606_v23 = vsel %vm558_vm0, %v2604_v22, %v2602_v21 }
 0x59f   : > { %v2607_v27 = vmul.f32 %v2606_v23, %v4356_v52  ;;  %v2608_v30 = vmul.f32 %v2605_v37, %v4360_v53 }
 0x5a0   : > { %v2591_v31 = vpop.permute.xlu1 %2590 }
 0x5a1   : > { %v2611_v33 = vpack.c.bf16 %v2607_v27, %v2607_v27  ;;  %v2612_v26 = vpack.c.bf16 %v2608_v30, %v2608_v30  ;;  %v2593_v38 = vpop.permute.xlu0 %2592 }
 0x5a2   : > { %v2594_v36 = vsel %vm532_vm1, %v2591_v31, %v2593_v38  ;;  %v2595_v17 = vsel %vm532_vm1, %v2593_v38, %v2591_v31  ;;  %v2849_v31 = vsel %vm848_vm8, %v2843_v1, 0 }
 0x5a3   : > { %v2596_v15 = vmul.f32 %v2595_v17, %v4370_v60  ;;  %v2597_v39 = vmul.f32 %v2594_v36, %v4375_v13  ;;  %3925 = vmatprep.subr.msk.bf16.mxu1 %vm848_vm8, %v2612_v26  ;;  %v2617_v40 = vsel %vm848_vm8, %v2611_v33, 0  ;;  %v3932_v26 = vld [vmem:[%s5168_s11 + $0xc] sm:$0xf] }
 0x5a4   : > { %v2714_v16 = vpop.permute.xlu1 %2713  ;;  %2623 = vmatpush1.bf16.msra.mxu1 %v2617_v40 }
 0x5a5   : > { %v2599_v42 = vpack.c.bf16 %v2596_v15, %v2596_v15  ;;  %v2600_v43 = vpack.c.bf16 %v2597_v39, %v2597_v39  ;;  %v2716_v44 = vpop.permute.xlu0 %2715 }
 0x5a6   : > { %v2717_v45 = vsel %vm593_vm2, %v2714_v16, %v2716_v44  ;;  %v2718_v49 = vsel %vm593_vm2, %v2716_v44, %v2714_v16 }
 0x5a7   : > { %v2719_v50 = vmul.f32 %v2718_v49, %v4382_v7  ;;  %v2720_v51 = vmul.f32 %v2717_v45, %v4389_v14  ;;  %3926 = vmatmul.mubr.msk.bf16.vlgmr.msra.gmra.mrb[52].mxu1 %vm844_vm9, %v3924_v41  ;;  %3927 = vmatprep.subr.msk.bf16.mxu0 %vm848_vm8, %v2600_v43  ;;  %v2667_v54 = vsel %vm848_vm8, %v2599_v42, 0  ;;  %v3935_v43 = vld [vmem:[%s5168_s11 + $0x10] sm:$0xf] }
 0x5a8   : > { %v2778_v55 = vpop.permute.xlu1 %2777  ;;  %2673 = vmatpush1.bf16.msra.mxu0 %v2667_v54  ;;  %2766 = vmatprep.mubr.bf16.mxu1 %v4026_v4 }
 0x5a9   : > { %v2723_v57 = vpack.c.bf16 %v2719_v50, %v2719_v50  ;;  %v2724_v58 = vpack.c.bf16 %v2720_v51, %v2720_v51  ;;  %v2780_v59 = vpop.permute.xlu0 %2779 }
 0x5aa   : > { %v2781_v63 = vsel %vm626_vm3, %v2778_v55, %v2780_v59  ;;  %v2782_v0 = vsel %vm626_vm3, %v2780_v59, %v2778_v55 }
 0x5ab   : > { %v2783_v2 = vmul.f32 %v2782_v0, %v4400_v25  ;;  %v2784_v6 = vmul.f32 %v2781_v63, %v4409_v29  ;;  %3928 = vmatmul.mubr.msk.bf16.vlgmr.msra.gmra.mrb[56].mxu0 %vm844_vm9, %v2598_v56  ;;  %3930 = vmatprep.subr.msk.bf16.mxu1 %vm848_vm8, %v2724_v58  ;;  %v2729_v8 = vsel %vm848_vm8, %v2723_v57, 0  ;;  %v3938_v58 = vld [vmem:[%s5168_s11 + $0x14] sm:$0xf] }
 0x5ac   : > { %v2898_v11 = vpop.permute.xlu1 %2897  ;;  %2735 = vmatpush1.bf16.msra.mxu1 %v2729_v8  ;;  %2830 = vmatprep.mubr.bf16.mxu0 %v4026_v4 }
 0x5ad   : > { %v2787_v18 = vpack.c.bf16 %v2783_v2, %v2783_v2  ;;  %v2788_v21 = vpack.c.bf16 %v2784_v6, %v2784_v6  ;;  %v2900_v22 = vpop.permute.xlu0 %2899  ;;  %3936 = vmatprep.subr.msk.bf16.mxu1 %vm848_vm8, %v2844_v10 }
 0x5ae   : > { %v2901_v37 = vsel %vm671_vm4, %v2898_v11, %v2900_v22  ;;  %v2902_v23 = vsel %vm671_vm4, %v2900_v22, %v2898_v11  ;;  %v3941_v11 = vld [vmem:[%s5168_s11 + $0x18] sm:$0xf]  ;;  %v3944_v22 = vld [vmem:[%s5168_s11 + $0x1c] sm:$0xf] }
 0x5af   : > { %v2903_v62 = vmul.f32 %v2901_v37, %v4424_v28  ;;  %v2904_v27 = vmul.f32 %v2902_v23, %v4433_v47  ;;  %3931 = vmatmul.mubr.msk.bf16.vlgmr.msra.gmra.mrb[56].mxu1 %vm844_vm9, %v3929_v19  ;;  %3933 = vmatprep.subr.msk.bf16.mxu0 %vm848_vm8, %v2788_v21  ;;  %v2793_v30 = vsel %vm848_vm8, %v2787_v18, 0  ;;  %v3947_v37 = vld [vmem:[%s5168_s11 + $0x20] sm:$0xf] }
 0x5b0   : > { %v2962_v33 = vpop.permute.xlu1 %2961  ;;  %2799 = vmatpush1.bf16.msra.mxu0 %v2793_v30  ;;  %2855 = vmatpush1.bf16.msra.mxu1 %v2849_v31 }
 0x5b1   : > { %v2907_v38 = vpack.c.bf16 %v2903_v62, %v2903_v62  ;;  %v2908_v36 = vpack.c.bf16 %v2904_v27, %v2904_v27  ;;  %v2964_v17 = vpop.permute.xlu0 %2963  ;;  %2886 = vmatprep.mubr.bf16.mxu1 %v4026_v4 }
 0x5b2   : > { %v2965_v15 = vsel %vm704_vm5, %v2962_v33, %v2964_v17  ;;  %v2966_v39 = vsel %vm704_vm5, %v2964_v17, %v2962_v33 }
 0x5b3   : > { %v2967_v40 = vmul.f32 %v2965_v15, %v4446_v61  ;;  %v2968_v16 = vmul.f32 %v2966_v39, %v4455_v5  ;;  %3934 = vmatmul.mubr.msk.bf16.vlgmr.msra.gmra.mrb[60].mxu0 %vm844_vm9, %v3932_v26  ;;  %3939 = vmatprep.subr.msk.bf16.mxu0 %vm848_vm8, %v2908_v36  ;;  %v2913_v41 = vsel %vm848_vm8, %v2907_v38, 0 }
 0x5b4   : > { %v3026_v42 = vpop.permute.xlu1 %3025  ;;  %2919 = vmatpush1.bf16.msra.mxu0 %v2913_v41  ;;  %2950 = vmatprep.mubr.bf16.mxu0 %v4026_v4 }
 0x5b5   : > { %v2971_v44 = vpack.c.bf16 %v2967_v40, %v2967_v40  ;;  %v2972_v45 = vpack.c.bf16 %v2968_v16, %v2968_v16  ;;  %v3028_v49 = vpop.permute.xlu0 %3027 }
 0x5b6   : > { %v3029_v50 = vsel %vm737_vm6, %v3026_v42, %v3028_v49  ;;  %v3030_v51 = vsel %vm737_vm6, %v3028_v49, %v3026_v42 }
 0x5b7   : > { %v3031_v54 = vmul.f32 %v3029_v50, %v4466_v20  ;;  %v3032_v55 = vmul.f32 %v3030_v51, %v4474_v24  ;;  %3937 = vmatmul.mubr.msk.bf16.vlgmr.msra.gmra.mrb[60].mxu1 %vm844_vm9, %v3935_v43  ;;  %3942 = vmatprep.subr.msk.bf16.mxu1 %vm848_vm8, %v2972_v45  ;;  %v2977_v56 = vsel %vm848_vm8, %v2971_v44, 0 }
 0x5b8   : > { %v3090_v57 = vpop.permute.xlu1 %3089  ;;  %2983 = vmatpush1.bf16.msra.mxu1 %v2977_v56  ;;  %3014 = vmatprep.mubr.bf16.mxu1 %v4026_v4 }
 0x5b9   : > { %v3035_v59 = vpack.c.bf16 %v3031_v54, %v3031_v54  ;;  %v3036_v63 = vpack.c.bf16 %v3032_v55, %v3032_v55  ;;  %v3092_v0 = vpop.permute.xlu0 %3091 }
 0x5ba   : > { %v3093_v1 = vsel %vm770_vm7, %v3090_v57, %v3092_v0  ;;  %v3094_v2 = vsel %vm770_vm7, %v3092_v0, %v3090_v57 }
 0x5bb   : > { %v3095_v6 = vmul.f32 %v3093_v1, %v4482_v32  ;;  %v3096_v8 = vmul.f32 %v3094_v2, %v4490_v35  ;;  %3940 = vmatmul.mubr.msk.bf16.vlgmr.msra.gmra.mrb[64].mxu0 %vm844_vm9, %v3938_v58  ;;  %3945 = vmatprep.subr.msk.bf16.mxu0 %vm848_vm8, %v3036_v63  ;;  %v3041_v10 = vsel %vm848_vm8, %v3035_v59, 0 }
 0x5bc   : > { %3047 = vmatpush1.bf16.msra.mxu0 %v3041_v10  ;;  %3078 = vmatprep.mubr.bf16.mxu0 %v4026_v4 }
 0x5bd   : > { %v3099_v19 = vpack.c.bf16 %v3095_v6, %v3095_v6  ;;  %v3100_v18 = vpack.c.bf16 %v3096_v8, %v3096_v8 }
 0x5bf   : > { %3943 = vmatmul.mubr.msk.bf16.vlgmr.msra.gmra.mrb[64].mxu1 %vm844_vm9, %v3941_v11  ;;  %3948 = vmatprep.subr.msk.bf16.mxu1 %vm848_vm8, %v3100_v18  ;;  %v3105_v21 = vsel %vm848_vm8, %v3099_v19, 0 }
 0x5c0   : > { %3111 = vmatpush1.bf16.msra.mxu1 %v3105_v21  ;;  %3142 = vmatprep.mubr.bf16.mxu1 %v4026_v4 }
 0x5c3   : > { %3946 = vmatmul.mubr.msk.bf16.vlgmr.msra.gmra.mrb[68].mxu0 %vm844_vm9, %v3944_v22 }
 0x5c4   : > { %3227 = vmatprep.mubr.bf16.mxu0 %v4026_v4 }
 0x5c7   : > { %3949 = vmatmul.mubr.msk.bf16.vlgmr.msra.gmra.mrb[68].mxu1 %vm844_vm9, %v3947_v37 }
 0x5c8   : > { %3277 = vmatprep.mubr.bf16.mxu1 %v4026_v4 }
 0x67a   : > { %v2656_v23 = vpop.f32.mrb[52].mxu1 }
 0x67b   : > { %v2658_v62 = vpop.f32.mrb[53].mxu1 }
 0x67c   : > { %v2660_v27 = vpop.f32.mrb[54].mxu1 }
 0x67d   : > { %v2661_v30 = vpop.f32.mrb[55].mxu1 }
 0x67e   : > { %v2706_v31 = vpop.f32.mrb[56].mxu0 }
 0x67f   : > { %v2707_v33 = vadd.f32 %v2706_v31, %v2656_v23  ;;  %v2708_v26 = vpop.f32.mrb[57].mxu0 }
 0x680   : > { %v2709_v38 = vadd.f32 %v2708_v26, %v2658_v62  ;;  %v2710_v36 = vpop.f32.mrb[58].mxu0 }
 0x681   : > { %v2711_v17 = vpop.f32.mrb[59].mxu0  ;;  %v3157_v36 = vpop.permute.xlu1 %3156 }
 0x682   : > { %v2768_v15 = vpop.f32.mrb[56].mxu1 }
 0x683   : > { %v2775_v39 = vadd.f32 %v2768_v15, %v2707_v33  ;;  %v2770_v40 = vpop.f32.mrb[57].mxu1 }
 0x684   : > { %v2776_v16 = vadd.f32 %v2770_v40, %v2709_v38  ;;  %v2772_v41 = vpop.f32.mrb[58].mxu1 }
 0x685   : > { %v2773_v42 = vpop.f32.mrb[59].mxu1 }
 0x686   : > { %v2832_v43 = vpop.f32.mrb[60].mxu0 }
 0x687   : > { %v2839_v44 = vadd.f32 %v2832_v43, %v2775_v39  ;;  %v2834_v45 = vpop.f32.mrb[61].mxu0 }
 0x688   : > { %v2840_v49 = vadd.f32 %v2834_v45, %v2776_v16  ;;  %v2836_v50 = vpop.f32.mrb[62].mxu0 }
 0x689   : > { %v2837_v51 = vpop.f32.mrb[63].mxu0 }
 0x68a   : > { %v2888_v54 = vpop.f32.mrb[60].mxu1 }
 0x68b   : > { %v2895_v55 = vadd.f32 %v2888_v54, %v2839_v44  ;;  %v2890_v56 = vpop.f32.mrb[61].mxu1 }
 0x68c   : > { %v2896_v57 = vadd.f32 %v2890_v56, %v2840_v49  ;;  %v2892_v58 = vpop.f32.mrb[62].mxu1 }
 0x68d   : > { %v2893_v59 = vpop.f32.mrb[63].mxu1 }
 0x68e   : > { %v2952_v63 = vpop.f32.mrb[64].mxu0 }
 0x68f   : > { %v2959_v0 = vadd.f32 %v2952_v63, %v2895_v55  ;;  %v2954_v1 = vpop.f32.mrb[65].mxu0 }
 0x690   : > { %v2960_v2 = vadd.f32 %v2954_v1, %v2896_v57  ;;  %v2956_v6 = vpop.f32.mrb[66].mxu0 }
 0x691   : > { %v2957_v8 = vpop.f32.mrb[67].mxu0 }
 0x692   : > { %v3016_v10 = vpop.f32.mrb[64].mxu1 }
 0x693   : > { %v3023_v11 = vadd.f32 %v3016_v10, %v2959_v0  ;;  %v3018_v19 = vpop.f32.mrb[65].mxu1  ;;  %v3950_v0 = vld [vmem:[%s5170_s13 + $0x1] sm:$0x1] }
 0x694   : > { %v3024_v18 = vadd.f32 %v3018_v19, %v2960_v2  ;;  %v3020_v21 = vpop.f32.mrb[66].mxu1 }
 0x695   : > { %v3021_v22 = vpop.f32.mrb[67].mxu1 }
 0x696   : > { %v3080_v37 = vpop.f32.mrb[68].mxu0 }
 0x697   : > { %v3087_v23 = vadd.f32 %v3080_v37, %v3023_v11  ;;  %v3082_v62 = vpop.f32.mrb[69].mxu0 }
 0x698   : > { %v3088_v27 = vadd.f32 %v3082_v62, %v3024_v18  ;;  %v3084_v30 = vpop.f32.mrb[70].mxu0  ;;  %v3171_v18 = vld [vmem:[%s5170_s13] sm:$0x1] }
 0x699   : > { %v3085_v31 = vpop.f32.mrb[71].mxu0 }
 0x69a   : > { %v3144_v33 = vpop.f32.mrb[68].mxu1 }
 0x69b   : > { %v3151_v26 = vadd.f32 %v3144_v33, %v3087_v23  ;;  %v3146_v38 = vpop.f32.mrb[69].mxu1 }
 0x69c   : > { %v3152_v17 = vadd.f32 %v3146_v38, %v3088_v27  ;;  %v3148_v15 = vpop.f32.mrb[70].mxu1 }
 0x69d   : > { %v3159_v39 = vadd.f32 %v3157_v36, %v3151_v26  ;;  %v3149_v40 = vpop.f32.mrb[71].mxu1  ;;  %v3955_v26 = vld [vmem:[%s5170_s13 + $0x2] sm:$0x1] }
 0x69e   : > { %v3160_v16 = vadd.f32 %v3157_v36, %v3152_v17 }
 0x69f   : > { %v4993_v41 = vadd.f32 %v3159_v39, %v4683_v46  ;;  %v3726_v46 = vld [vmem:[#allocation2] sm:$0x1] }
 0x6a0   : > { %v4996_v42 = vadd.f32 %v3160_v16, %v4686_v48 }
 0x6a1   : > { %3174 = vrot.lane.b32.xlu0 %v4993_v41, %s4028_s30  ;;  %v3416_v23 = vpack.c.bf16 %v4993_v41, %v4993_v41 }
 0x6a2   : > { %3176 = vrot.lane.b32.xlu1 %v4996_v42, %s4028_s30  ;;  %v3417_v31 = vpack.c.bf16 %v4996_v42, %v4996_v42 }
 0x6a3   : > { %v3422_v16 = vsel %vm848_vm8, %v3416_v23, 0 }
 0x6a5   : > { %3163 = vrot.lane.b32.xlu0 %v4993_v41, %s4027_s29 }
 0x6a6   : > { %3165 = vrot.lane.b32.xlu1 %v4996_v42, %s4027_s29 }
 0x6a9   : > { %3286 = vrot.lane.b32.xlu0 %v4993_v41, %s4029_s18 }
 0x6aa   : > { %3288 = vrot.lane.b32.xlu1 %v4996_v42, %s4029_s18 }
 0x6ad   : > { %3350 = vrot.lane.b32.xlu0 %v4993_v41, %s4030_s22 }
 0x6ae   : > { %3352 = vrot.lane.b32.xlu1 %v4996_v42, %s4030_s22 }
 0x6b1   : > { %3470 = vrot.lane.b32.xlu0 %v4993_v41, %s4031_s23 }
 0x6b2   : > { %3472 = vrot.lane.b32.xlu1 %v4996_v42, %s4031_s23 }
 0x6b5   : > { %3534 = vrot.lane.b32.xlu0 %v4993_v41, %s4032_s14 }
 0x6b6   : > { %3536 = vrot.lane.b32.xlu1 %v4996_v42, %s4032_s14 }
 0x6b9   : > { %3598 = vrot.lane.b32.xlu0 %v4993_v41, %s4033_s27 }
 0x6ba   : > { %3600 = vrot.lane.b32.xlu1 %v4996_v42, %s4033_s27  ;;  %s504_s27 = scalar_lea.vmem %s5158_s1, %s4140_s25 }
 0x6bd   : > { %3662 = vrot.lane.b32.xlu0 %v4993_v41, %s4034_s28 }
 0x6be   : > { %3664 = vrot.lane.b32.xlu1 %v4996_v42, %s4034_s28  ;;  %v3958_v42 = vld [vmem:[%s5170_s13 + $0x3] sm:$0x1] }
 0x6c1   : > { %3729 = vperm.xlu0 %3996, %v3726_v46  }
 0x713   : > { %v3175_v48 = vpop.permute.xlu0 %3174 }
 0x714   : > { %v3177_v43 = vpop.permute.xlu1 %3176 }
 0x715   : > { %v3178_v44 = vsel %vm558_vm0, %v3175_v48, %v3177_v43  ;;  %v3179_v45 = vsel %vm558_vm0, %v3177_v43, %v3175_v48 }
 0x716   : > { %v3180_v49 = vmul.f32 %v3179_v45, %v4356_v52  ;;  %v3181_v50 = vmul.f32 %v3178_v44, %v4360_v53 }
 0x717   : > { %v3164_v51 = vpop.permute.xlu0 %3163 }
 0x718   : > { %v3184_v54 = vpack.c.bf16 %v3180_v49, %v3180_v49  ;;  %v3185_v55 = vpack.c.bf16 %v3181_v50, %v3181_v50  ;;  %v3166_v56 = vpop.permute.xlu1 %3165 }
 0x719   : > { %v3167_v57 = vsel %vm532_vm1, %v3164_v51, %v3166_v56  ;;  %v3168_v58 = vsel %vm532_vm1, %v3166_v56, %v3164_v51  ;;  %v3961_v51 = vld [vmem:[%s5170_s13 + $0x4] sm:$0x1] }
 0x71a   : > { %v3169_v59 = vmul.f32 %v3168_v58, %v4370_v60  ;;  %v3170_v63 = vmul.f32 %v3167_v57, %v4375_v13  ;;  %3951 = vmatprep.subr.msk.bf16.mxu0 %vm848_vm8, %v3185_v55  ;;  %v3190_v52 = vsel %vm848_vm8, %v3184_v54, 0 }
 0x71b   : > { %3196 = vmatpush1.bf16.msra.mxu0 %v3190_v52  ;;  %v3287_v53 = vpop.permute.xlu0 %3286  ;;  %v3964_v52 = vld [vmem:[%s5170_s13 + $0x5] sm:$0x1] }
 0x71c   : > { %v3172_v1 = vpack.c.bf16 %v3169_v59, %v3169_v59  ;;  %v3173_v2 = vpack.c.bf16 %v3170_v63, %v3170_v63  ;;  %v3289_v6 = vpop.permute.xlu1 %3288 }
 0x71d   : > { %v3290_v8 = vsel %vm593_vm2, %v3287_v53, %v3289_v6  ;;  %v3291_v60 = vsel %vm593_vm2, %v3289_v6, %v3287_v53 }
 0x71e   : > { %v3292_v13 = vmul.f32 %v3291_v60, %v4382_v7  ;;  %v3293_v10 = vmul.f32 %v3290_v8, %v4389_v14  ;;  %3952 = vmatmul.mubr.msk.bf16.vlgmr.msra.gmra.mrb[72].mxu0 %vm844_vm9, %v3950_v0  ;;  %3953 = vmatprep.subr.msk.bf16.mxu1 %vm848_vm8, %v3173_v2  ;;  %v3240_v11 = vsel %vm848_vm8, %v3172_v1, 0  ;;  %v3967_v60 = vld [vmem:[%s5170_s13 + $0x6] sm:$0x1] }
 0x71f   : > { %3246 = vmatpush1.bf16.msra.mxu1 %v3240_v11  ;;  %v3351_v19 = vpop.permute.xlu0 %3350  ;;  %3339 = vmatprep.mubr.bf16.mxu0 %v4026_v4 }
 0x720   : > { %v3296_v21 = vpack.c.bf16 %v3292_v13, %v3292_v13  ;;  %v3297_v22 = vpack.c.bf16 %v3293_v10, %v3293_v10  ;;  %v3353_v37 = vpop.permute.xlu1 %3352  ;;  %v3973_v10 = vld [vmem:[%s5170_s13 + $0x8] sm:$0x1] }
 0x721   : > { %v3354_v7 = vsel %vm626_vm3, %v3351_v19, %v3353_v37  ;;  %v3355_v14 = vsel %vm626_vm3, %v3353_v37, %v3351_v19 }
 0x722   : > { %v3356_v62 = vmul.f32 %v3355_v14, %v4400_v25  ;;  %v3357_v27 = vmul.f32 %v3354_v7, %v4409_v29  ;;  %3954 = vmatmul.mubr.msk.bf16.vlgmr.msra.gmra.mrb[72].mxu1 %vm844_vm9, %v3171_v18  ;;  %3956 = vmatprep.subr.msk.bf16.mxu0 %vm848_vm8, %v3297_v22  ;;  %v3302_v30 = vsel %vm848_vm8, %v3296_v21, 0 }
 0x723   : > { %3308 = vmatpush1.bf16.msra.mxu0 %v3302_v30  ;;  %v3471_v33 = vpop.permute.xlu0 %3470  ;;  %3403 = vmatprep.mubr.bf16.mxu1 %v4026_v4 }
 0x724   : > { %v3360_v25 = vpack.c.bf16 %v3356_v62, %v3356_v62  ;;  %v3361_v38 = vpack.c.bf16 %v3357_v27, %v3357_v27  ;;  %v3473_v29 = vpop.permute.xlu1 %3472  ;;  %3962 = vmatprep.subr.msk.bf16.mxu0 %vm848_vm8, %v3417_v31 }
 0x725   : > { %v3474_v36 = vsel %vm671_vm4, %v3471_v33, %v3473_v29  ;;  %v3475_v17 = vsel %vm671_vm4, %v3473_v29, %v3471_v33 }
 0x726   : > { %v3476_v15 = vmul.f32 %v3474_v36, %v4424_v28  ;;  %v3477_v39 = vmul.f32 %v3475_v17, %v4433_v47  ;;  %3957 = vmatmul.mubr.msk.bf16.vlgmr.msra.gmra.mrb[76].mxu0 %vm844_vm9, %v3955_v26  ;;  %3959 = vmatprep.subr.msk.bf16.mxu1 %vm848_vm8, %v3361_v38  ;;  %v3366_v40 = vsel %vm848_vm8, %v3360_v25, 0 }
 0x727   : > { %3372 = vmatpush1.bf16.msra.mxu1 %v3366_v40  ;;  %v3535_v41 = vpop.permute.xlu0 %3534  ;;  %3428 = vmatpush1.bf16.msra.mxu0 %v3422_v16 }
 0x728   : > { %v3480_v46 = vpack.c.bf16 %v3476_v15, %v3476_v15  ;;  %v3481_v48 = vpack.c.bf16 %v3477_v39, %v3477_v39  ;;  %v3537_v28 = vpop.permute.xlu1 %3536  ;;  %3459 = vmatprep.mubr.bf16.mxu0 %v4026_v4 }
 0x729   : > { %v3538_v47 = vsel %vm704_vm5, %v3535_v41, %v3537_v28  ;;  %v3539_v43 = vsel %vm704_vm5, %v3537_v28, %v3535_v41 }
 0x72a   : > { %v3540_v44 = vmul.f32 %v3538_v47, %v4446_v61  ;;  %v3541_v45 = vmul.f32 %v3539_v43, %v4455_v5  ;;  %3960 = vmatmul.mubr.msk.bf16.vlgmr.msra.gmra.mrb[76].mxu1 %vm844_vm9, %v3958_v42  ;;  %3965 = vmatprep.subr.msk.bf16.mxu1 %vm848_vm8, %v3481_v48  ;;  %v3486_v49 = vsel %vm848_vm8, %v3480_v46, 0 }
 0x72b   : > { %3492 = vmatpush1.bf16.msra.mxu1 %v3486_v49  ;;  %v3599_v50 = vpop.permute.xlu0 %3598  ;;  %3523 = vmatprep.mubr.bf16.mxu1 %v4026_v4 }
 0x72c   : > { %v3544_v54 = vpack.c.bf16 %v3540_v44, %v3540_v44  ;;  %v3545_v55 = vpack.c.bf16 %v3541_v45, %v3541_v45  ;;  %v3601_v56 = vpop.permute.xlu1 %3600 }
 0x72d   : > { %v3602_v61 = vsel %vm737_vm6, %v3599_v50, %v3601_v56  ;;  %v3603_v5 = vsel %vm737_vm6, %v3601_v56, %v3599_v50 }
 0x72e   : > { %v3604_v57 = vmul.f32 %v3602_v61, %v4466_v20  ;;  %v3605_v58 = vmul.f32 %v3603_v5, %v4474_v24  ;;  %3963 = vmatmul.mubr.msk.bf16.vlgmr.msra.gmra.mrb[80].mxu0 %vm844_vm9, %v3961_v51  ;;  %3968 = vmatprep.subr.msk.bf16.mxu0 %vm848_vm8, %v3545_v55  ;;  %v3550_v59 = vsel %vm848_vm8, %v3544_v54, 0 }
 0x72f   : > { %v3663_v63 = vpop.permute.xlu0 %3662  ;;  %3556 = vmatpush1.bf16.msra.mxu0 %v3550_v59  ;;  %3587 = vmatprep.mubr.bf16.mxu0 %v4026_v4 }
 0x730   : > { %v3608_v53 = vpack.c.bf16 %v3604_v57, %v3604_v57  ;;  %v3609_v0 = vpack.c.bf16 %v3605_v58, %v3605_v58  ;;  %v3665_v1 = vpop.permute.xlu1 %3664 }
 0x731   : > { %v3666_v20 = vsel %vm770_vm7, %v3663_v63, %v3665_v1  ;;  %v3667_v24 = vsel %vm770_vm7, %v3665_v1, %v3663_v63  ;;  %v4035_v63 = vmov 1966171168  }
 0x732   : > { %v3668_v2 = vmul.f32 %v3666_v20, %v4482_v32  ;;  %v3669_v6 = vmul.f32 %v3667_v24, %v4490_v35  ;;  %3966 = vmatmul.mubr.msk.bf16.vlgmr.msra.gmra.mrb[80].mxu1 %vm844_vm9, %v3964_v52  ;;  %3971 = vmatprep.subr.msk.bf16.mxu1 %vm848_vm8, %v3609_v0  ;;  %v3614_v8 = vsel %vm848_vm8, %v3608_v53, 0  ;;  %v3970_v35 = vld [vmem:[%s5170_s13 + $0x7] sm:$0x1]  ;;  %v3745_v52 = vunpack.c.l.s4 %v4035_v63 }
 0x733   : > { %3620 = vmatpush1.bf16.msra.mxu1 %v3614_v8  ;;  %3651 = vmatprep.mubr.bf16.mxu1 %v4026_v4 }
 0x734   : > { %v3672_v13 = vpack.c.bf16 %v3668_v2, %v3668_v2  ;;  %v3673_v34 = vpack.c.bf16 %v3669_v6, %v3669_v6  ;;  %v3746_v8 = vunpack.c.0.s8 %v3745_v52 }
 0x736   : > { %3969 = vmatmul.mubr.msk.bf16.vlgmr.msra.gmra.mrb[84].mxu0 %vm844_vm9, %v3967_v60  ;;  %3974 = vmatprep.subr.msk.bf16.mxu0 %vm848_vm8, %v3673_v34  ;;  %v3678_v32 = vsel %vm848_vm8, %v3672_v13, 0 }
 0x737   : > { %3684 = vmatpush1.bf16.msra.mxu0 %v3678_v32  ;;  %3715 = vmatprep.mubr.bf16.mxu0 %v4026_v4 }
 0x73a   : > { %3972 = vmatmul.mubr.msk.bf16.vlgmr.msra.gmra.mrb[84].mxu1 %vm844_vm9, %v3970_v35 }
 0x73e   : > { %3975 = vmatmul.mubr.msk.bf16.vlgmr.msra.gmra.mrb[88].mxu0 %vm844_vm9, %v3973_v10 }
 0x740   : > { %v3730_v58 = vpop.permute.xlu0 %3729 }
 0x741   : > { %v3735_v20 = vrot.slane %v3730_v58, %v4143_v12  ;;  %v3740_v12 = vld [vmem:[%s504_s27] sm:$0x3] }
 0x7f1   : > { %v3229_v11 = vpop.f32.mrb[72].mxu0 }
 0x7f2   : > { %v3231_v19 = vpop.f32.mrb[73].mxu0 }
 0x7f3   : > { %v3233_v18 = vpop.f32.mrb[74].mxu0 }
 0x7f4   : > { %v3234_v21 = vpop.f32.mrb[75].mxu0 }
 0x7f5   : > { %v3279_v22 = vpop.f32.mrb[72].mxu1 }
 0x7f6   : > { %v3280_v37 = vadd.f32 %v3279_v22, %v3229_v11  ;;  %v3281_v7 = vpop.f32.mrb[73].mxu1  ;;  %v3749_v11 = vsub.s32 %v3746_v8, %v4136_v9 }
 0x7f7   : > { %v3282_v14 = vadd.f32 %v3281_v7, %v3231_v19  ;;  %v3283_v23 = vpop.f32.mrb[74].mxu1 }
 0x7f8   : > { %v3284_v62 = vpop.f32.mrb[75].mxu1 }
 0x7f9   : > { %v3341_v27 = vpop.f32.mrb[76].mxu0 }
 0x7fa   : > { %v3348_v4 = vadd.f32 %v3341_v27, %v3280_v37  ;;  %v3343_v30 = vpop.f32.mrb[77].mxu0 }
 0x7fb   : > { %v3349_v31 = vadd.f32 %v3343_v30, %v3282_v14  ;;  %v3345_v33 = vpop.f32.mrb[78].mxu0 }
 0x7fc   : > { %v3346_v26 = vpop.f32.mrb[79].mxu0 }
 0x7fd   : > { %v3405_v25 = vpop.f32.mrb[76].mxu1 }
 0x7fe   : > { %v3412_v38 = vadd.f32 %v3405_v25, %v3348_v4  ;;  %v3407_v29 = vpop.f32.mrb[77].mxu1 }
 0x7ff   : > { %v3413_v36 = vadd.f32 %v3407_v29, %v3349_v31  ;;  %v3409_v17 = vpop.f32.mrb[78].mxu1 }
 0x800   : > { %v3410_v15 = vpop.f32.mrb[79].mxu1 }
 0x801   : > { %v3461_v39 = vpop.f32.mrb[80].mxu0 }
 0x802   : > { %v3468_v40 = vadd.f32 %v3461_v39, %v3412_v38  ;;  %v3463_v16 = vpop.f32.mrb[81].mxu0 }
 0x803   : > { %v3469_v41 = vadd.f32 %v3463_v16, %v3413_v36  ;;  %v3465_v42 = vpop.f32.mrb[82].mxu0 }
 0x804   : > { %v3466_v46 = vpop.f32.mrb[83].mxu0 }
 0x805   : > { %v3525_v48 = vpop.f32.mrb[80].mxu1 }
 0x806   : > { %v3532_v28 = vadd.f32 %v3525_v48, %v3468_v40  ;;  %v3527_v47 = vpop.f32.mrb[81].mxu1 }
 0x807   : > { %v3533_v43 = vadd.f32 %v3527_v47, %v3469_v41  ;;  %v3529_v44 = vpop.f32.mrb[82].mxu1 }
 0x808   : > { %v3530_v45 = vpop.f32.mrb[83].mxu1 }
 0x809   : > { %v3589_v49 = vpop.f32.mrb[84].mxu0 }
 0x80a   : > { %v3596_v50 = vadd.f32 %v3589_v49, %v3532_v28  ;;  %v3591_v51 = vpop.f32.mrb[85].mxu0 }
 0x80b   : > { %v3597_v54 = vadd.f32 %v3591_v51, %v3533_v43  ;;  %v3593_v55 = vpop.f32.mrb[86].mxu0 }
 0x80c   : > { %v3594_v56 = vpop.f32.mrb[87].mxu0 }
 0x80d   : > { %v3653_v61 = vpop.f32.mrb[84].mxu1 }
 0x80e   : > { %v3660_v5 = vadd.f32 %v3653_v61, %v3596_v50  ;;  %v3655_v57 = vpop.f32.mrb[85].mxu1 }
 0x80f   : > { %v3661_v59 = vadd.f32 %v3655_v57, %v3597_v54  ;;  %v3657_v53 = vpop.f32.mrb[86].mxu1 }
 0x810   : > { %v3658_v0 = vpop.f32.mrb[87].mxu1 }
 0x811   : > { %v3717_v1 = vpop.f32.mrb[88].mxu0 }
 0x812   : > { %v3724_v24 = vadd.f32 %v3717_v1, %v3660_v5  ;;  %v3719_v2 = vpop.f32.mrb[89].mxu0 }
 0x813   : > { %v3725_v6 = vadd.f32 %v3719_v2, %v3661_v59  ;;  %v3721_v60 = vpop.f32.mrb[90].mxu0 }
 0x814   : > { %v3736_v13 = vadd.f32 %v3735_v20, %v3724_v24  ;;  %v3722_v34 = vpop.f32.mrb[91].mxu0 }
 0x815   : > { %v3737_v32 = vadd.f32 %v3735_v20, %v3725_v6 }
 0x816   : > { %v3738_v35 = vmax.f32 %v3736_v13, 0.0 }
 0x817   : > { %v3739_v10 = vmax.f32 %v3737_v32, 0.0 }
 0x819   : > { %v3743_v19 = vcombine.low %v3738_v35, %v3739_v10 }
 0x81b   : > { %v3750_v18 = vrot.slane %v3743_v19, %v3749_v11 }
 0x81d   : > { %v3757_v21 = vrot.slane %v3750_v18, %v3749_v11 }
 0x81f   : > { %v3759_v22 = vadd.f32 %v3757_v21, %v3740_v12 }
 0x821   : > { %3764 = vst.msk [vmem:[%s508_s17] sm:$0x3] %vm3762_vm10, %v3759_v22 }
 0x822 PF: > { %s27_s20 = sadd.s32 1, %s4024_s20  }
 0x823   : > { %p24_p4 = scmp.ge.s32.totalorder %s27_s20, 4  }
 0x825   :  { %26 = sbr.rel (!%p24_p4) target bundleno = 3 (0x3), region = 161 }

</bundles_post_ra>
